<compile_context>
chip_gen: v6e
topology: v6e:2x2x1
jax: 0.10.0
libtpu: 0.0.40
codegen_flags: <defaults>
</compile_context>

<pallas_src>
import functools

import jax
import jax.numpy as jnp
from jax.experimental import pallas as pl
from jax.experimental.pallas import tpu as pltpu

EPS = 1e-5
VMEM_LIMIT_BYTES = 32 * 1024 * 1024   # safe on v5e/v6e (128 MiB) and v7x (64 MiB)


# ----------------------------------------------------------------------------
# small helpers (trace-time / plain jnp glue)
# ----------------------------------------------------------------------------
def _round_up(x, m):
    return (x + m - 1) // m * m


def _row_tiling(R, max_tile=512):
    """Pick a row tile (multiple of 8, <= max_tile) and the padded row count."""
    if R <= max_tile:
        tr = _round_up(R, 8)
    else:
        tr = max_tile
        for t in (512, 256, 128, 64, 32, 16, 8):
            if R % t == 0:
                tr = t
                break
    return tr, _round_up(R, tr)


def _pad_rows(a, rp):
    r = a.shape[0]
    return a if r == rp else jnp.pad(a, ((0, rp - r), (0, 0)))


def _block_diag_weight(w_oi, groups, dtype):
    """PyTorch grouped 1x1 weight (Cout, Cin//groups) -> dense (Cin, Cout)."""
    cout, _ = w_oi.shape
    og = cout // groups
    blocks = [w_oi[g * og:(g + 1) * og, :].T for g in range(groups)]
    w = blocks[0] if groups == 1 else jax.scipy.linalg.block_diag(*blocks)
    return w.astype(dtype)


def _bn_scale_shift(stats, count, gamma, beta):
    """Partial stats (T, 8, C) -> packed (2, C): row0 = scale, row1 = shift."""
    s = jnp.sum(stats[:, 0, :], axis=0)
    ss = jnp.sum(stats[:, 1, :], axis=0)
    mean = s / count
    var = jnp.maximum(ss / count - mean * mean, 0.0)
    a = gamma * jax.lax.rsqrt(var + EPS)
    return jnp.stack([a, beta - mean * a], axis=0).astype(jnp.float32)


# ----------------------------------------------------------------------------
# kernels
# ----------------------------------------------------------------------------
def _stats_block(y):
    """(TR, C) f32 -> (1, 8, C): rows 0/1 = sum / sum-of-squares, rest zero."""
    s = jnp.sum(y, axis=0, keepdims=True)
    ss = jnp.sum(y * y, axis=0, keepdims=True)
    pad = jnp.zeros((6, y.shape[-1]), jnp.float32)
    return jnp.concatenate([s, ss, pad], axis=0)[None]


def pw_conv_stats_kernel(x_ref, w_ref, y_ref, st_ref):
    """1x1 conv tile: y = x @ W (bf16 in, f32 acc) + per-tile (sum, sumsq).

    Zero-padded rows of x contribute exactly zero to the statistics."""
    y = jnp.dot(x_ref[...], w_ref[...], preferred_element_type=jnp.float32)
    st_ref[...] = _stats_block(y)
    y_ref[...] = y.astype(y_ref.dtype)


def pw_norm_conv_stats_kernel(x_ref, s_ref, w_ref, y_ref, st_ref, *, n_rows):
    """Fused BN(prev conv)+ReLU on the input tile, then matmul + stats."""
    tr = x_ref.shape[0]
    row = pl.program_id(0) * tr + jax.lax.broadcasted_iota(jnp.int32, (tr, 1), 0)
    a = s_ref[0:1, :]
    c = s_ref[1:2, :]
    z = jnp.maximum(x_ref[...].astype(jnp.float32) * a + c, 0.0)
    z = jnp.where(row < n_rows, z, 0.0)         # keep padded rows out of stats
    y = jnp.dot(z.astype(jnp.bfloat16), w_ref[...],
                preferred_element_type=jnp.float32)
    st_ref[...] = _stats_block(y)
    y_ref[...] = y.astype(y_ref.dtype)


def dw_conv_stats_kernel(x_ref, s_ref, w_ref, y_ref, st_ref, buf, *, K, S, pad):
    """Depthwise KxK / stride S with fused input BN+ReLU; zero pad in VMEM.

    x_ref: (1, H, W, CB) raw conv1 output (bf16)
    s_ref: (2, CB)       BN1 scale / shift
    w_ref: (K*K, CB)     depthwise taps
    buf:   (1, H+2p, W+2p, CB) f32 scratch (zero-padded, normalized input)
    """
    _, H, W, CB = x_ref.shape
    _, Ho, Wo, _ = y_ref.shape
    a = s_ref[0:1, :]
    c = s_ref[1:2, :]
    z = jnp.maximum(x_ref[...].astype(jnp.float32) * a + c, 0.0)
    if pad > 0:
        buf[...] = jnp.zeros_like(buf)
    buf[:, pad:pad + H, pad:pad + W, :] = z

    acc = jnp.zeros((1, Ho, Wo, CB), jnp.float32)
    for i in range(K):
        for j in range(K):
            if S == 1:
                patch = buf[:, i:i + Ho, j:j + Wo, :]
            else:
                patch = buf[:, pl.ds(i, Ho, S), pl.ds(j, Wo, S), :]
            acc = acc + patch * w_ref[i * K + j, :]

    st_ref[...] = _stats_block(acc.reshape(Ho * Wo, CB))
    y_ref[...] = acc.astype(y_ref.dtype)


def finalize_identity_kernel(y_ref, s_ref, sc_ref, o_ref):
    """out = relu(bn3(conv3)) + identity shortcut."""
    a = s_ref[0:1, :]
    c = s_ref[1:2, :]
    y = jnp.maximum(y_ref[...].astype(jnp.float32) * a + c, 0.0)
    o_ref[...] = (y + sc_ref[...].astype(jnp.float32)).astype(o_ref.dtype)


def finalize_proj_kernel(y_ref, s_ref, ys_ref, ss_ref, o_ref):
    """out = relu(bn3(conv3)) + relu(bn_s(conv_s))  (projection shortcut)."""
    a = s_ref[0:1, :]
    c = s_ref[1:2, :]
    y = jnp.maximum(y_ref[...].astype(jnp.float32) * a + c, 0.0)
    a2 = ss_ref[0:1, :]
    c2 = ss_ref[1:2, :]
    sc = jnp.maximum(ys_ref[...].astype(jnp.float32) * a2 + c2, 0.0)
    o_ref[...] = (y + sc).astype(o_ref.dtype)


# ----------------------------------------------------------------------------
# pallas_call wrappers
# ----------------------------------------------------------------------------
def _compiler_params(n_axes):
    return pltpu.CompilerParams(
        dimension_semantics=("parallel",) * n_axes,
        vmem_limit_bytes=VMEM_LIMIT_BYTES)


def pw_conv_stats(x_flat, w, out_dtype):
    R, Cin = x_flat.shape
    Cout = w.shape[1]
    TR, Rp = _row_tiling(R)
    nt = Rp // TR
    y, st = pl.pallas_call(
        pw_conv_stats_kernel,
        out_shape=(jax.ShapeDtypeStruct((Rp, Cout), out_dtype),
                   jax.ShapeDtypeStruct((nt, 8, Cout), jnp.float32)),
        grid=(nt,),
        in_specs=[pl.BlockSpec((TR, Cin), lambda i: (i, 0)),
                  pl.BlockSpec((Cin, Cout), lambda i: (0, 0))],
        out_specs=(pl.BlockSpec((TR, Cout), lambda i: (i, 0)),
                   pl.BlockSpec((1, 8, Cout), lambda i: (i, 0, 0))),
        compiler_params=_compiler_params(1),
    )(_pad_rows(x_flat, Rp), w)
    return (y if Rp == R else y[:R]), st


def pw_norm_conv_stats(x_flat, s, w, out_dtype):
    R, Cin = x_flat.shape
    Cout = w.shape[1]
    TR, Rp = _row_tiling(R)
    nt = Rp // TR
    kern = functools.partial(pw_norm_conv_stats_kernel, n_rows=R)
    y, st = pl.pallas_call(
        kern,
        out_shape=(jax.ShapeDtypeStruct((Rp, Cout), out_dtype),
                   jax.ShapeDtypeStruct((nt, 8, Cout), jnp.float32)),
        grid=(nt,),
        in_specs=[pl.BlockSpec((TR, Cin), lambda i: (i, 0)),
                  pl.BlockSpec((2, Cin), lambda i: (0, 0)),
                  pl.BlockSpec((Cin, Cout), lambda i: (0, 0))],
        out_specs=(pl.BlockSpec((TR, Cout), lambda i: (i, 0)),
                   pl.BlockSpec((1, 8, Cout), lambda i: (i, 0, 0))),
        compiler_params=_compiler_params(1),
    )(_pad_rows(x_flat, Rp), s, w)
    return (y if Rp == R else y[:R]), st


def dw_conv_stats(x_nhwc, s, w_kk_c, K, S):
    N, H, W, C = x_nhwc.shape
    pad = (K - 1) // 2
    Ho = (H + 2 * pad - K) // S + 1
    Wo = (W + 2 * pad - K) // S + 1
    CB = 128 if C % 128 == 0 else C
    ncb = C // CB
    kern = functools.partial(dw_conv_stats_kernel, K=K, S=S, pad=pad)
    return pl.pallas_call(
        kern,
        out_shape=(jax.ShapeDtypeStruct((N, Ho, Wo, C), jnp.bfloat16),
                   jax.ShapeDtypeStruct((N, 8, C), jnp.float32)),
        grid=(N, ncb),
        in_specs=[pl.BlockSpec((1, H, W, CB), lambda n, c: (n, 0, 0, c)),
                  pl.BlockSpec((2, CB), lambda n, c: (0, c)),
                  pl.BlockSpec((K * K, CB), lambda n, c: (0, c))],
        out_specs=(pl.BlockSpec((1, Ho, Wo, CB), lambda n, c: (n, 0, 0, c)),
                   pl.BlockSpec((1, 8, CB), lambda n, c: (n, 0, c))),
        scratch_shapes=[pltpu.VMEM((1, H + 2 * pad, W + 2 * pad, CB), jnp.float32)],
        compiler_params=_compiler_params(2),
    )(x_nhwc, s, w_kk_c)


def finalize(y3, s3, sc, ss=None):
    R, Cout = y3.shape
    TR, Rp = _row_tiling(R)
    nt = Rp // TR
    row_spec = pl.BlockSpec((TR, Cout), lambda i: (i, 0))
    vec_spec = pl.BlockSpec((2, Cout), lambda i: (0, 0))
    if ss is None:
        out = pl.pallas_call(
            finalize_identity_kernel,
            out_shape=jax.ShapeDtypeStruct((Rp, Cout), jnp.float32),
            grid=(nt,),
            in_specs=[row_spec, vec_spec, row_spec],
            out_specs=row_spec,
            compiler_params=_compiler_params(1),
        )(_pad_rows(y3, Rp), s3, _pad_rows(sc, Rp))
    else:
        out = pl.pallas_call(
            finalize_proj_kernel,
            out_shape=jax.ShapeDtypeStruct((Rp, Cout), jnp.float32),
            grid=(nt,),
            in_specs=[row_spec, vec_spec, row_spec, vec_spec],
            out_specs=row_spec,
            compiler_params=_compiler_params(1),
        )(_pad_rows(y3, Rp), s3, _pad_rows(sc, Rp), ss)
    return out if Rp == R else out[:R]


# ----------------------------------------------------------------------------
# full FBNetUnit forward (NCHW in / NCHW out, like the PyTorch module)
# ----------------------------------------------------------------------------
def fbnet_unit_forward(x_nchw, p, exp, kernel, stride, group):
    x = jnp.transpose(x_nchw, (0, 2, 3, 1)).astype(jnp.float32)      # NHWC
    N, H, W, Cin = x.shape
    hid = exp * Cin
    Cout = p["w3"].shape[0]
    pad = (kernel - 1) // 2
    Ho = (H + 2 * pad - kernel) // stride + 1
    Wo = (W + 2 * pad - kernel) // stride + 1

    # conv1 (grouped 1x1 as one block-diagonal matmul) + partial stats for bn1
    w1 = _block_diag_weight(p["w1"].reshape(hid, Cin // group), group, jnp.bfloat16)
    x_flat = x.reshape(N * H * W, Cin)
    y1, st1 = pw_conv_stats(x_flat.astype(jnp.bfloat16), w1, jnp.bfloat16)
    s1 = _bn_scale_shift(st1, N * H * W, p["g1"], p["be1"])

    # conv2 (depthwise KxK / stride, fused bn1+relu on its input) + bn2 stats
    w2 = jnp.transpose(p["w2"].reshape(hid, kernel * kernel)).astype(jnp.float32)
    y2, st2 = dw_conv_stats(y1.reshape(N, H, W, hid), s1, w2, kernel, stride)
    s2 = _bn_scale_shift(st2, N * Ho * Wo, p["g2"], p["be2"])

    # conv3 (grouped 1x1, fused bn2+relu on its input) + bn3 stats
    w3 = _block_diag_weight(p["w3"].reshape(Cout, hid // group), group, jnp.bfloat16)
    y3, st3 = pw_norm_conv_stats(y2.reshape(N * Ho * Wo, hid), s2, w3, jnp.float32)
    s3 = _bn_scale_shift(st3, N * Ho * Wo, p["g3"], p["be3"])

    # shortcut branch + final fused relu(bn3(.)) + residual add
    if Cin == Cout and stride == 1:
        out = finalize(y3, s3, x_flat)
    else:
        # Strided spatial subsample of the narrow Cin-channel input; done with
        # a cheap XLA slice (could be fused into the shortcut matmul later).
        xs = x[:, ::stride, ::stride, :].reshape(N * Ho * Wo, Cin)
        ws = jnp.transpose(p["ws"].reshape(Cout, Cin)).astype(jnp.bfloat16)
        ys, sts = pw_conv_stats(xs.astype(jnp.bfloat16), ws, jnp.float32)
        ss = _bn_scale_shift(sts, N * Ho * Wo, p["gs"], p["bes"])
        out = finalize(y3, s3, ys, ss)

    return jnp.transpose(out.reshape(N, Ho, Wo, Cout), (0, 3, 1, 2))


# ----------------------------------------------------------------------------
# deterministic parameter construction (shapes follow FBNetUnit.__init__)
# ----------------------------------------------------------------------------
def init_params(key, in_ch, out_ch, exp, kernel, stride, group):
    hid = exp * in_ch
    k = jax.random.split(key, 16)
    n = lambda kk, shp, s=0.1: s * jax.random.normal(kk, shp, jnp.float32)
    p = dict(
        # b1/b2/b3 exist in the PyTorch module but are exactly cancelled by
        # train-mode BatchNorm's mean subtraction, so the kernels never read them.
        w1=n(k[0], (hid, in_ch // group, 1, 1)),
        b1=n(k[1], (hid,)),
        g1=1.0 + n(k[2], (hid,)),
        be1=n(k[3], (hid,)),
        w2=n(k[4], (hid, 1, kernel, kernel)),
        b2=n(k[5], (hid,)),
        g2=1.0 + n(k[6], (hid,)),
        be2=n(k[7], (hid,)),
        w3=n(k[8], (out_ch, hid // group, 1, 1)),
        b3=n(k[9], (out_ch,)),
        g3=1.0 + n(k[10], (out_ch,)),
        be3=n(k[11], (out_ch,)),
    )
    if not (in_ch == out_ch and stride == 1):
        p["ws"] = n(k[12], (out_ch, in_ch, 1, 1))      # Shortcut conv, bias=False
        p["gs"] = 1.0 + n(k[13], (out_ch,))
        p["bes"] = n(k[14], (out_ch,))
    return p


if __name__ == "__main__":
    key = jax.random.PRNGKey(0)
    x = jax.random.normal(key, (2, 4, 16, 16), jnp.float32)   # NCHW, like PyTorch

    fwd = jax.jit(fbnet_unit_forward, static_argnums=(2, 3, 4, 5))

    # Config 1: identity shortcut (in_ch == out_ch, stride == 1, group == 1)
    params = init_params(jax.random.PRNGKey(42), 4, 4, 2, 3, 1, 1)
    out = fwd(x, params, 2, 3, 1, 1)
    jax.block_until_ready(out)
    assert out.shape == (2, 4, 16, 16), out.shape
    assert bool(jnp.all(jnp.isfinite(out)))

    # Config 2: projection shortcut (channel change, stride 2, grouped 1x1 convs)
    params2 = init_params(jax.random.PRNGKey(7), 4, 8, 2, 3, 2, 2)
    out2 = fwd(x, params2, 2, 3, 2, 2)
    jax.block_until_ready(out2)
    assert out2.shape == (2, 8, 8, 8), out2.shape
    assert bool(jnp.all(jnp.isfinite(out2)))

    print("KERNEL_OK")
</pallas_src>

<mosaic_0001>
module attributes {stable_mosaic.version = 11 : i64} {
  func.func @pw_conv_stats_kernel(%arg0: i32, %arg1: memref<512x4xbf16, #tpu.memory_space<vmem>>, %arg2: memref<4x8xbf16, #tpu.memory_space<vmem>>, %arg3: memref<512x8xbf16, #tpu.memory_space<vmem>>, %arg4: memref<1x8x8xf32, #tpu.memory_space<vmem>>) attributes {dimension_semantics = [#tpu.dimension_semantics<parallel>], iteration_bounds = array<i64: 1>, scalar_prefetch = 0 : i64, scratch_operands = 0 : i64, tpu.core_type = #tpu.core_type<tc>, window_params = [{transform_indices = @transform_0, window_bounds = array<i64: 512, 4>}, {pipeline_mode = #tpu.pipeline_mode<synchronous>, transform_indices = @transform_1, window_bounds = array<i64: 4, 8>}, {transform_indices = @transform_2, window_bounds = array<i64: 512, 8>}, {transform_indices = @transform_3, window_bounds = array<i64: 1, 8, 8>}]} {
    %c0 = arith.constant 0 : index
    %c0_0 = arith.constant 0 : index
    %0 = vector.load %arg1[%c0, %c0_0] : memref<512x4xbf16, #tpu.memory_space<vmem>>, vector<512x4xbf16>
    %c0_1 = arith.constant 0 : index
    %c0_2 = arith.constant 0 : index
    %1 = vector.load %arg2[%c0_1, %c0_2] : memref<4x8xbf16, #tpu.memory_space<vmem>>, vector<4x8xbf16>
    %cst = arith.constant dense<0.000000e+00> : vector<512x8xf32>
    %2 = tpu.matmul %0, %1, %cst {dimension_numbers = #tpu.dot_dimension_numbers<[1], [0], [0], [1], [0, 0, 1, 1], [], []>} : vector<512x4xbf16>, vector<4x8xbf16>, vector<512x8xf32> -> vector<512x8xf32>
    %cst_3 = arith.constant dense<0.000000e+00> : vector<8xf32>
    %3 = vector.multi_reduction <add>, %2, %cst_3 [0] : vector<512x8xf32> to vector<8xf32>
    %4 = vector.shape_cast %3 : vector<8xf32> to vector<1x8xf32>
    %5 = arith.mulf %2, %2 : vector<512x8xf32>
    %cst_4 = arith.constant dense<0.000000e+00> : vector<8xf32>
    %6 = vector.multi_reduction <add>, %5, %cst_4 [0] : vector<512x8xf32> to vector<8xf32>
    %7 = vector.shape_cast %6 : vector<8xf32> to vector<1x8xf32>
    %cst_5 = arith.constant 0.000000e+00 : f32
    %8 = vector.broadcast %cst_5 : f32 to vector<6x8xf32>
    %9 = tpu.concatenate %4, %7, %8 in 0 : vector<1x8xf32>, vector<1x8xf32>, vector<6x8xf32> -> vector<8x8xf32>
    %10 = vector.shape_cast %9 : vector<8x8xf32> to vector<1x8x8xf32>
    %c0_6 = arith.constant 0 : index
    %c0_7 = arith.constant 0 : index
    %c0_8 = arith.constant 0 : index
    %11 = vector.load %arg4[%c0_6, %c0_7, %c0_8] : memref<1x8x8xf32, #tpu.memory_space<vmem>>, vector<1x8x8xf32>
    tpu.vector_store %arg4[%c0_6, %c0_7, %c0_8], %10 {strides = array<i32>} : memref<1x8x8xf32, #tpu.memory_space<vmem>>, vector<1x8x8xf32>,
    %12 = arith.truncf %2 : vector<512x8xf32> to vector<512x8xbf16>
    %c0_9 = arith.constant 0 : index
    %c0_10 = arith.constant 0 : index
    %13 = vector.load %arg3[%c0_9, %c0_10] : memref<512x8xbf16, #tpu.memory_space<vmem>>, vector<512x8xbf16>
    tpu.vector_store %arg3[%c0_9, %c0_10], %12 {strides = array<i32>} : memref<512x8xbf16, #tpu.memory_space<vmem>>, vector<512x8xbf16>,
    return
  }
  func.func @transform_0(%arg0: i32) -> (i32, i32) {
    %c0_i32 = arith.constant 0 : i32
    %c0_i32_0 = arith.constant 0 : i32
    return %arg0, %c0_i32 : i32, i32
  }
  func.func @transform_1(%arg0: i32) -> (i32, i32) {
    %c0_i32 = arith.constant 0 : i32
    %c0_i32_0 = arith.constant 0 : i32
    %c0_i32_1 = arith.constant 0 : i32
    return %c0_i32, %c0_i32_0 : i32, i32
  }
  func.func @transform_2(%arg0: i32) -> (i32, i32) {
    %c0_i32 = arith.constant 0 : i32
    %c0_i32_0 = arith.constant 0 : i32
    return %arg0, %c0_i32 : i32, i32
  }
  func.func @transform_3(%arg0: i32) -> (i32, i32, i32) {
    %c0_i32 = arith.constant 0 : i32
    %c0_i32_0 = arith.constant 0 : i32
    %c0_i32_1 = arith.constant 0 : i32
    return %arg0, %c0_i32, %c0_i32_0 : i32, i32, i32
  }
}

module attributes {stable_mosaic.version = 11 : i64} {
  func.func @dw_conv_stats_kernel(%arg0: i32, %arg1: i32, %arg2: memref<1x16x16x8xbf16, #tpu.memory_space<vmem>>, %arg3: memref<2x8xf32, #tpu.memory_space<vmem>>, %arg4: memref<9x8xf32, #tpu.memory_space<vmem>>, %arg5: memref<1x16x16x8xbf16, #tpu.memory_space<vmem>>, %arg6: memref<1x8x8xf32, #tpu.memory_space<vmem>>, %arg7: memref<1x18x18x8xf32, #tpu.memory_space<vmem>>) attributes {dimension_semantics = [#tpu.dimension_semantics<parallel>, #tpu.dimension_semantics<parallel>], iteration_bounds = array<i64: 2, 1>, scalar_prefetch = 0 : i64, scratch_operands = 1 : i64, tpu.core_type = #tpu.core_type<tc>, window_params = [{transform_indices = @transform_0, window_bounds = array<i64: 1, 16, 16, 8>}, {transform_indices = @transform_1, window_bounds = array<i64: 2, 8>}, {transform_indices = @transform_2, window_bounds = array<i64: 9, 8>}, {transform_indices = @transform_3, window_bounds = array<i64: 1, 16, 16, 8>}, {transform_indices = @transform_4, window_bounds = array<i64: 1, 8, 8>}]} {
    %c0 = arith.constant 0 : index
    %c0_0 = arith.constant 0 : index
    %0 = vector.load %arg3[%c0, %c0_0] : memref<2x8xf32, #tpu.memory_space<vmem>>, vector<1x8xf32>
    %c1 = arith.constant 1 : index
    %c0_1 = arith.constant 0 : index
    %1 = vector.load %arg3[%c1, %c0_1] : memref<2x8xf32, #tpu.memory_space<vmem>>, vector<1x8xf32>
    %c0_2 = arith.constant 0 : index
    %c0_3 = arith.constant 0 : index
    %c0_4 = arith.constant 0 : index
    %c0_5 = arith.constant 0 : index
    %2 = vector.load %arg2[%c0_2, %c0_3, %c0_4, %c0_5] : memref<1x16x16x8xbf16, #tpu.memory_space<vmem>>, vector<1x16x16x8xbf16>
    %3 = arith.extf %2 : vector<1x16x16x8xbf16> to vector<1x16x16x8xf32>
    %4 = vector.shape_cast %0 : vector<1x8xf32> to vector<1x1x1x8xf32>
    %5 = vector.broadcast %4 : vector<1x1x1x8xf32> to vector<1x16x16x8xf32>
    %6 = arith.mulf %3, %5 : vector<1x16x16x8xf32>
    %7 = vector.shape_cast %1 : vector<1x8xf32> to vector<1x1x1x8xf32>
    %8 = vector.broadcast %7 : vector<1x1x1x8xf32> to vector<1x16x16x8xf32>
    %9 = arith.addf %6, %8 : vector<1x16x16x8xf32>
    %cst = arith.constant 0.000000e+00 : f32
    %10 = vector.broadcast %cst : f32 to vector<1x16x16x8xf32>
    %11 = arith.maximumf %9, %10 : vector<1x16x16x8xf32>
    %cst_6 = arith.constant 0.000000e+00 : f32
    %12 = vector.broadcast %cst_6 : f32 to vector<1x18x18x8xf32>
    %c0_7 = arith.constant 0 : index
    %c0_8 = arith.constant 0 : index
    %c0_9 = arith.constant 0 : index
    %c0_10 = arith.constant 0 : index
    %13 = vector.load %arg7[%c0_7, %c0_8, %c0_9, %c0_10] : memref<1x18x18x8xf32, #tpu.memory_space<vmem>>, vector<1x18x18x8xf32>
    tpu.vector_store %arg7[%c0_7, %c0_8, %c0_9, %c0_10], %12 {strides = array<i32>} : memref<1x18x18x8xf32, #tpu.memory_space<vmem>>, vector<1x18x18x8xf32>,
    %c0_11 = arith.constant 0 : index
    %c1_12 = arith.constant 1 : index
    %c1_13 = arith.constant 1 : index
    %c0_14 = arith.constant 0 : index
    %14 = vector.load %arg7[%c0_11, %c1_12, %c1_13, %c0_14] : memref<1x18x18x8xf32, #tpu.memory_space<vmem>>, vector<1x16x16x8xf32>
    tpu.vector_store %arg7[%c0_11, %c1_12, %c1_13, %c0_14], %11 {strides = array<i32>} : memref<1x18x18x8xf32, #tpu.memory_space<vmem>>, vector<1x16x16x8xf32>,
    %cst_15 = arith.constant 0.000000e+00 : f32
    %15 = vector.broadcast %cst_15 : f32 to vector<1x16x16x8xf32>
    %c0_16 = arith.constant 0 : index
    %c0_17 = arith.constant 0 : index
    %c0_18 = arith.constant 0 : index
    %c0_19 = arith.constant 0 : index
    %16 = vector.load %arg7[%c0_16, %c0_17, %c0_18, %c0_19] : memref<1x18x18x8xf32, #tpu.memory_space<vmem>>, vector<1x16x16x8xf32>
    %c0_20 = arith.constant 0 : index
    %c0_21 = arith.constant 0 : index
    %17 = vector.load %arg4[%c0_20, %c0_21] : memref<9x8xf32, #tpu.memory_space<vmem>>, vector<1x8xf32>
    %18 = vector.shape_cast %17 : vector<1x8xf32> to vector<8xf32>
    %19 = vector.shape_cast %18 : vector<8xf32> to vector<1x1x1x8xf32>
    %20 = vector.broadcast %19 : vector<1x1x1x8xf32> to vector<1x16x16x8xf32>
    %21 = arith.mulf %16, %20 : vector<1x16x16x8xf32>
    %22 = arith.addf %15, %21 : vector<1x16x16x8xf32>
    %c0_22 = arith.constant 0 : index
    %c0_23 = arith.constant 0 : index
    %c1_24 = arith.constant 1 : index
    %c0_25 = arith.constant 0 : index
    %23 = vector.load %arg7[%c0_22, %c0_23, %c1_24, %c0_25] : memref<1x18x18x8xf32, #tpu.memory_space<vmem>>, vector<1x16x16x8xf32>
    %c1_26 = arith.constant 1 : index
    %c0_27 = arith.constant 0 : index
    %24 = vector.load %arg4[%c1_26, %c0_27] : memref<9x8xf32, #tpu.memory_space<vmem>>, vector<1x8xf32>
    %25 = vector.shape_cast %24 : vector<1x8xf32> to vector<8xf32>
    %26 = vector.shape_cast %25 : vector<8xf32> to vector<1x1x1x8xf32>
    %27 = vector.broadcast %26 : vector<1x1x1x8xf32> to vector<1x16x16x8xf32>
    %28 = arith.mulf %23, %27 : vector<1x16x16x8xf32>
    %29 = arith.addf %22, %28 : vector<1x16x16x8xf32>
    %c0_28 = arith.constant 0 : index
    %c0_29 = arith.constant 0 : index
    %c2 = arith.constant 2 : index
    %c0_30 = arith.constant 0 : index
    %30 = vector.load %arg7[%c0_28, %c0_29, %c2, %c0_30] : memref<1x18x18x8xf32, #tpu.memory_space<vmem>>, vector<1x16x16x8xf32>
    %c2_31 = arith.constant 2 : index
    %c0_32 = arith.constant 0 : index
    %31 = vector.load %arg4[%c2_31, %c0_32] : memref<9x8xf32, #tpu.memory_space<vmem>>, vector<1x8xf32>
    %32 = vector.shape_cast %31 : vector<1x8xf32> to vector<8xf32>
    %33 = vector.shape_cast %32 : vector<8xf32> to vector<1x1x1x8xf32>
    %34 = vector.broadcast %33 : vector<1x1x1x8xf32> to vector<1x16x16x8xf32>
    %35 = arith.mulf %30, %34 : vector<1x16x16x8xf32>
    %36 = arith.addf %29, %35 : vector<1x16x16x8xf32>
    %c0_33 = arith.constant 0 : index
    %c1_34 = arith.constant 1 : index
    %c0_35 = arith.constant 0 : index
    %c0_36 = arith.constant 0 : index
    %37 = vector.load %arg7[%c0_33, %c1_34, %c0_35, %c0_36] : memref<1x18x18x8xf32, #tpu.memory_space<vmem>>, vector<1x16x16x8xf32>
    %c3 = arith.constant 3 : index
    %c0_37 = arith.constant 0 : index
    %38 = vector.load %arg4[%c3, %c0_37] : memref<9x8xf32, #tpu.memory_space<vmem>>, vector<1x8xf32>
    %39 = vector.shape_cast %38 : vector<1x8xf32> to vector<8xf32>
    %40 = vector.shape_cast %39 : vector<8xf32> to vector<1x1x1x8xf32>
    %41 = vector.broadcast %40 : vector<1x1x1x8xf32> to vector<1x16x16x8xf32>
    %42 = arith.mulf %37, %41 : vector<1x16x16x8xf32>
    %43 = arith.addf %36, %42 : vector<1x16x16x8xf32>
    %c0_38 = arith.constant 0 : index
    %c1_39 = arith.constant 1 : index
    %c1_40 = arith.constant 1 : index
    %c0_41 = arith.constant 0 : index
    %44 = vector.load %arg7[%c0_38, %c1_39, %c1_40, %c0_41] : memref<1x18x18x8xf32, #tpu.memory_space<vmem>>, vector<1x16x16x8xf32>
    %c4 = arith.constant 4 : index
    %c0_42 = arith.constant 0 : index
    %45 = vector.load %arg4[%c4, %c0_42] : memref<9x8xf32, #tpu.memory_space<vmem>>, vector<1x8xf32>
    %46 = vector.shape_cast %45 : vector<1x8xf32> to vector<8xf32>
    %47 = vector.shape_cast %46 : vector<8xf32> to vector<1x1x1x8xf32>
    %48 = vector.broadcast %47 : vector<1x1x1x8xf32> to vector<1x16x16x8xf32>
    %49 = arith.mulf %44, %48 : vector<1x16x16x8xf32>
    %50 = arith.addf %43, %49 : vector<1x16x16x8xf32>
    %c0_43 = arith.constant 0 : index
    %c1_44 = arith.constant 1 : index
    %c2_45 = arith.constant 2 : index
    %c0_46 = arith.constant 0 : index
    %51 = vector.load %arg7[%c0_43, %c1_44, %c2_45, %c0_46] : memref<1x18x18x8xf32, #tpu.memory_space<vmem>>, vector<1x16x16x8xf32>
    %c5 = arith.constant 5 : index
    %c0_47 = arith.constant 0 : index
    %52 = vector.load %arg4[%c5, %c0_47] : memref<9x8xf32, #tpu.memory_space<vmem>>, vector<1x8xf32>
    %53 = vector.shape_cast %52 : vector<1x8xf32> to vector<8xf32>
    %54 = vector.shape_cast %53 : vector<8xf32> to vector<1x1x1x8xf32>
    %55 = vector.broadcast %54 : vector<1x1x1x8xf32> to vector<1x16x16x8xf32>
    %56 = arith.mulf %51, %55 : vector<1x16x16x8xf32>
    %57 = arith.addf %50, %56 : vector<1x16x16x8xf32>
    %c0_48 = arith.constant 0 : index
    %c2_49 = arith.constant 2 : index
    %c0_50 = arith.constant 0 : index
    %c0_51 = arith.constant 0 : index
    %58 = vector.load %arg7[%c0_48, %c2_49, %c0_50, %c0_51] : memref<1x18x18x8xf32, #tpu.memory_space<vmem>>, vector<1x16x16x8xf32>
    %c6 = arith.constant 6 : index
    %c0_52 = arith.constant 0 : index
    %59 = vector.load %arg4[%c6, %c0_52] : memref<9x8xf32, #tpu.memory_space<vmem>>, vector<1x8xf32>
    %60 = vector.shape_cast %59 : vector<1x8xf32> to vector<8xf32>
    %61 = vector.shape_cast %60 : vector<8xf32> to vector<1x1x1x8xf32>
    %62 = vector.broadcast %61 : vector<1x1x1x8xf32> to vector<1x16x16x8xf32>
    %63 = arith.mulf %58, %62 : vector<1x16x16x8xf32>
    %64 = arith.addf %57, %63 : vector<1x16x16x8xf32>
    %c0_53 = arith.constant 0 : index
    %c2_54 = arith.constant 2 : index
    %c1_55 = arith.constant 1 : index
    %c0_56 = arith.constant 0 : index
    %65 = vector.load %arg7[%c0_53, %c2_54, %c1_55, %c0_56] : memref<1x18x18x8xf32, #tpu.memory_space<vmem>>, vector<1x16x16x8xf32>
    %c7 = arith.constant 7 : index
    %c0_57 = arith.constant 0 : index
    %66 = vector.load %arg4[%c7, %c0_57] : memref<9x8xf32, #tpu.memory_space<vmem>>, vector<1x8xf32>
    %67 = vector.shape_cast %66 : vector<1x8xf32> to vector<8xf32>
    %68 = vector.shape_cast %67 : vector<8xf32> to vector<1x1x1x8xf32>
    %69 = vector.broadcast %68 : vector<1x1x1x8xf32> to vector<1x16x16x8xf32>
    %70 = arith.mulf %65, %69 : vector<1x16x16x8xf32>
    %71 = arith.addf %64, %70 : vector<1x16x16x8xf32>
    %c0_58 = arith.constant 0 : index
    %c2_59 = arith.constant 2 : index
    %c2_60 = arith.constant 2 : index
    %c0_61 = arith.constant 0 : index
    %72 = vector.load %arg7[%c0_58, %c2_59, %c2_60, %c0_61] : memref<1x18x18x8xf32, #tpu.memory_space<vmem>>, vector<1x16x16x8xf32>
    %c8 = arith.constant 8 : index
    %c0_62 = arith.constant 0 : index
    %73 = vector.load %arg4[%c8, %c0_62] : memref<9x8xf32, #tpu.memory_space<vmem>>, vector<1x8xf32>
    %74 = vector.shape_cast %73 : vector<1x8xf32> to vector<8xf32>
    %75 = vector.shape_cast %74 : vector<8xf32> to vector<1x1x1x8xf32>
    %76 = vector.broadcast %75 : vector<1x1x1x8xf32> to vector<1x16x16x8xf32>
    %77 = arith.mulf %72, %76 : vector<1x16x16x8xf32>
    %78 = arith.addf %71, %77 : vector<1x16x16x8xf32>
    %79 = vector.shape_cast %78 : vector<1x16x16x8xf32> to vector<256x8xf32>
    %cst_63 = arith.constant dense<0.000000e+00> : vector<8xf32>
    %80 = vector.multi_reduction <add>, %79, %cst_63 [0] : vector<256x8xf32> to vector<8xf32>
    %81 = vector.shape_cast %80 : vector<8xf32> to vector<1x8xf32>
    %82 = arith.mulf %79, %79 : vector<256x8xf32>
    %cst_64 = arith.constant dense<0.000000e+00> : vector<8xf32>
    %83 = vector.multi_reduction <add>, %82, %cst_64 [0] : vector<256x8xf32> to vector<8xf32>
    %84 = vector.shape_cast %83 : vector<8xf32> to vector<1x8xf32>
    %cst_65 = arith.constant 0.000000e+00 : f32
    %85 = vector.broadcast %cst_65 : f32 to vector<6x8xf32>
    %86 = tpu.concatenate %81, %84, %85 in 0 : vector<1x8xf32>, vector<1x8xf32>, vector<6x8xf32> -> vector<8x8xf32>
    %87 = vector.shape_cast %86 : vector<8x8xf32> to vector<1x8x8xf32>
    %c0_66 = arith.constant 0 : index
    %c0_67 = arith.constant 0 : index
    %c0_68 = arith.constant 0 : index
    %88 = vector.load %arg6[%c0_66, %c0_67, %c0_68] : memref<1x8x8xf32, #tpu.memory_space<vmem>>, vector<1x8x8xf32>
    tpu.vector_store %arg6[%c0_66, %c0_67, %c0_68], %87 {strides = array<i32>} : memref<1x8x8xf32, #tpu.memory_space<vmem>>, vector<1x8x8xf32>,
    %89 = arith.truncf %78 : vector<1x16x16x8xf32> to vector<1x16x16x8xbf16>
    %c0_69 = arith.constant 0 : index
    %c0_70 = arith.constant 0 : index
    %c0_71 = arith.constant 0 : index
    %c0_72 = arith.constant 0 : index
    %90 = vector.load %arg5[%c0_69, %c0_70, %c0_71, %c0_72] : memref<1x16x16x8xbf16, #tpu.memory_space<vmem>>, vector<1x16x16x8xbf16>
    tpu.vector_store %arg5[%c0_69, %c0_70, %c0_71, %c0_72], %89 {strides = array<i32>} : memref<1x16x16x8xbf16, #tpu.memory_space<vmem>>, vector<1x16x16x8xbf16>,
    return
  }
  func.func @transform_0(%arg0: i32, %arg1: i32) -> (i32, i32, i32, i32) {
    %c0_i32 = arith.constant 0 : i32
    %c0_i32_0 = arith.constant 0 : i32
    %c0_i32_1 = arith.constant 0 : i32
    return %arg0, %c0_i32, %c0_i32_0, %arg1 : i32, i32, i32, i32
  }
  func.func @transform_1(%arg0: i32, %arg1: i32) -> (i32, i32) {
    %c0_i32 = arith.constant 0 : i32
    %c0_i32_0 = arith.constant 0 : i32
    return %c0_i32, %arg1 : i32, i32
  }
  func.func @transform_2(%arg0: i32, %arg1: i32) -> (i32, i32) {
    %c0_i32 = arith.constant 0 : i32
    %c0_i32_0 = arith.constant 0 : i32
    return %c0_i32, %arg1 : i32, i32
  }
  func.func @transform_3(%arg0: i32, %arg1: i32) -> (i32, i32, i32, i32) {
    %c0_i32 = arith.constant 0 : i32
    %c0_i32_0 = arith.constant 0 : i32
    %c0_i32_1 = arith.constant 0 : i32
    return %arg0, %c0_i32, %c0_i32_0, %arg1 : i32, i32, i32, i32
  }
  func.func @transform_4(%arg0: i32, %arg1: i32) -> (i32, i32, i32) {
    %c0_i32 = arith.constant 0 : i32
    %c0_i32_0 = arith.constant 0 : i32
    return %arg0, %c0_i32, %arg1 : i32, i32, i32
  }
}

module attributes {stable_mosaic.version = 11 : i64} {
  func.func @pw_norm_conv_stats_kernel(%arg0: i32, %arg1: memref<512x8xbf16, #tpu.memory_space<vmem>>, %arg2: memref<2x8xf32, #tpu.memory_space<vmem>>, %arg3: memref<8x4xbf16, #tpu.memory_space<vmem>>, %arg4: memref<512x4xf32, #tpu.memory_space<vmem>>, %arg5: memref<1x8x4xf32, #tpu.memory_space<vmem>>) attributes {dimension_semantics = [#tpu.dimension_semantics<parallel>], iteration_bounds = array<i64: 1>, scalar_prefetch = 0 : i64, scratch_operands = 0 : i64, tpu.core_type = #tpu.core_type<tc>, window_params = [{transform_indices = @transform_0, window_bounds = array<i64: 512, 8>}, {pipeline_mode = #tpu.pipeline_mode<synchronous>, transform_indices = @transform_1, window_bounds = array<i64: 2, 8>}, {pipeline_mode = #tpu.pipeline_mode<synchronous>, transform_indices = @transform_2, window_bounds = array<i64: 8, 4>}, {transform_indices = @transform_3, window_bounds = array<i64: 512, 4>}, {transform_indices = @transform_4, window_bounds = array<i64: 1, 8, 4>}]} {
    %c512_i32 = arith.constant 512 : i32
    %0 = arith.muli %arg0, %c512_i32 : i32
    %1 = tpu.iota {dimensions = array<i32: 0>} : vector<512x1xi32>
    %2 = vector.broadcast %0 : i32 to vector<512x1xi32>
    %3 = arith.addi %2, %1 : vector<512x1xi32>
    %c0 = arith.constant 0 : index
    %c0_0 = arith.constant 0 : index
    %4 = vector.load %arg2[%c0, %c0_0] : memref<2x8xf32, #tpu.memory_space<vmem>>, vector<1x8xf32>
    %c1 = arith.constant 1 : index
    %c0_1 = arith.constant 0 : index
    %5 = vector.load %arg2[%c1, %c0_1] : memref<2x8xf32, #tpu.memory_space<vmem>>, vector<1x8xf32>
    %c0_2 = arith.constant 0 : index
    %c0_3 = arith.constant 0 : index
    %6 = vector.load %arg1[%c0_2, %c0_3] : memref<512x8xbf16, #tpu.memory_space<vmem>>, vector<512x8xbf16>
    %7 = arith.extf %6 : vector<512x8xbf16> to vector<512x8xf32>
    %8 = vector.broadcast %4 : vector<1x8xf32> to vector<512x8xf32>
    %9 = arith.mulf %7, %8 : vector<512x8xf32>
    %10 = vector.broadcast %5 : vector<1x8xf32> to vector<512x8xf32>
    %11 = arith.addf %9, %10 : vector<512x8xf32>
    %cst = arith.constant 0.000000e+00 : f32
    %12 = vector.broadcast %cst : f32 to vector<512x8xf32>
    %13 = arith.maximumf %11, %12 : vector<512x8xf32>
    %c512_i32_4 = arith.constant 512 : i32
    %14 = vector.broadcast %c512_i32_4 : i32 to vector<512x1xi32>
    %15 = arith.cmpi slt, %3, %14 : vector<512x1xi32>
    %cst_5 = arith.constant 0.000000e+00 : f32
    %16 = vector.shape_cast %15 : vector<512x1xi1> to vector<512x1xi1>
    %17 = vector.broadcast %16 : vector<512x1xi1> to vector<512x8xi1>
    %18 = vector.broadcast %cst_5 : f32 to vector<512x8xf32>
    %19 = arith.select %17, %13, %18 : vector<512x8xi1>, vector<512x8xf32>
    %20 = arith.truncf %19 : vector<512x8xf32> to vector<512x8xbf16>
    %c0_6 = arith.constant 0 : index
    %c0_7 = arith.constant 0 : index
    %21 = vector.load %arg3[%c0_6, %c0_7] : memref<8x4xbf16, #tpu.memory_space<vmem>>, vector<8x4xbf16>
    %cst_8 = arith.constant dense<0.000000e+00> : vector<512x4xf32>
    %22 = tpu.matmul %20, %21, %cst_8 {dimension_numbers = #tpu.dot_dimension_numbers<[1], [0], [0], [1], [0, 0, 1, 1], [], []>} : vector<512x8xbf16>, vector<8x4xbf16>, vector<512x4xf32> -> vector<512x4xf32>
    %cst_9 = arith.constant dense<0.000000e+00> : vector<4xf32>
    %23 = vector.multi_reduction <add>, %22, %cst_9 [0] : vector<512x4xf32> to vector<4xf32>
    %24 = vector.shape_cast %23 : vector<4xf32> to vector<1x4xf32>
    %25 = arith.mulf %22, %22 : vector<512x4xf32>
    %cst_10 = arith.constant dense<0.000000e+00> : vector<4xf32>
    %26 = vector.multi_reduction <add>, %25, %cst_10 [0] : vector<512x4xf32> to vector<4xf32>
    %27 = vector.shape_cast %26 : vector<4xf32> to vector<1x4xf32>
    %cst_11 = arith.constant 0.000000e+00 : f32
    %28 = vector.broadcast %cst_11 : f32 to vector<6x4xf32>
    %29 = tpu.concatenate %24, %27, %28 in 0 : vector<1x4xf32>, vector<1x4xf32>, vector<6x4xf32> -> vector<8x4xf32>
    %30 = vector.shape_cast %29 : vector<8x4xf32> to vector<1x8x4xf32>
    %c0_12 = arith.constant 0 : index
    %c0_13 = arith.constant 0 : index
    %c0_14 = arith.constant 0 : index
    %31 = vector.load %arg5[%c0_12, %c0_13, %c0_14] : memref<1x8x4xf32, #tpu.memory_space<vmem>>, vector<1x8x4xf32>
    tpu.vector_store %arg5[%c0_12, %c0_13, %c0_14], %30 {strides = array<i32>} : memref<1x8x4xf32, #tpu.memory_space<vmem>>, vector<1x8x4xf32>,
    %c0_15 = arith.constant 0 : index
    %c0_16 = arith.constant 0 : index
    %32 = vector.load %arg4[%c0_15, %c0_16] : memref<512x4xf32, #tpu.memory_space<vmem>>, vector<512x4xf32>
    tpu.vector_store %arg4[%c0_15, %c0_16], %22 {strides = array<i32>} : memref<512x4xf32, #tpu.memory_space<vmem>>, vector<512x4xf32>,
    return
  }
  func.func @transform_0(%arg0: i32) -> (i32, i32) {
    %c0_i32 = arith.constant 0 : i32
    %c0_i32_0 = arith.constant 0 : i32
    return %arg0, %c0_i32 : i32, i32
  }
  func.func @transform_1(%arg0: i32) -> (i32, i32) {
    %c0_i32 = arith.constant 0 : i32
    %c0_i32_0 = arith.constant 0 : i32
    %c0_i32_1 = arith.constant 0 : i32
    return %c0_i32, %c0_i32_0 : i32, i32
  }
  func.func @transform_2(%arg0: i32) -> (i32, i32) {
    %c0_i32 = arith.constant 0 : i32
    %c0_i32_0 = arith.constant 0 : i32
    %c0_i32_1 = arith.constant 0 : i32
    return %c0_i32, %c0_i32_0 : i32, i32
  }
  func.func @transform_3(%arg0: i32) -> (i32, i32) {
    %c0_i32 = arith.constant 0 : i32
    %c0_i32_0 = arith.constant 0 : i32
    return %arg0, %c0_i32 : i32, i32
  }
  func.func @transform_4(%arg0: i32) -> (i32, i32, i32) {
    %c0_i32 = arith.constant 0 : i32
    %c0_i32_0 = arith.constant 0 : i32
    %c0_i32_1 = arith.constant 0 : i32
    return %arg0, %c0_i32, %c0_i32_0 : i32, i32, i32
  }
}

module attributes {stable_mosaic.version = 11 : i64} {
  func.func @finalize_identity_kernel(%arg0: i32, %arg1: memref<512x4xf32, #tpu.memory_space<vmem>>, %arg2: memref<2x4xf32, #tpu.memory_space<vmem>>, %arg3: memref<512x4xf32, #tpu.memory_space<vmem>>, %arg4: memref<512x4xf32, #tpu.memory_space<vmem>>) attributes {dimension_semantics = [#tpu.dimension_semantics<parallel>], iteration_bounds = array<i64: 1>, scalar_prefetch = 0 : i64, scratch_operands = 0 : i64, tpu.core_type = #tpu.core_type<tc>, window_params = [{transform_indices = @transform_0, window_bounds = array<i64: 512, 4>}, {pipeline_mode = #tpu.pipeline_mode<synchronous>, transform_indices = @transform_1, window_bounds = array<i64: 2, 4>}, {transform_indices = @transform_2, window_bounds = array<i64: 512, 4>}, {transform_indices = @transform_3, window_bounds = array<i64: 512, 4>}]} {
    %c0 = arith.constant 0 : index
    %c0_0 = arith.constant 0 : index
    %0 = vector.load %arg2[%c0, %c0_0] : memref<2x4xf32, #tpu.memory_space<vmem>>, vector<1x4xf32>
    %c1 = arith.constant 1 : index
    %c0_1 = arith.constant 0 : index
    %1 = vector.load %arg2[%c1, %c0_1] : memref<2x4xf32, #tpu.memory_space<vmem>>, vector<1x4xf32>
    %c0_2 = arith.constant 0 : index
    %c0_3 = arith.constant 0 : index
    %2 = vector.load %arg1[%c0_2, %c0_3] : memref<512x4xf32, #tpu.memory_space<vmem>>, vector<512x4xf32>
    %3 = vector.broadcast %0 : vector<1x4xf32> to vector<512x4xf32>
    %4 = arith.mulf %2, %3 : vector<512x4xf32>
    %5 = vector.broadcast %1 : vector<1x4xf32> to vector<512x4xf32>
    %6 = arith.addf %4, %5 : vector<512x4xf32>
    %cst = arith.constant 0.000000e+00 : f32
    %7 = vector.broadcast %cst : f32 to vector<512x4xf32>
    %8 = arith.maximumf %6, %7 : vector<512x4xf32>
    %c0_4 = arith.constant 0 : index
    %c0_5 = arith.constant 0 : index
    %9 = vector.load %arg3[%c0_4, %c0_5] : memref<512x4xf32, #tpu.memory_space<vmem>>, vector<512x4xf32>
    %10 = arith.addf %8, %9 : vector<512x4xf32>
    %c0_6 = arith.constant 0 : index
    %c0_7 = arith.constant 0 : index
    %11 = vector.load %arg4[%c0_6, %c0_7] : memref<512x4xf32, #tpu.memory_space<vmem>>, vector<512x4xf32>
    tpu.vector_store %arg4[%c0_6, %c0_7], %10 {strides = array<i32>} : memref<512x4xf32, #tpu.memory_space<vmem>>, vector<512x4xf32>,
    return
  }
  func.func @transform_0(%arg0: i32) -> (i32, i32) {
    %c0_i32 = arith.constant 0 : i32
    %c0_i32_0 = arith.constant 0 : i32
    return %arg0, %c0_i32 : i32, i32
  }
  func.func @transform_1(%arg0: i32) -> (i32, i32) {
    %c0_i32 = arith.constant 0 : i32
    %c0_i32_0 = arith.constant 0 : i32
    %c0_i32_1 = arith.constant 0 : i32
    return %c0_i32, %c0_i32_0 : i32, i32
  }
  func.func @transform_2(%arg0: i32) -> (i32, i32) {
    %c0_i32 = arith.constant 0 : i32
    %c0_i32_0 = arith.constant 0 : i32
    return %arg0, %c0_i32 : i32, i32
  }
  func.func @transform_3(%arg0: i32) -> (i32, i32) {
    %c0_i32 = arith.constant 0 : i32
    %c0_i32_0 = arith.constant 0 : i32
    return %arg0, %c0_i32 : i32, i32
  }
}

</mosaic_0001>

<bundles_post_ra>
// kernel: fbnet_unit_forward.7
= control target key start
LH: loop header
LB: loop body
LE: loop exit
PB: predicated region body
PF: predicated region fallthrough
CT: control target
= control target key end

     0   :  { %vm408_vm0 = vcmask 31744   ;;  %s1277_s0 = inlined_call_operand.vmem [shape: f32[512,4], index: 0, kind: input, shape index: {}]   ;;  %s1278_s1 = inlined_call_operand.vmem [shape: f32[2,4], index: 1, kind: input, shape index: {}]   ;;  %s1279_s2 = inlined_call_operand.vmem [shape: f32[512,4], index: 2, kind: input, shape index: {}]   ;;  %s1280_s3 = inlined_call_operand.vmem [shape: f32[512,4], index: 3, kind: output, shape index: {}]  }
   0x1   :  { %v502_v0 = vld [vmem:[%s1278_s1] ss:$0 sm:$0xff]  ;;  %v507_v1 = vld [vmem:[%s1278_s1 + $0x1] ss:$0 sm:$0xff]  ;;  %v17_v4 = vld [vmem:[%s1277_s0 + $0x8] sm:$0xff] }
   0x2   :  { %v16_v2 = vld [vmem:[%s1277_s0] sm:$0xff]  ;;  %v85_v5 = vmul.f32 %v502_v0, %v17_v4  ;;  %v18_v6 = vld [vmem:[%s1277_s0 + $0x10] sm:$0xff]  ;;  %v19_v7 = vld [vmem:[%s1277_s0 + $0x18] sm:$0xff] }
   0x3   :  { %v84_v3 = vmul.f32 %v502_v0, %v16_v2  ;;  %v86_v9 = vmul.f32 %v502_v0, %v18_v6  ;;  %v87_v10 = vmul.f32 %v502_v0, %v19_v7  ;;  %v20_v11 = vld [vmem:[%s1277_s0 + $0x20] sm:$0xff]  ;;  %v21_v15 = vld [vmem:[%s1277_s0 + $0x28] sm:$0xff]  ;;  %v22_v16 = vld [vmem:[%s1277_s0 + $0x30] sm:$0xff] }
   0x4   :  { %v280_v12 = vld [vmem:[%s1279_s2] sm:$0xff]  ;;  %v153_v13 = vadd.f32 %v507_v1, %v85_v5  ;;  %v88_v14 = vmul.f32 %v502_v0, %v20_v11  ;;  %v281_v18 = vld [vmem:[%s1279_s2 + $0x8] sm:$0xff]  ;;  %v89_v21 = vmul.f32 %v502_v0, %v21_v15  ;;  %v23_v22 = vld [vmem:[%s1277_s0 + $0x38] sm:$0xff]  ;;  %v90_v27 = vmul.f32 %v502_v0, %v22_v16 }
   0x5   :  { %v152_v8 = vadd.f32 %v507_v1, %v84_v3  ;;  %v154_v19 = vadd.f32 %v507_v1, %v86_v9  ;;  %v155_v20 = vadd.f32 %v507_v1, %v87_v10  ;;  %v282_v24 = vld [vmem:[%s1279_s2 + $0x10] sm:$0xff]  ;;  %v283_v25 = vld [vmem:[%s1279_s2 + $0x18] sm:$0xff]  ;;  %v91_v28 = vmul.f32 %v502_v0, %v23_v22  ;;  %v24_v29 = vld [vmem:[%s1277_s0 + $0x40] sm:$0xff] }
   0x6   :  { %v217_v23 = vmax.f32 %v153_v13, 0.0  ;;  %v156_v26 = vadd.f32 %v507_v1, %v88_v14  ;;  %v284_v33 = vld [vmem:[%s1279_s2 + $0x20] sm:$0xff]  ;;  %v157_v34 = vadd.f32 %v507_v1, %v89_v21  ;;  %v25_v35 = vld [vmem:[%s1277_s0 + $0x48] sm:$0xff]  ;;  %v158_v39 = vadd.f32 %v507_v1, %v90_v27  ;;  %v26_v41 = vld [vmem:[%s1277_s0 + $0x50] sm:$0xff] }
   0x7   :  { %v216_v17 = vmax.f32 %v152_v8, 0.0  ;;  %v218_v31 = vmax.f32 %v154_v19, 0.0  ;;  %v219_v32 = vmax.f32 %v155_v20, 0.0  ;;  %v285_v38 = vld [vmem:[%s1279_s2 + $0x28] sm:$0xff]  ;;  %v159_v40 = vadd.f32 %v507_v1, %v91_v28  ;;  %v27_v42 = vld [vmem:[%s1277_s0 + $0x58] sm:$0xff]  ;;  %v286_v46 = vld [vmem:[%s1279_s2 + $0x30] sm:$0xff] }
   0x8   :  { %v345_v36 = vadd.f32 %v281_v18, %v217_v23  ;;  %v220_v37 = vmax.f32 %v156_v26, 0.0  ;;  %v221_v45 = vmax.f32 %v157_v34, 0.0  ;;  %v287_v47 = vld [vmem:[%s1279_s2 + $0x38] sm:$0xff]  ;;  %v92_v48 = vmul.f32 %v502_v0, %v24_v29  ;;  %v28_v49 = vld [vmem:[%s1277_s0 + $0x60] sm:$0xff]  ;;  %v29_v54 = vld [vmem:[%s1277_s0 + $0x68] sm:$0xff] }
   0x9   :  { %v344_v30 = vadd.f32 %v280_v12, %v216_v17  ;;  %v346_v43 = vadd.f32 %v282_v24, %v218_v31  ;;  %v347_v44 = vadd.f32 %v283_v25, %v219_v32  ;;  %v222_v51 = vmax.f32 %v158_v39, 0.0  ;;  %v30_v59 = vld [vmem:[%s1277_s0 + $0x70] sm:$0xff]  ;;  %v31_v60 = vld [vmem:[%s1277_s0 + $0x78] sm:$0xff]  ;;  %v288_v63 = vld [vmem:[%s1279_s2 + $0x40] sm:$0xff] }
   0xa   :  { %410 = vst.msk [vmem:[%s1280_s3 + $0x8] sm:$0xff] %vm408_vm0, %v345_v36  ;;  %v348_v50 = vadd.f32 %v284_v33, %v220_v37  ;;  %v223_v52 = vmax.f32 %v159_v40, 0.0  ;;  %v93_v53 = vmul.f32 %v502_v0, %v25_v35  ;;  %v349_v55 = vadd.f32 %v285_v38, %v221_v45  ;;  %v289_v5 = vld [vmem:[%s1279_s2 + $0x48] sm:$0xff]  ;;  %v290_v10 = vld [vmem:[%s1279_s2 + $0x50] sm:$0xff]  ;;  %v291_v11 = vld [vmem:[%s1279_s2 + $0x58] sm:$0xff] }
   0xb   :  { %409 = vst.msk [vmem:[%s1280_s3] sm:$0xff] %vm408_vm0, %v344_v30  ;;  %411 = vst.msk [vmem:[%s1280_s3 + $0x10] sm:$0xff] %vm408_vm0, %v346_v43  ;;  %v160_v56 = vadd.f32 %v507_v1, %v92_v48  ;;  %v94_v57 = vmul.f32 %v502_v0, %v26_v41  ;;  %v95_v58 = vmul.f32 %v502_v0, %v27_v42  ;;  %v32_v15 = vld [vmem:[%s1277_s0 + $0x80] sm:$0xff]  ;;  %v33_v21 = vld [vmem:[%s1277_s0 + $0x88] sm:$0xff] }
   0xc   :  { %412 = vst.msk [vmem:[%s1280_s3 + $0x18] sm:$0xff] %vm408_vm0, %v347_v44  ;;  %413 = vst.msk [vmem:[%s1280_s3 + $0x20] sm:$0xff] %vm408_vm0, %v348_v50  ;;  %v350_v61 = vadd.f32 %v286_v46, %v222_v51  ;;  %v351_v62 = vadd.f32 %v287_v47, %v223_v52  ;;  %v161_v2 = vadd.f32 %v507_v1, %v93_v53  ;;  %v292_v19 = vld [vmem:[%s1279_s2 + $0x60] sm:$0xff]  ;;  %v293_v24 = vld [vmem:[%s1279_s2 + $0x68] sm:$0xff] }
   0xd   :  { %v96_v3 = vmul.f32 %v502_v0, %v28_v49  ;;  %414 = vst.msk [vmem:[%s1280_s3 + $0x28] sm:$0xff] %vm408_vm0, %v349_v55  ;;  %v224_v4 = vmax.f32 %v160_v56, 0.0  ;;  %v162_v6 = vadd.f32 %v507_v1, %v94_v57  ;;  %v163_v7 = vadd.f32 %v507_v1, %v95_v58  ;;  %v34_v27 = vld [vmem:[%s1277_s0 + $0x90] sm:$0xff]  ;;  %v35_v28 = vld [vmem:[%s1277_s0 + $0x98] sm:$0xff]  ;;  %v36_v35 = vld [vmem:[%s1277_s0 + $0xa0] sm:$0xff] }
   0xe   :  { %v97_v8 = vmul.f32 %v502_v0, %v29_v54  ;;  %415 = vst.msk [vmem:[%s1280_s3 + $0x30] sm:$0xff] %vm408_vm0, %v350_v61  ;;  %416 = vst.msk [vmem:[%s1280_s3 + $0x38] sm:$0xff] %vm408_vm0, %v351_v62  ;;  %v225_v9 = vmax.f32 %v161_v2, 0.0  ;;  %v98_v13 = vmul.f32 %v502_v0, %v30_v59  ;;  %v99_v14 = vmul.f32 %v502_v0, %v31_v60  ;;  %v294_v32 = vld [vmem:[%s1279_s2 + $0x70] sm:$0xff]  ;;  %v295_v33 = vld [vmem:[%s1279_s2 + $0x78] sm:$0xff] }
   0xf   :  { %v164_v12 = vadd.f32 %v507_v1, %v96_v3  ;;  %v352_v16 = vadd.f32 %v288_v63, %v224_v4  ;;  %v226_v17 = vmax.f32 %v162_v6, 0.0  ;;  %v227_v18 = vmax.f32 %v163_v7, 0.0  ;;  %v37_v40 = vld [vmem:[%s1277_s0 + $0xa8] sm:$0xff]  ;;  %v38_v45 = vld [vmem:[%s1277_s0 + $0xb0] sm:$0xff]  ;;  %v39_v46 = vld [vmem:[%s1277_s0 + $0xb8] sm:$0xff] }
  0x10   :  { %v165_v20 = vadd.f32 %v507_v1, %v97_v8  ;;  %v353_v22 = vadd.f32 %v289_v5, %v225_v9  ;;  %v166_v25 = vadd.f32 %v507_v1, %v98_v13  ;;  %v167_v26 = vadd.f32 %v507_v1, %v99_v14  ;;  %v296_v49 = vld [vmem:[%s1279_s2 + $0x80] sm:$0xff]  ;;  %v297_v53 = vld [vmem:[%s1279_s2 + $0x88] sm:$0xff]  ;;  %v298_v58 = vld [vmem:[%s1279_s2 + $0x90] sm:$0xff] }
  0x11   :  { %v228_v23 = vmax.f32 %v164_v12, 0.0  ;;  %417 = vst.msk [vmem:[%s1280_s3 + $0x40] sm:$0xff] %vm408_vm0, %v352_v16  ;;  %v354_v29 = vadd.f32 %v290_v10, %v226_v17  ;;  %v355_v30 = vadd.f32 %v291_v11, %v227_v18  ;;  %v100_v34 = vmul.f32 %v502_v0, %v32_v15  ;;  %v299_v59 = vld [vmem:[%s1279_s2 + $0x98] sm:$0xff]  ;;  %v40_v63 = vld [vmem:[%s1277_s0 + $0xc0] sm:$0xff]  ;;  %v41_v7 = vld [vmem:[%s1277_s0 + $0xc8] sm:$0xff] }
  0x12   :  { %v229_v31 = vmax.f32 %v165_v20, 0.0  ;;  %418 = vst.msk [vmem:[%s1280_s3 + $0x48] sm:$0xff] %vm408_vm0, %v353_v22  ;;  %v230_v37 = vmax.f32 %v166_v25, 0.0  ;;  %v231_v38 = vmax.f32 %v167_v26, 0.0  ;;  %v101_v39 = vmul.f32 %v502_v0, %v33_v21  ;;  %v300_v5 = vld [vmem:[%s1279_s2 + $0xa0] sm:$0xff]  ;;  %v301_v10 = vld [vmem:[%s1279_s2 + $0xa8] sm:$0xff] }
  0x13   :  { %v356_v36 = vadd.f32 %v292_v19, %v228_v23  ;;  %419 = vst.msk [vmem:[%s1280_s3 + $0x50] sm:$0xff] %vm408_vm0, %v354_v29  ;;  %420 = vst.msk [vmem:[%s1280_s3 + $0x58] sm:$0xff] %vm408_vm0, %v355_v30  ;;  %v168_v42 = vadd.f32 %v507_v1, %v100_v34  ;;  %v102_v43 = vmul.f32 %v502_v0, %v34_v27  ;;  %v42_v13 = vld [vmem:[%s1277_s0 + $0xd0] sm:$0xff]  ;;  %v43_v14 = vld [vmem:[%s1277_s0 + $0xd8] sm:$0xff] }
  0x14   :  { %v357_v41 = vadd.f32 %v293_v24, %v229_v31  ;;  %v103_v44 = vmul.f32 %v502_v0, %v35_v28  ;;  %v358_v47 = vadd.f32 %v294_v32, %v230_v37  ;;  %v359_v48 = vadd.f32 %v295_v33, %v231_v38  ;;  %v302_v18 = vld [vmem:[%s1279_s2 + $0xb0] sm:$0xff]  ;;  %v303_v19 = vld [vmem:[%s1279_s2 + $0xb8] sm:$0xff]  ;;  %v44_v21 = vld [vmem:[%s1277_s0 + $0xe0] sm:$0xff] }
  0x15   :  { %421 = vst.msk [vmem:[%s1280_s3 + $0x60] sm:$0xff] %vm408_vm0, %v356_v36  ;;  %v169_v50 = vadd.f32 %v507_v1, %v101_v39  ;;  %v104_v51 = vmul.f32 %v502_v0, %v36_v35  ;;  %v232_v52 = vmax.f32 %v168_v42, 0.0  ;;  %v170_v54 = vadd.f32 %v507_v1, %v102_v43  ;;  %v45_v26 = vld [vmem:[%s1277_s0 + $0xe8] sm:$0xff]  ;;  %v46_v31 = vld [vmem:[%s1277_s0 + $0xf0] sm:$0xff]  ;;  %v47_v32 = vld [vmem:[%s1277_s0 + $0xf8] sm:$0xff] }
  0x16   :  { %422 = vst.msk [vmem:[%s1280_s3 + $0x68] sm:$0xff] %vm408_vm0, %v357_v41  ;;  %v171_v55 = vadd.f32 %v507_v1, %v103_v44  ;;  %v105_v56 = vmul.f32 %v502_v0, %v37_v40  ;;  %423 = vst.msk [vmem:[%s1280_s3 + $0x70] sm:$0xff] %vm408_vm0, %v358_v47  ;;  %v106_v61 = vmul.f32 %v502_v0, %v38_v45  ;;  %v304_v35 = vld [vmem:[%s1279_s2 + $0xc0] sm:$0xff]  ;;  %v305_v39 = vld [vmem:[%s1279_s2 + $0xc8] sm:$0xff] }
  0x17   :  { %424 = vst.msk [vmem:[%s1280_s3 + $0x78] sm:$0xff] %vm408_vm0, %v359_v48  ;;  %v233_v57 = vmax.f32 %v169_v50, 0.0  ;;  %v172_v60 = vadd.f32 %v507_v1, %v104_v51  ;;  %v107_v62 = vmul.f32 %v502_v0, %v39_v46  ;;  %v360_v2 = vadd.f32 %v296_v49, %v232_v52  ;;  %v306_v44 = vld [vmem:[%s1279_s2 + $0xd0] sm:$0xff]  ;;  %v307_v45 = vld [vmem:[%s1279_s2 + $0xd8] sm:$0xff]  ;;  %v48_v49 = vld [vmem:[%s1277_s0 + $0x100] sm:$0xff] }
  0x18   :  { %v234_v3 = vmax.f32 %v170_v54, 0.0  ;;  %v235_v4 = vmax.f32 %v171_v55, 0.0  ;;  %v173_v6 = vadd.f32 %v507_v1, %v105_v56  ;;  %v174_v11 = vadd.f32 %v507_v1, %v106_v61  ;;  %v49_v55 = vld [vmem:[%s1277_s0 + $0x108] sm:$0xff]  ;;  %v50_v61 = vld [vmem:[%s1277_s0 + $0x110] sm:$0xff] }
  0x19   :  { %v361_v8 = vadd.f32 %v297_v53, %v233_v57  ;;  %v236_v9 = vmax.f32 %v172_v60, 0.0  ;;  %v175_v12 = vadd.f32 %v507_v1, %v107_v62  ;;  %425 = vst.msk [vmem:[%s1280_s3 + $0x80] sm:$0xff] %vm408_vm0, %v360_v2  ;;  %v108_v20 = vmul.f32 %v502_v0, %v40_v63  ;;  %v308_v53 = vld [vmem:[%s1279_s2 + $0xe0] sm:$0xff]  ;;  %v51_v62 = vld [vmem:[%s1277_s0 + $0x118] sm:$0xff] }
  0x1a   :  { %v362_v15 = vadd.f32 %v298_v58, %v234_v3  ;;  %v363_v16 = vadd.f32 %v299_v59, %v235_v4  ;;  %v237_v17 = vmax.f32 %v173_v6, 0.0  ;;  %v238_v23 = vmax.f32 %v174_v11, 0.0  ;;  %v309_v58 = vld [vmem:[%s1279_s2 + $0xe8] sm:$0xff]  ;;  %v310_v4 = vld [vmem:[%s1279_s2 + $0xf0] sm:$0xff] }
  0x1b   :  { %426 = vst.msk [vmem:[%s1280_s3 + $0x88] sm:$0xff] %vm408_vm0, %v361_v8  ;;  %v364_v22 = vadd.f32 %v300_v5, %v236_v9  ;;  %v239_v24 = vmax.f32 %v175_v12, 0.0  ;;  %v109_v25 = vmul.f32 %v502_v0, %v41_v7  ;;  %v176_v28 = vadd.f32 %v507_v1, %v108_v20  ;;  %v311_v5 = vld [vmem:[%s1279_s2 + $0xf8] sm:$0xff]  ;;  %v52_v7 = vld [vmem:[%s1277_s0 + $0x120] sm:$0xff]  ;;  %v53_v12 = vld [vmem:[%s1277_s0 + $0x128] sm:$0xff] }
  0x1c   :  { %427 = vst.msk [vmem:[%s1280_s3 + $0x90] sm:$0xff] %vm408_vm0, %v362_v15  ;;  %428 = vst.msk [vmem:[%s1280_s3 + $0x98] sm:$0xff] %vm408_vm0, %v363_v16  ;;  %v365_v27 = vadd.f32 %v301_v10, %v237_v17  ;;  %v110_v29 = vmul.f32 %v502_v0, %v42_v13  ;;  %v111_v30 = vmul.f32 %v502_v0, %v43_v14  ;;  %v54_v17 = vld [vmem:[%s1277_s0 + $0x130] sm:$0xff] }
  0x1d   :  { %429 = vst.msk [vmem:[%s1280_s3 + $0xa0] sm:$0xff] %vm408_vm0, %v364_v22  ;;  %v366_v33 = vadd.f32 %v302_v18, %v238_v23  ;;  %v367_v34 = vadd.f32 %v303_v19, %v239_v24  ;;  %v177_v36 = vadd.f32 %v507_v1, %v109_v25  ;;  %v112_v37 = vmul.f32 %v502_v0, %v44_v21  ;;  %v55_v18 = vld [vmem:[%s1277_s0 + $0x138] sm:$0xff]  ;;  %v312_v21 = vld [vmem:[%s1279_s2 + $0x100] sm:$0xff]  ;;  %v313_v25 = vld [vmem:[%s1279_s2 + $0x108] sm:$0xff] }
  0x1e   :  { %430 = vst.msk [vmem:[%s1280_s3 + $0xa8] sm:$0xff] %vm408_vm0, %v365_v27  ;;  %v240_v38 = vmax.f32 %v176_v28, 0.0  ;;  %v178_v40 = vadd.f32 %v507_v1, %v110_v29  ;;  %v179_v41 = vadd.f32 %v507_v1, %v111_v30  ;;  %v113_v42 = vmul.f32 %v502_v0, %v45_v26  ;;  %v314_v30 = vld [vmem:[%s1279_s2 + $0x110] sm:$0xff] }
  0x1f   :  { %431 = vst.msk [vmem:[%s1280_s3 + $0xb0] sm:$0xff] %vm408_vm0, %v366_v33  ;;  %432 = vst.msk [vmem:[%s1280_s3 + $0xb8] sm:$0xff] %vm408_vm0, %v367_v34  ;;  %v241_v43 = vmax.f32 %v177_v36, 0.0  ;;  %v180_v46 = vadd.f32 %v507_v1, %v112_v37  ;;  %v114_v47 = vmul.f32 %v502_v0, %v46_v31  ;;  %v115_v48 = vmul.f32 %v502_v0, %v47_v32  ;;  %v315_v31 = vld [vmem:[%s1279_s2 + $0x118] sm:$0xff] }
  0x20   :  { %v368_v50 = vadd.f32 %v304_v35, %v240_v38  ;;  %v242_v51 = vmax.f32 %v178_v40, 0.0  ;;  %v243_v52 = vmax.f32 %v179_v41, 0.0  ;;  %v181_v54 = vadd.f32 %v507_v1, %v113_v42  ;;  %v56_v35 = vld [vmem:[%s1277_s0 + $0x140] sm:$0xff]  ;;  %v57_v41 = vld [vmem:[%s1277_s0 + $0x148] sm:$0xff] }
  0x21   :  { %v369_v56 = vadd.f32 %v305_v39, %v241_v43  ;;  %v244_v57 = vmax.f32 %v180_v46, 0.0  ;;  %v182_v59 = vadd.f32 %v507_v1, %v114_v47  ;;  %v183_v60 = vadd.f32 %v507_v1, %v115_v48  ;;  %v316_v39 = vld [vmem:[%s1279_s2 + $0x120] sm:$0xff]  ;;  %v58_v47 = vld [vmem:[%s1277_s0 + $0x150] sm:$0xff]  ;;  %v59_v48 = vld [vmem:[%s1277_s0 + $0x158] sm:$0xff] }
  0x22   :  { %433 = vst.msk [vmem:[%s1280_s3 + $0xc0] sm:$0xff] %vm408_vm0, %v368_v50  ;;  %v370_v63 = vadd.f32 %v306_v44, %v242_v51  ;;  %v371_v2 = vadd.f32 %v307_v45, %v243_v52  ;;  %v245_v3 = vmax.f32 %v181_v54, 0.0  ;;  %v116_v6 = vmul.f32 %v502_v0, %v48_v49  ;;  %v317_v44 = vld [vmem:[%s1279_s2 + $0x128] sm:$0xff]  ;;  %v318_v52 = vld [vmem:[%s1279_s2 + $0x130] sm:$0xff] }
  0x23   :  { %434 = vst.msk [vmem:[%s1280_s3 + $0xc8] sm:$0xff] %vm408_vm0, %v369_v56  ;;  %v372_v8 = vadd.f32 %v308_v53, %v244_v57  ;;  %v246_v9 = vmax.f32 %v182_v59, 0.0  ;;  %v247_v10 = vmax.f32 %v183_v60, 0.0  ;;  %v117_v11 = vmul.f32 %v502_v0, %v49_v55  ;;  %v319_v53 = vld [vmem:[%s1279_s2 + $0x138] sm:$0xff]  ;;  %v60_v55 = vld [vmem:[%s1277_s0 + $0x160] sm:$0xff]  ;;  %v61_v60 = vld [vmem:[%s1277_s0 + $0x168] sm:$0xff] }
  0x24   :  { %435 = vst.msk [vmem:[%s1280_s3 + $0xd0] sm:$0xff] %vm408_vm0, %v370_v63  ;;  %436 = vst.msk [vmem:[%s1280_s3 + $0xd8] sm:$0xff] %vm408_vm0, %v371_v2  ;;  %v373_v13 = vadd.f32 %v309_v58, %v245_v3  ;;  %v184_v14 = vadd.f32 %v507_v1, %v116_v6  ;;  %v118_v15 = vmul.f32 %v502_v0, %v50_v61  ;;  %v62_v3 = vld [vmem:[%s1277_s0 + $0x170] sm:$0xff] }
  0x25   :  { %v119_v16 = vmul.f32 %v502_v0, %v51_v62  ;;  %437 = vst.msk [vmem:[%s1280_s3 + $0xe0] sm:$0xff] %vm408_vm0, %v372_v8  ;;  %v374_v19 = vadd.f32 %v310_v4, %v246_v9  ;;  %v375_v20 = vadd.f32 %v311_v5, %v247_v10  ;;  %v185_v22 = vadd.f32 %v507_v1, %v117_v11  ;;  %v63_v4 = vld [vmem:[%s1277_s0 + $0x178] sm:$0xff]  ;;  %v321_v11 = vld [vmem:[%s1279_s2 + $0x148] sm:$0xff] }
  0x26   :  { %v120_v23 = vmul.f32 %v502_v0, %v52_v7  ;;  %438 = vst.msk [vmem:[%s1280_s3 + $0xe8] sm:$0xff] %vm408_vm0, %v373_v13  ;;  %v248_v24 = vmax.f32 %v184_v14, 0.0  ;;  %v186_v26 = vadd.f32 %v507_v1, %v118_v15  ;;  %v121_v28 = vmul.f32 %v502_v0, %v53_v12  ;;  %v320_v7 = vld [vmem:[%s1279_s2 + $0x140] sm:$0xff] }
  0x27   :  { %v187_v27 = vadd.f32 %v507_v1, %v119_v16  ;;  %439 = vst.msk [vmem:[%s1280_s3 + $0xf0] sm:$0xff] %vm408_vm0, %v374_v19  ;;  %440 = vst.msk [vmem:[%s1280_s3 + $0xf8] sm:$0xff] %vm408_vm0, %v375_v20  ;;  %v249_v29 = vmax.f32 %v185_v22, 0.0  ;;  %v122_v33 = vmul.f32 %v502_v0, %v54_v17  ;;  %v123_v34 = vmul.f32 %v502_v0, %v55_v18  ;;  %v322_v16 = vld [vmem:[%s1279_s2 + $0x150] sm:$0xff]  ;;  %v323_v17 = vld [vmem:[%s1279_s2 + $0x158] sm:$0xff] }
  0x28   :  { %v188_v32 = vadd.f32 %v507_v1, %v120_v23  ;;  %v376_v36 = vadd.f32 %v312_v21, %v248_v24  ;;  %v250_v37 = vmax.f32 %v186_v26, 0.0  ;;  %v189_v40 = vadd.f32 %v507_v1, %v121_v28  ;;  %v64_v21 = vld [vmem:[%s1277_s0 + $0x180] sm:$0xff] }
  0x29   :  { %v251_v38 = vmax.f32 %v187_v27, 0.0  ;;  %v377_v42 = vadd.f32 %v313_v25, %v249_v29  ;;  %v190_v45 = vadd.f32 %v507_v1, %v122_v33  ;;  %v191_v46 = vadd.f32 %v507_v1, %v123_v34  ;;  %v324_v25 = vld [vmem:[%s1279_s2 + $0x160] sm:$0xff]  ;;  %v65_v27 = vld [vmem:[%s1277_s0 + $0x188] sm:$0xff]  ;;  %v66_v33 = vld [vmem:[%s1277_s0 + $0x190] sm:$0xff] }
  0x2a   :  { %v252_v43 = vmax.f32 %v188_v32, 0.0  ;;  %441 = vst.msk [vmem:[%s1280_s3 + $0x100] sm:$0xff] %vm408_vm0, %v376_v36  ;;  %v378_v49 = vadd.f32 %v314_v30, %v250_v37  ;;  %v253_v51 = vmax.f32 %v189_v40, 0.0  ;;  %v124_v54 = vmul.f32 %v502_v0, %v56_v35  ;;  %v325_v30 = vld [vmem:[%s1279_s2 + $0x168] sm:$0xff]  ;;  %v67_v34 = vld [vmem:[%s1277_s0 + $0x198] sm:$0xff] }
  0x2b   :  { %v379_v50 = vadd.f32 %v315_v31, %v251_v38  ;;  %442 = vst.msk [vmem:[%s1280_s3 + $0x108] sm:$0xff] %vm408_vm0, %v377_v42  ;;  %v254_v57 = vmax.f32 %v190_v45, 0.0  ;;  %v255_v58 = vmax.f32 %v191_v46, 0.0  ;;  %v125_v59 = vmul.f32 %v502_v0, %v57_v41  ;;  %v326_v38 = vld [vmem:[%s1279_s2 + $0x170] sm:$0xff]  ;;  %v68_v41 = vld [vmem:[%s1277_s0 + $0x1a0] sm:$0xff]  ;;  %v69_v46 = vld [vmem:[%s1277_s0 + $0x1a8] sm:$0xff] }
  0x2c   :  { %v380_v56 = vadd.f32 %v316_v39, %v252_v43  ;;  %443 = vst.msk [vmem:[%s1280_s3 + $0x110] sm:$0xff] %vm408_vm0, %v378_v49  ;;  %v381_v61 = vadd.f32 %v317_v44, %v253_v51  ;;  %v192_v62 = vadd.f32 %v507_v1, %v124_v54  ;;  %v126_v63 = vmul.f32 %v502_v0, %v58_v47  ;;  %v327_v39 = vld [vmem:[%s1279_s2 + $0x178] sm:$0xff]  ;;  %v70_v51 = vld [vmem:[%s1277_s0 + $0x1b0] sm:$0xff] }
  0x2d   :  { %444 = vst.msk [vmem:[%s1280_s3 + $0x118] sm:$0xff] %vm408_vm0, %v379_v50  ;;  %v127_v2 = vmul.f32 %v502_v0, %v59_v48  ;;  %v382_v5 = vadd.f32 %v318_v52, %v254_v57  ;;  %v383_v6 = vadd.f32 %v319_v53, %v255_v58  ;;  %v193_v8 = vadd.f32 %v507_v1, %v125_v59  ;;  %v71_v52 = vld [vmem:[%s1277_s0 + $0x1b8] sm:$0xff]  ;;  %v329_v59 = vld [vmem:[%s1279_s2 + $0x188] sm:$0xff] }
  0x2e   :  { %445 = vst.msk [vmem:[%s1280_s3 + $0x120] sm:$0xff] %vm408_vm0, %v380_v56  ;;  %v128_v9 = vmul.f32 %v502_v0, %v60_v55  ;;  %446 = vst.msk [vmem:[%s1280_s3 + $0x128] sm:$0xff] %vm408_vm0, %v381_v61  ;;  %v256_v10 = vmax.f32 %v192_v62, 0.0  ;;  %v194_v12 = vadd.f32 %v507_v1, %v126_v63  ;;  %v129_v14 = vmul.f32 %v502_v0, %v61_v60  ;;  %v328_v55 = vld [vmem:[%s1279_s2 + $0x180] sm:$0xff] }
  0x2f   :  { %v195_v13 = vadd.f32 %v507_v1, %v127_v2  ;;  %447 = vst.msk [vmem:[%s1280_s3 + $0x130] sm:$0xff] %vm408_vm0, %v382_v5  ;;  %448 = vst.msk [vmem:[%s1280_s3 + $0x138] sm:$0xff] %vm408_vm0, %v383_v6  ;;  %v257_v15 = vmax.f32 %v193_v8, 0.0  ;;  %v130_v19 = vmul.f32 %v502_v0, %v62_v3  ;;  %v131_v20 = vmul.f32 %v502_v0, %v63_v4  ;;  %v330_v2 = vld [vmem:[%s1279_s2 + $0x190] sm:$0xff]  ;;  %v331_v3 = vld [vmem:[%s1279_s2 + $0x198] sm:$0xff] }
  0x30   :  { %v196_v18 = vadd.f32 %v507_v1, %v128_v9  ;;  %v384_v22 = vadd.f32 %v320_v7, %v256_v10  ;;  %v258_v23 = vmax.f32 %v194_v12, 0.0  ;;  %v197_v26 = vadd.f32 %v507_v1, %v129_v14  ;;  %v72_v7 = vld [vmem:[%s1277_s0 + $0x1c0] sm:$0xff] }
  0x31   :  { %v259_v24 = vmax.f32 %v195_v13, 0.0  ;;  %v385_v28 = vadd.f32 %v321_v11, %v257_v15  ;;  %v198_v31 = vadd.f32 %v507_v1, %v130_v19  ;;  %v199_v32 = vadd.f32 %v507_v1, %v131_v20  ;;  %v332_v11 = vld [vmem:[%s1279_s2 + $0x1a0] sm:$0xff]  ;;  %v73_v13 = vld [vmem:[%s1277_s0 + $0x1c8] sm:$0xff]  ;;  %v74_v19 = vld [vmem:[%s1277_s0 + $0x1d0] sm:$0xff] }
  0x32   :  { %v260_v29 = vmax.f32 %v196_v18, 0.0  ;;  %449 = vst.msk [vmem:[%s1280_s3 + $0x140] sm:$0xff] %vm408_vm0, %v384_v22  ;;  %v386_v35 = vadd.f32 %v322_v16, %v258_v23  ;;  %v261_v37 = vmax.f32 %v197_v26, 0.0  ;;  %v132_v40 = vmul.f32 %v502_v0, %v64_v21  ;;  %v333_v16 = vld [vmem:[%s1279_s2 + $0x1a8] sm:$0xff]  ;;  %v75_v20 = vld [vmem:[%s1277_s0 + $0x1d8] sm:$0xff] }
  0x33   :  { %v387_v36 = vadd.f32 %v323_v17, %v259_v24  ;;  %450 = vst.msk [vmem:[%s1280_s3 + $0x148] sm:$0xff] %vm408_vm0, %v385_v28  ;;  %v262_v43 = vmax.f32 %v198_v31, 0.0  ;;  %v263_v44 = vmax.f32 %v199_v32, 0.0  ;;  %v133_v45 = vmul.f32 %v502_v0, %v65_v27  ;;  %v334_v24 = vld [vmem:[%s1279_s2 + $0x1b0] sm:$0xff]  ;;  %v76_v27 = vld [vmem:[%s1277_s0 + $0x1e0] sm:$0xff]  ;;  %v77_v32 = vld [vmem:[%s1277_s0 + $0x1e8] sm:$0xff] }
  0x34   :  { %v388_v42 = vadd.f32 %v324_v25, %v260_v29  ;;  %451 = vst.msk [vmem:[%s1280_s3 + $0x150] sm:$0xff] %vm408_vm0, %v386_v35  ;;  %v389_v47 = vadd.f32 %v325_v30, %v261_v37  ;;  %v200_v48 = vadd.f32 %v507_v1, %v132_v40  ;;  %v134_v49 = vmul.f32 %v502_v0, %v66_v33  ;;  %v335_v25 = vld [vmem:[%s1279_s2 + $0x1b8] sm:$0xff]  ;;  %v78_v37 = vld [vmem:[%s1277_s0 + $0x1f0] sm:$0xff] }
  0x35   :  { %452 = vst.msk [vmem:[%s1280_s3 + $0x158] sm:$0xff] %vm408_vm0, %v387_v36  ;;  %v135_v50 = vmul.f32 %v502_v0, %v67_v34  ;;  %v390_v53 = vadd.f32 %v326_v38, %v262_v43  ;;  %v391_v54 = vadd.f32 %v327_v39, %v263_v44  ;;  %v201_v56 = vadd.f32 %v507_v1, %v133_v45  ;;  %v79_v38 = vld [vmem:[%s1277_s0 + $0x1f8] sm:$0xff]  ;;  %v337_v45 = vld [vmem:[%s1279_s2 + $0x1c8] sm:$0xff] }
  0x36   :  { %453 = vst.msk [vmem:[%s1280_s3 + $0x160] sm:$0xff] %vm408_vm0, %v388_v42  ;;  %v136_v57 = vmul.f32 %v502_v0, %v68_v41  ;;  %454 = vst.msk [vmem:[%s1280_s3 + $0x168] sm:$0xff] %vm408_vm0, %v389_v47  ;;  %v264_v58 = vmax.f32 %v200_v48, 0.0  ;;  %v202_v60 = vadd.f32 %v507_v1, %v134_v49  ;;  %v137_v62 = vmul.f32 %v502_v0, %v69_v46  ;;  %v336_v41 = vld [vmem:[%s1279_s2 + $0x1c0] sm:$0xff] }
  0x37   :  { %v203_v61 = vadd.f32 %v507_v1, %v135_v50  ;;  %455 = vst.msk [vmem:[%s1280_s3 + $0x170] sm:$0xff] %vm408_vm0, %v390_v53  ;;  %456 = vst.msk [vmem:[%s1280_s3 + $0x178] sm:$0xff] %vm408_vm0, %v391_v54  ;;  %v265_v63 = vmax.f32 %v201_v56, 0.0  ;;  %v138_v5 = vmul.f32 %v502_v0, %v70_v51  ;;  %v139_v6 = vmul.f32 %v502_v0, %v71_v52  ;;  %v338_v50 = vld [vmem:[%s1279_s2 + $0x1d0] sm:$0xff]  ;;  %v339_v51 = vld [vmem:[%s1279_s2 + $0x1d8] sm:$0xff] }
  0x38   :  { %v204_v4 = vadd.f32 %v507_v1, %v136_v57  ;;  %v392_v8 = vadd.f32 %v328_v55, %v264_v58  ;;  %v266_v9 = vmax.f32 %v202_v60, 0.0  ;;  %v205_v12 = vadd.f32 %v507_v1, %v137_v62  ;;  %v340_v58 = vld [vmem:[%s1279_s2 + $0x1e0] sm:$0xff]  ;;  %v341_v62 = vld [vmem:[%s1279_s2 + $0x1e8] sm:$0xff] }
  0x39   :  { %v267_v10 = vmax.f32 %v203_v61, 0.0  ;;  %v393_v14 = vadd.f32 %v329_v59, %v265_v63  ;;  %v206_v17 = vadd.f32 %v507_v1, %v138_v5  ;;  %v207_v18 = vadd.f32 %v507_v1, %v139_v6  ;;  %v342_v5 = vld [vmem:[%s1279_s2 + $0x1f0] sm:$0xff]  ;;  %v343_v6 = vld [vmem:[%s1279_s2 + $0x1f8] sm:$0xff] }
  0x3a   :  { %v268_v15 = vmax.f32 %v204_v4, 0.0  ;;  %457 = vst.msk [vmem:[%s1280_s3 + $0x180] sm:$0xff] %vm408_vm0, %v392_v8  ;;  %v394_v21 = vadd.f32 %v330_v2, %v266_v9  ;;  %v269_v23 = vmax.f32 %v205_v12, 0.0  ;;  %v140_v26 = vmul.f32 %v502_v0, %v72_v7 }
  0x3b   :  { %v395_v22 = vadd.f32 %v331_v3, %v267_v10  ;;  %458 = vst.msk [vmem:[%s1280_s3 + $0x188] sm:$0xff] %vm408_vm0, %v393_v14  ;;  %v270_v29 = vmax.f32 %v206_v17, 0.0  ;;  %v271_v30 = vmax.f32 %v207_v18, 0.0  ;;  %v141_v31 = vmul.f32 %v502_v0, %v73_v13 }
  0x3c   :  { %v396_v28 = vadd.f32 %v332_v11, %v268_v15  ;;  %459 = vst.msk [vmem:[%s1280_s3 + $0x190] sm:$0xff] %vm408_vm0, %v394_v21  ;;  %v397_v33 = vadd.f32 %v333_v16, %v269_v23  ;;  %v208_v34 = vadd.f32 %v507_v1, %v140_v26  ;;  %v142_v35 = vmul.f32 %v502_v0, %v74_v19 }
  0x3d   :  { %460 = vst.msk [vmem:[%s1280_s3 + $0x198] sm:$0xff] %vm408_vm0, %v395_v22  ;;  %v143_v36 = vmul.f32 %v502_v0, %v75_v20  ;;  %v398_v39 = vadd.f32 %v334_v24, %v270_v29  ;;  %v399_v40 = vadd.f32 %v335_v25, %v271_v30  ;;  %v209_v42 = vadd.f32 %v507_v1, %v141_v31 }
  0x3e   :  { %461 = vst.msk [vmem:[%s1280_s3 + $0x1a0] sm:$0xff] %vm408_vm0, %v396_v28  ;;  %v144_v43 = vmul.f32 %v502_v0, %v76_v27  ;;  %462 = vst.msk [vmem:[%s1280_s3 + $0x1a8] sm:$0xff] %vm408_vm0, %v397_v33  ;;  %v272_v44 = vmax.f32 %v208_v34, 0.0  ;;  %v210_v46 = vadd.f32 %v507_v1, %v142_v35  ;;  %v145_v48 = vmul.f32 %v502_v0, %v77_v32 }
  0x3f   :  { %v211_v47 = vadd.f32 %v507_v1, %v143_v36  ;;  %463 = vst.msk [vmem:[%s1280_s3 + $0x1b0] sm:$0xff] %vm408_vm0, %v398_v39  ;;  %464 = vst.msk [vmem:[%s1280_s3 + $0x1b8] sm:$0xff] %vm408_vm0, %v399_v40  ;;  %v273_v49 = vmax.f32 %v209_v42, 0.0  ;;  %v146_v53 = vmul.f32 %v502_v0, %v78_v37  ;;  %v147_v54 = vmul.f32 %v502_v0, %v79_v38 }
  0x40   :  { %v212_v52 = vadd.f32 %v507_v1, %v144_v43  ;;  %v400_v55 = vadd.f32 %v336_v41, %v272_v44  ;;  %v274_v56 = vmax.f32 %v210_v46, 0.0  ;;  %v213_v59 = vadd.f32 %v507_v1, %v145_v48 }
  0x41   :  { %v275_v57 = vmax.f32 %v211_v47, 0.0  ;;  %v401_v60 = vadd.f32 %v337_v45, %v273_v49  ;;  %v214_v63 = vadd.f32 %v507_v1, %v146_v53  ;;  %v215_v2 = vadd.f32 %v507_v1, %v147_v54 }
  0x42   :  { %v276_v61 = vmax.f32 %v212_v52, 0.0  ;;  %465 = vst.msk [vmem:[%s1280_s3 + $0x1c0] sm:$0xff] %vm408_vm0, %v400_v55  ;;  %v402_v0 = vadd.f32 %v338_v50, %v274_v56  ;;  %v277_v4 = vmax.f32 %v213_v59, 0.0 }
  0x43   :  { %v403_v3 = vadd.f32 %v339_v51, %v275_v57  ;;  %466 = vst.msk [vmem:[%s1280_s3 + $0x1c8] sm:$0xff] %vm408_vm0, %v401_v60  ;;  %v278_v7 = vmax.f32 %v214_v63, 0.0  ;;  %v279_v8 = vmax.f32 %v215_v2, 0.0 }
  0x44   :  { %v404_v1 = vadd.f32 %v340_v58, %v276_v61  ;;  %467 = vst.msk [vmem:[%s1280_s3 + $0x1d0] sm:$0xff] %vm408_vm0, %v402_v0  ;;  %v405_v9 = vadd.f32 %v341_v62, %v277_v4 }
  0x45   :  { %468 = vst.msk [vmem:[%s1280_s3 + $0x1d8] sm:$0xff] %vm408_vm0, %v403_v3  ;;  %v406_v10 = vadd.f32 %v342_v5, %v278_v7  ;;  %v407_v11 = vadd.f32 %v343_v6, %v279_v8 }
  0x46   :  { %469 = vst.msk [vmem:[%s1280_s3 + $0x1e0] sm:$0xff] %vm408_vm0, %v404_v1  ;;  %470 = vst.msk [vmem:[%s1280_s3 + $0x1e8] sm:$0xff] %vm408_vm0, %v405_v9 }
  0x47   :  { %471 = vst.msk [vmem:[%s1280_s3 + $0x1f0] sm:$0xff] %vm408_vm0, %v406_v10  ;;  %472 = vst.msk [vmem:[%s1280_s3 + $0x1f8] sm:$0xff] %vm408_vm0, %v407_v11 }

// kernel: fbnet_unit_forward.4
= control target key start
LH: loop header
LB: loop body
LE: loop exit
PB: predicated region body
PF: predicated region fallthrough
CT: control target
= control target key end

     0   :  { %vm336_vm0 = vcmask 1041408   ;;  %vm239_vm1 = vcmask 31744   ;;  %vm1220_vm2 = vcmask 60416   ;;  %vm629_vm3 = vcmask 64512   ;;  %s2387_s1 = inlined_call_operand.vmem [shape: bf16[4,8], index: 1, kind: input, shape index: {}]   ;;  %s2388_s0 = inlined_call_operand.vmem [shape: bf16[512,4], index: 0, kind: input, shape index: {}]   ;;  %s2389_s2 = inlined_call_operand.vmem [shape: bf16[512,8], index: 2, kind: output, shape index: {0}]   ;;  %s2390_s3 = inlined_call_operand.vmem [shape: f32[1,8,8], index: 3, kind: output, shape index: {1}]  }
   0x1   :  { %v78_v0 = vld [vmem:[%s2387_s1] sm:$0x3]  ;;  %v1589_v3 = vld [vmem:[%s2388_s0 + $0x8] sm:$0xff]   ;;  %v1590_v4 = vld [vmem:[%s2388_s0 + $0x10] sm:$0xff]   ;;  %vm960_vm4 = vcmask 1040384  }
   0x2   :  { %1586 = vmatprep.subr.msk.bf16.mxu0 %vm336_vm0, %v78_v0  ;;  %v338_v1 = vsel %vm336_vm0, %v78_v0, 0  ;;  %v1588_v2 = vld [vmem:[%s2388_s0] sm:$0xff]   ;;  %1587 = vmatprep.subr.msk.bf16.mxu1 %vm336_vm0, %v78_v0  ;;  %v1591_v5 = vld [vmem:[%s2388_s0 + $0x18] sm:$0xff]   ;;  %v1593_v7 = vld [vmem:[%s2388_s0 + $0x28] sm:$0xff]  }
   0x3   :  { %1519 = vmatpush3.bf16.msra.mxu0 %v338_v1  ;;  %1585 = vmatpush3.bf16.msra.mxu1 %v338_v1  ;;  %v1592_v6 = vld [vmem:[%s2388_s0 + $0x20] sm:$0xff]   ;;  %v1594_v8 = vld [vmem:[%s2388_s0 + $0x30] sm:$0xff]   ;;  %v1605_v10 = vld [vmem:[%s2388_s0 + $0x88] sm:$0xff]  }
   0x4   :  { %1520 = vmatprep.mubr.msk.bf16.mxu0 %vm239_vm1, %v1588_v2  ;;  %v1604_v9 = vld [vmem:[%s2388_s0 + $0x80] sm:$0xff]   ;;  %v1606_v11 = vld [vmem:[%s2388_s0 + $0x90] sm:$0xff]   ;;  %v1595_v12 = vld [vmem:[%s2388_s0 + $0x38] sm:$0xff]  }
   0x5   :  { %1552 = vmatprep.mubr.msk.bf16.mxu1 %vm239_vm1, %v1604_v9  ;;  %v1607_v13 = vld [vmem:[%s2388_s0 + $0x98] sm:$0xff]   ;;  %v1608_v14 = vld [vmem:[%s2388_s0 + $0xa0] sm:$0xff]   ;;  %v1609_v16 = vld [vmem:[%s2388_s0 + $0xa8] sm:$0xff]  }
   0x6   :  { %1521 = vmatmul.mubr.msk.bf16.vlgmr.msra.gmra.mxu0 %vm239_vm1, %v1589_v3  ;;  %1553 = vmatmul.mubr.msk.bf16.vlgmr.msra.gmra.mxu1 %vm239_vm1, %v1605_v10  ;;  %v1596_v15 = vld [vmem:[%s2388_s0 + $0x40] sm:$0xff]   ;;  %v1597_v17 = vld [vmem:[%s2388_s0 + $0x48] sm:$0xff]   ;;  %v1610_v18 = vld [vmem:[%s2388_s0 + $0xb0] sm:$0xff]  }
   0x7   :  { %1524 = vmatprep.mubr.msk.bf16.mxu0 %vm239_vm1, %v1590_v4  ;;  %1556 = vmatprep.mubr.msk.bf16.mxu1 %vm239_vm1, %v1606_v11  ;;  %v1598_v19 = vld [vmem:[%s2388_s0 + $0x50] sm:$0xff]   ;;  %v1611_v20 = vld [vmem:[%s2388_s0 + $0xb8] sm:$0xff]   ;;  %v1612_v22 = vld [vmem:[%s2388_s0 + $0xc0] sm:$0xff]  }
   0x8   :  { %v1599_v21 = vld [vmem:[%s2388_s0 + $0x58] sm:$0xff]   ;;  %v1600_v23 = vld [vmem:[%s2388_s0 + $0x60] sm:$0xff]   ;;  %v1613_v24 = vld [vmem:[%s2388_s0 + $0xc8] sm:$0xff]  }
   0x9   :  { %v1601_v25 = vld [vmem:[%s2388_s0 + $0x68] sm:$0xff]   ;;  %v1614_v26 = vld [vmem:[%s2388_s0 + $0xd0] sm:$0xff]   ;;  %v1615_v28 = vld [vmem:[%s2388_s0 + $0xd8] sm:$0xff]  }
   0xa   :  { %v1602_v27 = vld [vmem:[%s2388_s0 + $0x70] sm:$0xff]   ;;  %v1603_v29 = vld [vmem:[%s2388_s0 + $0x78] sm:$0xff]   ;;  %v1616_v30 = vld [vmem:[%s2388_s0 + $0xe0] sm:$0xff]  }
   0xb   :  { %v1617_v31 = vld [vmem:[%s2388_s0 + $0xe8] sm:$0xff]   ;;  %v1618_v32 = vld [vmem:[%s2388_s0 + $0xf0] sm:$0xff]   ;;  %v1619_v33 = vld [vmem:[%s2388_s0 + $0xf8] sm:$0xff]  }
   0xe   :  { %1525 = vmatmul.mubr.msk.bf16.gmra.mxu0 %vm239_vm1, %v1591_v5  ;;  %1557 = vmatmul.mubr.msk.bf16.gmra.mxu1 %vm239_vm1, %v1607_v13 }
   0xf   :  { %1528 = vmatprep.mubr.msk.bf16.mxu0 %vm239_vm1, %v1592_v6  ;;  %1560 = vmatprep.mubr.msk.bf16.mxu1 %vm239_vm1, %v1608_v14 }
  0x16   :  { %1529 = vmatmul.mubr.msk.bf16.gmra.mxu0 %vm239_vm1, %v1593_v7  ;;  %1561 = vmatmul.mubr.msk.bf16.gmra.mxu1 %vm239_vm1, %v1609_v16 }
  0x17   :  { %1532 = vmatprep.mubr.msk.bf16.mxu0 %vm239_vm1, %v1594_v8  ;;  %1564 = vmatprep.mubr.msk.bf16.mxu1 %vm239_vm1, %v1610_v18 }
  0x1e   :  { %1533 = vmatmul.mubr.msk.bf16.gmra.mxu0 %vm239_vm1, %v1595_v12  ;;  %1565 = vmatmul.mubr.msk.bf16.gmra.mxu1 %vm239_vm1, %v1611_v20 }
  0x1f   :  { %1536 = vmatprep.mubr.msk.bf16.mxu0 %vm239_vm1, %v1596_v15  ;;  %1568 = vmatprep.mubr.msk.bf16.mxu1 %vm239_vm1, %v1612_v22 }
  0x26   :  { %1537 = vmatmul.mubr.msk.bf16.gmra.mxu0 %vm239_vm1, %v1597_v17  ;;  %1569 = vmatmul.mubr.msk.bf16.gmra.mxu1 %vm239_vm1, %v1613_v24 }
  0x27   :  { %1540 = vmatprep.mubr.msk.bf16.mxu0 %vm239_vm1, %v1598_v19  ;;  %1572 = vmatprep.mubr.msk.bf16.mxu1 %vm239_vm1, %v1614_v26 }
  0x2e   :  { %1541 = vmatmul.mubr.msk.bf16.gmra.mxu0 %vm239_vm1, %v1599_v21  ;;  %1573 = vmatmul.mubr.msk.bf16.gmra.mxu1 %vm239_vm1, %v1615_v28 }
  0x2f   :  { %1544 = vmatprep.mubr.msk.bf16.mxu0 %vm239_vm1, %v1600_v23  ;;  %1576 = vmatprep.mubr.msk.bf16.mxu1 %vm239_vm1, %v1616_v30 }
  0x36   :  { %1545 = vmatmul.mubr.msk.bf16.gmra.mxu0 %vm239_vm1, %v1601_v25  ;;  %1577 = vmatmul.mubr.msk.bf16.gmra.mxu1 %vm239_vm1, %v1617_v31 }
  0x37   :  { %1548 = vmatprep.mubr.msk.bf16.mxu0 %vm239_vm1, %v1602_v27  ;;  %1580 = vmatprep.mubr.msk.bf16.mxu1 %vm239_vm1, %v1618_v32 }
  0x3e   :  { %1549 = vmatmul.mubr.msk.bf16.gmra.mxu0 %vm239_vm1, %v1603_v29  ;;  %1581 = vmatmul.mubr.msk.bf16.gmra.mxu1 %vm239_vm1, %v1619_v33 }
  0xc6   :  { %v1522_v34 = vpop.f32.mrf.mxu0  ;;  %v1813_v11 = vpop.f32.mrf.mxu1 }
  0xc7   :  { %v1423_v35 = vpack.c.bf16 %v1522_v34, %v1522_v34  ;;  %v765_v41 = vmul.f32 %v1522_v34, %v1522_v34  ;;  %v633_v47 = vsel %vm629_vm3, %v1522_v34, 0.0  ;;  %v1455_v23 = vpack.c.bf16 %v1813_v11, %v1813_v11 }
  0xc8   :  { %v374_v36 = vpop.f32.mrf.mxu0  ;;  %v1821_v19 = vpop.f32.mrf.mxu1 }
  0xc9   :  { %1223 = vst.msk [vmem:[%s2389_s2 + $0x8] sm:$0xf] %vm1220_vm2, %v1423_v35  ;;  %v1421_v37 = vpack.c.bf16 %v374_v36, %v374_v36  ;;  %v763_v39 = vmul.f32 %v374_v36, %v374_v36  ;;  %v630_v43 = vsel %vm629_vm3, %v374_v36, 0.0  ;;  %v830_v57 = vsel %vm629_vm3, %v765_v41, 0.0  ;;  %1255 = vst.msk [vmem:[%s2389_s2 + $0x88] sm:$0xf] %vm1220_vm2, %v1455_v23 }
  0xca   :  { %v1523_v38 = vpop.f32.mrf.mxu0  ;;  %v1831_v28 = vpop.f32.mrf.mxu1 }
  0xcb   :  { %1221 = vst.msk [vmem:[%s2389_s2] sm:$0xf] %vm1220_vm2, %v1421_v37  ;;  %v1424_v40 = vpack.c.bf16 %v1523_v38, %v1523_v38  ;;  %v827_v50 = vsel %vm629_vm3, %v763_v39, 0.0  ;;  %v766_v51 = vmul.f32 %v1523_v38, %v1523_v38  ;;  %v635_v58 = vsel %vm629_vm3, %v1523_v38, 0.0 }
  0xcc   :  { %v377_v42 = vpop.f32.mrf.mxu0  ;;  %v1843_v35 = vpop.f32.mrf.mxu1 }
  0xcd   :  { %1224 = vst.msk [vmem:[%s2389_s2 + $0xc] sm:$0xf] %vm1220_vm2, %v1424_v40  ;;  %v631_v44 = vsel %vm629_vm3, %v377_v42, 0.0  ;;  %v764_v45 = vmul.f32 %v377_v42, %v377_v42  ;;  %v1422_v46 = vpack.c.bf16 %v377_v42, %v377_v42  ;;  %v832_v0 = vsel %vm629_vm3, %v766_v51, 0.0 }
  0xce   :  { %v632_v48 = vadd.f32 %v631_v44, %v630_v43  ;;  %v1526_v49 = vpop.f32.mrf.mxu0  ;;  %v1453_v40 = vpack.c.bf16 %v1821_v19, %v1821_v19 }
  0xcf   :  { %v828_v52 = vsel %vm629_vm3, %v764_v45, 0.0  ;;  %1222 = vst.msk [vmem:[%s2389_s2 + $0x4] sm:$0xf] %vm1220_vm2, %v1422_v46  ;;  %v1427_v53 = vpack.c.bf16 %v1526_v49, %v1526_v49  ;;  %v769_v3 = vmul.f32 %v1526_v49, %v1526_v49  ;;  %v641_v15 = vsel %vm629_vm3, %v1526_v49, 0.0  ;;  %v1853_v45 = vpop.f32.mrf.mxu1 }
  0xd0   :  { %v634_v54 = vadd.f32 %v633_v47, %v632_v48  ;;  %v829_v55 = vadd.f32 %v828_v52, %v827_v50  ;;  %v390_v56 = vpop.f32.mrf.mxu0  ;;  %1253 = vst.msk [vmem:[%s2389_s2 + $0x80] sm:$0xf] %vm1220_vm2, %v1453_v40 }
  0xd1   :  { %1227 = vst.msk [vmem:[%s2389_s2 + $0x18] sm:$0xf] %vm1220_vm2, %v1427_v53  ;;  %v767_v59 = vmul.f32 %v390_v56, %v390_v56  ;;  %v1425_v60 = vpack.c.bf16 %v390_v56, %v390_v56  ;;  %v637_v1 = vsel %vm629_vm3, %v390_v56, 0.0  ;;  %v838_v24 = vsel %vm629_vm3, %v769_v3, 0.0  ;;  %v1865_v53 = vpop.f32.mrf.mxu1 }
  0xd2   :  { %v831_v61 = vadd.f32 %v830_v57, %v829_v55  ;;  %v636_v62 = vadd.f32 %v635_v58, %v634_v54  ;;  %v1527_v63 = vpop.f32.mrf.mxu0  ;;  %v1456_v57 = vpack.c.bf16 %v1831_v28, %v1831_v28 }
  0xd3   :  { %1225 = vst.msk [vmem:[%s2389_s2 + $0x10] sm:$0xf] %vm1220_vm2, %v1425_v60  ;;  %v1428_v2 = vpack.c.bf16 %v1527_v63, %v1527_v63  ;;  %v834_v7 = vsel %vm629_vm3, %v767_v59, 0.0  ;;  %v770_v16 = vmul.f32 %v1527_v63, %v1527_v63  ;;  %v643_v25 = vsel %vm629_vm3, %v1527_v63, 0.0 }
  0xd4   :  { %v638_v4 = vadd.f32 %v637_v1, %v636_v62  ;;  %v833_v5 = vadd.f32 %v832_v0, %v831_v61  ;;  %v393_v6 = vpop.f32.mrf.mxu0  ;;  %v1875_v62 = vpop.f32.mrf.mxu1  ;;  %1256 = vst.msk [vmem:[%s2389_s2 + $0x8c] sm:$0xf] %vm1220_vm2, %v1456_v57 }
  0xd5   :  { %1228 = vst.msk [vmem:[%s2389_s2 + $0x1c] sm:$0xf] %vm1220_vm2, %v1428_v2  ;;  %v639_v8 = vsel %vm629_vm3, %v393_v6, 0.0  ;;  %v768_v9 = vmul.f32 %v393_v6, %v393_v6  ;;  %v1426_v10 = vpack.c.bf16 %v393_v6, %v393_v6  ;;  %v840_v32 = vsel %vm629_vm3, %v770_v16, 0.0 }
  0xd6   :  { %v835_v12 = vadd.f32 %v834_v7, %v833_v5  ;;  %v640_v13 = vadd.f32 %v639_v8, %v638_v4  ;;  %v1530_v14 = vpop.f32.mrf.mxu0  ;;  %v1887_v5 = vpop.f32.mrf.mxu1 }
  0xd7   :  { %v836_v17 = vsel %vm629_vm3, %v768_v9, 0.0  ;;  %1226 = vst.msk [vmem:[%s2389_s2 + $0x14] sm:$0xf] %vm1220_vm2, %v1426_v10  ;;  %v1431_v18 = vpack.c.bf16 %v1530_v14, %v1530_v14  ;;  %v773_v36 = vmul.f32 %v1530_v14, %v1530_v14  ;;  %v649_v49 = vsel %vm629_vm3, %v1530_v14, 0.0 }
  0xd8   :  { %v642_v20 = vadd.f32 %v641_v15, %v640_v13  ;;  %v837_v21 = vadd.f32 %v836_v17, %v835_v12  ;;  %v406_v22 = vpop.f32.mrf.mxu0  ;;  %v1454_v10 = vpack.c.bf16 %v1843_v35, %v1843_v35  ;;  %v1897_v16 = vpop.f32.mrf.mxu1 }
  0xd9   :  { %1231 = vst.msk [vmem:[%s2389_s2 + $0x28] sm:$0xf] %vm1220_vm2, %v1431_v18  ;;  %v771_v26 = vmul.f32 %v406_v22, %v406_v22  ;;  %v1429_v27 = vpack.c.bf16 %v406_v22, %v406_v22  ;;  %v645_v33 = vsel %vm629_vm3, %v406_v22, 0.0  ;;  %v846_v58 = vsel %vm629_vm3, %v773_v36, 0.0 }
  0xda   :  { %v839_v29 = vadd.f32 %v838_v24, %v837_v21  ;;  %v644_v30 = vadd.f32 %v643_v25, %v642_v20  ;;  %v1531_v31 = vpop.f32.mrf.mxu0  ;;  %1254 = vst.msk [vmem:[%s2389_s2 + $0x84] sm:$0xf] %vm1220_vm2, %v1454_v10  ;;  %v1909_v25 = vpop.f32.mrf.mxu1 }
  0xdb   :  { %1229 = vst.msk [vmem:[%s2389_s2 + $0x20] sm:$0xf] %vm1220_vm2, %v1429_v27  ;;  %v1432_v34 = vpack.c.bf16 %v1531_v31, %v1531_v31  ;;  %v842_v41 = vsel %vm629_vm3, %v771_v26, 0.0  ;;  %v774_v50 = vmul.f32 %v1531_v31, %v1531_v31  ;;  %v651_v59 = vsel %vm629_vm3, %v1531_v31, 0.0 }
  0xdc   :  { %v646_v37 = vadd.f32 %v645_v33, %v644_v30  ;;  %v841_v38 = vadd.f32 %v840_v32, %v839_v29  ;;  %v409_v39 = vpop.f32.mrf.mxu0  ;;  %v1459_v30 = vpack.c.bf16 %v1853_v45, %v1853_v45  ;;  %v1919_v36 = vpop.f32.mrf.mxu1 }
  0xdd   :  { %1232 = vst.msk [vmem:[%s2389_s2 + $0x2c] sm:$0xf] %vm1220_vm2, %v1432_v34  ;;  %v647_v42 = vsel %vm629_vm3, %v409_v39, 0.0  ;;  %v772_v43 = vmul.f32 %v409_v39, %v409_v39  ;;  %v1430_v44 = vpack.c.bf16 %v409_v39, %v409_v39  ;;  %v848_v2 = vsel %vm629_vm3, %v774_v50, 0.0 }
  0xde   :  { %v843_v46 = vadd.f32 %v842_v41, %v841_v38  ;;  %v648_v47 = vadd.f32 %v647_v42, %v646_v37  ;;  %v1534_v48 = vpop.f32.mrf.mxu0  ;;  %1259 = vst.msk [vmem:[%s2389_s2 + $0x98] sm:$0xf] %vm1220_vm2, %v1459_v30 }
  0xdf   :  { %v844_v51 = vsel %vm629_vm3, %v772_v43, 0.0  ;;  %1230 = vst.msk [vmem:[%s2389_s2 + $0x24] sm:$0xf] %vm1220_vm2, %v1430_v44  ;;  %v1435_v52 = vpack.c.bf16 %v1534_v48, %v1534_v48  ;;  %v777_v6 = vmul.f32 %v1534_v48, %v1534_v48  ;;  %v657_v21 = vsel %vm629_vm3, %v1534_v48, 0.0  ;;  %v1931_v43 = vpop.f32.mrf.mxu1 }
  0xe0   :  { %v650_v54 = vadd.f32 %v649_v49, %v648_v47  ;;  %v845_v55 = vadd.f32 %v844_v51, %v843_v46  ;;  %v422_v56 = vpop.f32.mrf.mxu0  ;;  %v1457_v49 = vpack.c.bf16 %v1865_v53, %v1865_v53 }
  0xe1   :  { %1235 = vst.msk [vmem:[%s2389_s2 + $0x38] sm:$0xf] %vm1220_vm2, %v1435_v52  ;;  %v775_v60 = vmul.f32 %v422_v56, %v422_v56  ;;  %v1433_v61 = vpack.c.bf16 %v422_v56, %v422_v56  ;;  %v653_v3 = vsel %vm629_vm3, %v422_v56, 0.0  ;;  %v854_v31 = vsel %vm629_vm3, %v777_v6, 0.0 }
  0xe2   :  { %v847_v63 = vadd.f32 %v846_v58, %v845_v55  ;;  %v652_v0 = vadd.f32 %v651_v59, %v650_v54  ;;  %v1535_v1 = vpop.f32.mrf.mxu0  ;;  %v1941_v55 = vpop.f32.mrf.mxu1  ;;  %1257 = vst.msk [vmem:[%s2389_s2 + $0x90] sm:$0xf] %vm1220_vm2, %v1457_v49 }
  0xe3   :  { %1233 = vst.msk [vmem:[%s2389_s2 + $0x30] sm:$0xf] %vm1220_vm2, %v1433_v61  ;;  %v1436_v4 = vpack.c.bf16 %v1535_v1, %v1535_v1  ;;  %v850_v12 = vsel %vm629_vm3, %v775_v60, 0.0  ;;  %v778_v22 = vmul.f32 %v1535_v1, %v1535_v1  ;;  %v659_v32 = vsel %vm629_vm3, %v1535_v1, 0.0 }
  0xe4   :  { %v654_v7 = vadd.f32 %v653_v3, %v652_v0  ;;  %v849_v8 = vadd.f32 %v848_v2, %v847_v63  ;;  %v425_v9 = vpop.f32.mrf.mxu0  ;;  %v1953_v0 = vpop.f32.mrf.mxu1 }
  0xe5   :  { %1236 = vst.msk [vmem:[%s2389_s2 + $0x3c] sm:$0xf] %vm1220_vm2, %v1436_v4  ;;  %v655_v13 = vsel %vm629_vm3, %v425_v9, 0.0  ;;  %v776_v14 = vmul.f32 %v425_v9, %v425_v9  ;;  %v1434_v15 = vpack.c.bf16 %v425_v9, %v425_v9  ;;  %v856_v40 = vsel %vm629_vm3, %v778_v22, 0.0 }
  0xe6   :  { %v851_v17 = vadd.f32 %v850_v12, %v849_v8  ;;  %v656_v18 = vadd.f32 %v655_v13, %v654_v7  ;;  %v1538_v20 = vpop.f32.mrf.mxu0  ;;  %v1460_v4 = vpack.c.bf16 %v1875_v62, %v1875_v62  ;;  %v1963_v10 = vpop.f32.mrf.mxu1 }
  0xe7   :  { %v852_v23 = vsel %vm629_vm3, %v776_v14, 0.0  ;;  %1234 = vst.msk [vmem:[%s2389_s2 + $0x34] sm:$0xf] %vm1220_vm2, %v1434_v15  ;;  %v1439_v24 = vpack.c.bf16 %v1538_v20, %v1538_v20  ;;  %v781_v44 = vmul.f32 %v1538_v20, %v1538_v20  ;;  %v665_v59 = vsel %vm629_vm3, %v1538_v20, 0.0 }
  0xe8   :  { %v658_v26 = vadd.f32 %v657_v21, %v656_v18  ;;  %v853_v27 = vadd.f32 %v852_v23, %v851_v17  ;;  %v438_v29 = vpop.f32.mrf.mxu0  ;;  %1260 = vst.msk [vmem:[%s2389_s2 + $0x9c] sm:$0xf] %vm1220_vm2, %v1460_v4  ;;  %v1975_v20 = vpop.f32.mrf.mxu1 }
  0xe9   :  { %1239 = vst.msk [vmem:[%s2389_s2 + $0x48] sm:$0xf] %vm1220_vm2, %v1439_v24  ;;  %v779_v33 = vmul.f32 %v438_v29, %v438_v29  ;;  %v1437_v34 = vpack.c.bf16 %v438_v29, %v438_v29  ;;  %v661_v41 = vsel %vm629_vm3, %v438_v29, 0.0  ;;  %v862_v6 = vsel %vm629_vm3, %v781_v44, 0.0 }
  0xea   :  { %v855_v37 = vadd.f32 %v854_v31, %v853_v27  ;;  %v660_v38 = vadd.f32 %v659_v32, %v658_v26  ;;  %v1539_v39 = vpop.f32.mrf.mxu0  ;;  %v1458_v26 = vpack.c.bf16 %v1887_v5, %v1887_v5  ;;  %v1985_v32 = vpop.f32.mrf.mxu1 }
  0xeb   :  { %1237 = vst.msk [vmem:[%s2389_s2 + $0x40] sm:$0xf] %vm1220_vm2, %v1437_v34  ;;  %v1440_v42 = vpack.c.bf16 %v1539_v39, %v1539_v39  ;;  %v858_v50 = vsel %vm629_vm3, %v779_v33, 0.0  ;;  %v782_v60 = vmul.f32 %v1539_v39, %v1539_v39  ;;  %v667_v7 = vsel %vm629_vm3, %v1539_v39, 0.0 }
  0xec   :  { %v662_v46 = vadd.f32 %v661_v41, %v660_v38  ;;  %v857_v47 = vadd.f32 %v856_v40, %v855_v37  ;;  %v441_v48 = vpop.f32.mrf.mxu0  ;;  %1258 = vst.msk [vmem:[%s2389_s2 + $0x94] sm:$0xf] %vm1220_vm2, %v1458_v26 }
  0xed   :  { %1240 = vst.msk [vmem:[%s2389_s2 + $0x4c] sm:$0xf] %vm1220_vm2, %v1440_v42  ;;  %v663_v51 = vsel %vm629_vm3, %v441_v48, 0.0  ;;  %v780_v52 = vmul.f32 %v441_v48, %v441_v48  ;;  %v1438_v54 = vpack.c.bf16 %v441_v48, %v441_v48  ;;  %v864_v15 = vsel %vm629_vm3, %v782_v60, 0.0  ;;  %v1997_v42 = vpop.f32.mrf.mxu1 }
  0xee   :  { %v859_v56 = vadd.f32 %v858_v50, %v857_v47  ;;  %v664_v57 = vadd.f32 %v663_v51, %v662_v46  ;;  %v1542_v58 = vpop.f32.mrf.mxu0  ;;  %v1463_v48 = vpack.c.bf16 %v1897_v16, %v1897_v16 }
  0xef   :  { %v860_v61 = vsel %vm629_vm3, %v780_v52, 0.0  ;;  %1238 = vst.msk [vmem:[%s2389_s2 + $0x44] sm:$0xf] %vm1220_vm2, %v1438_v54  ;;  %v1443_v63 = vpack.c.bf16 %v1542_v58, %v1542_v58  ;;  %v785_v21 = vmul.f32 %v1542_v58, %v1542_v58  ;;  %v673_v38 = vsel %vm629_vm3, %v1542_v58, 0.0  ;;  %v2007_v54 = vpop.f32.mrf.mxu1 }
  0xf0   :  { %v666_v1 = vadd.f32 %v665_v59, %v664_v57  ;;  %v861_v2 = vadd.f32 %v860_v61, %v859_v56  ;;  %v454_v3 = vpop.f32.mrf.mxu0  ;;  %1263 = vst.msk [vmem:[%s2389_s2 + $0xa8] sm:$0xf] %vm1220_vm2, %v1463_v48 }
  0xf1   :  { %1243 = vst.msk [vmem:[%s2389_s2 + $0x58] sm:$0xf] %vm1220_vm2, %v1443_v63  ;;  %v783_v8 = vmul.f32 %v454_v3, %v454_v3  ;;  %v1441_v9 = vpack.c.bf16 %v454_v3, %v454_v3  ;;  %v669_v17 = vsel %vm629_vm3, %v454_v3, 0.0  ;;  %v870_v49 = vsel %vm629_vm3, %v785_v21, 0.0  ;;  %v2019_v63 = vpop.f32.mrf.mxu1 }
  0xf2   :  { %v863_v12 = vadd.f32 %v862_v6, %v861_v2  ;;  %v668_v13 = vadd.f32 %v667_v7, %v666_v1  ;;  %v1543_v14 = vpop.f32.mrf.mxu0  ;;  %v1461_v6 = vpack.c.bf16 %v1909_v25, %v1909_v25 }
  0xf3   :  { %1241 = vst.msk [vmem:[%s2389_s2 + $0x50] sm:$0xf] %vm1220_vm2, %v1441_v9  ;;  %v1444_v18 = vpack.c.bf16 %v1543_v14, %v1543_v14  ;;  %v866_v27 = vsel %vm629_vm3, %v783_v8, 0.0  ;;  %v786_v39 = vmul.f32 %v1543_v14, %v1543_v14  ;;  %v675_v50 = vsel %vm629_vm3, %v1543_v14, 0.0 }
  0xf4   :  { %v670_v22 = vadd.f32 %v669_v17, %v668_v13  ;;  %v865_v23 = vadd.f32 %v864_v15, %v863_v12  ;;  %v457_v24 = vpop.f32.mrf.mxu0  ;;  %v2029_v13 = vpop.f32.mrf.mxu1  ;;  %1261 = vst.msk [vmem:[%s2389_s2 + $0xa0] sm:$0xf] %vm1220_vm2, %v1461_v6 }
  0xf5   :  { %1244 = vst.msk [vmem:[%s2389_s2 + $0x5c] sm:$0xf] %vm1220_vm2, %v1444_v18  ;;  %v671_v29 = vsel %vm629_vm3, %v457_v24, 0.0  ;;  %v784_v30 = vmul.f32 %v457_v24, %v457_v24  ;;  %v1442_v31 = vpack.c.bf16 %v457_v24, %v457_v24  ;;  %v872_v59 = vsel %vm629_vm3, %v786_v39, 0.0 }
  0xf6   :  { %v867_v33 = vadd.f32 %v866_v27, %v865_v23  ;;  %v672_v34 = vadd.f32 %v671_v29, %v670_v22  ;;  %v1546_v37 = vpop.f32.mrf.mxu0  ;;  %v2041_v24 = vpop.f32.mrf.mxu1 }
  0xf7   :  { %v868_v40 = vsel %vm629_vm3, %v784_v30, 0.0  ;;  %1242 = vst.msk [vmem:[%s2389_s2 + $0x54] sm:$0xf] %vm1220_vm2, %v1442_v31  ;;  %v1447_v41 = vpack.c.bf16 %v1546_v37, %v1546_v37  ;;  %v789_v1 = vmul.f32 %v1546_v37, %v1546_v37  ;;  %v681_v18 = vsel %vm629_vm3, %v1546_v37, 0.0 }
  0xf8   :  { %v674_v44 = vadd.f32 %v673_v38, %v672_v34  ;;  %v869_v46 = vadd.f32 %v868_v40, %v867_v33  ;;  %v470_v47 = vpop.f32.mrf.mxu0  ;;  %v1464_v30 = vpack.c.bf16 %v1919_v36, %v1919_v36  ;;  %v2051_v38 = vpop.f32.mrf.mxu1 }
  0xf9   :  { %1247 = vst.msk [vmem:[%s2389_s2 + $0x68] sm:$0xf] %vm1220_vm2, %v1447_v41  ;;  %v787_v51 = vmul.f32 %v470_v47, %v470_v47  ;;  %v1445_v52 = vpack.c.bf16 %v470_v47, %v470_v47  ;;  %v677_v60 = vsel %vm629_vm3, %v470_v47, 0.0  ;;  %v878_v31 = vsel %vm629_vm3, %v789_v1, 0.0 }
  0xfa   :  { %v871_v56 = vadd.f32 %v870_v49, %v869_v46  ;;  %v676_v57 = vadd.f32 %v675_v50, %v674_v44  ;;  %v1547_v58 = vpop.f32.mrf.mxu0  ;;  %1264 = vst.msk [vmem:[%s2389_s2 + $0xac] sm:$0xf] %vm1220_vm2, %v1464_v30  ;;  %v2063_v48 = vpop.f32.mrf.mxu1  ;;  %v796_v30 = vmul.f32 %v1843_v35, %v1843_v35 }
  0xfb   :  { %1245 = vst.msk [vmem:[%s2389_s2 + $0x60] sm:$0xf] %vm1220_vm2, %v1445_v52  ;;  %v1448_v61 = vpack.c.bf16 %v1547_v58, %v1547_v58  ;;  %v874_v7 = vsel %vm629_vm3, %v787_v51, 0.0  ;;  %v790_v21 = vmul.f32 %v1547_v58, %v1547_v58  ;;  %v683_v33 = vsel %vm629_vm3, %v1547_v58, 0.0 }
  0xfc   :  { %v678_v2 = vadd.f32 %v677_v60, %v676_v57  ;;  %v873_v3 = vadd.f32 %v872_v59, %v871_v56  ;;  %v473_v4 = vpop.f32.mrf.mxu0  ;;  %v1462_v56 = vpack.c.bf16 %v1931_v43, %v1931_v43 }
  0xfd   :  { %1248 = vst.msk [vmem:[%s2389_s2 + $0x6c] sm:$0xf] %vm1220_vm2, %v1448_v61  ;;  %v679_v8 = vsel %vm629_vm3, %v473_v4, 0.0  ;;  %v788_v9 = vmul.f32 %v473_v4, %v473_v4  ;;  %v1446_v12 = vpack.c.bf16 %v473_v4, %v473_v4  ;;  %v880_v44 = vsel %vm629_vm3, %v790_v21, 0.0  ;;  %v2073_v61 = vpop.f32.mrf.mxu1 }
  0xfe   :  { %v875_v14 = vadd.f32 %v874_v7, %v873_v3  ;;  %v680_v15 = vadd.f32 %v679_v8, %v678_v2  ;;  %v1550_v17 = vpop.f32.mrf.mxu0  ;;  %1262 = vst.msk [vmem:[%s2389_s2 + $0xa4] sm:$0xf] %vm1220_vm2, %v1462_v56  ;;  %v1467_v7 = vpack.c.bf16 %v1941_v55, %v1941_v55  ;;  %v1468_v21 = vpack.c.bf16 %v1963_v10, %v1963_v10 }
  0xff   :  { %v876_v22 = vsel %vm629_vm3, %v788_v9, 0.0  ;;  %1246 = vst.msk [vmem:[%s2389_s2 + $0x64] sm:$0xf] %vm1220_vm2, %v1446_v12  ;;  %v1451_v23 = vpack.c.bf16 %v1550_v17, %v1550_v17  ;;  %v793_v49 = vmul.f32 %v1550_v17, %v1550_v17  ;;  %v689_v3 = vsel %vm629_vm3, %v1550_v17, 0.0  ;;  %v2087_v8 = vpop.f32.mrf.mxu1 }
 0x100   :  { %v682_v26 = vadd.f32 %v681_v18, %v680_v15  ;;  %v877_v27 = vadd.f32 %v876_v22, %v875_v14  ;;  %v486_v29 = vpop.f32.mrf.mxu0  ;;  %v1465_v14 = vpack.c.bf16 %v1953_v0, %v1953_v0  ;;  %v795_v18 = vmul.f32 %v1821_v19, %v1821_v19  ;;  %1267 = vst.msk [vmem:[%s2389_s2 + $0xb8] sm:$0xf] %vm1220_vm2, %v1467_v7 }
 0x101   :  { %1251 = vst.msk [vmem:[%s2389_s2 + $0x78] sm:$0xf] %vm1220_vm2, %v1451_v23  ;;  %v791_v34 = vmul.f32 %v486_v29, %v486_v29  ;;  %v1449_v37 = vpack.c.bf16 %v486_v29, %v486_v29  ;;  %v685_v46 = vsel %vm629_vm3, %v486_v29, 0.0  ;;  %v886_v15 = vsel %vm629_vm3, %v793_v49, 0.0  ;;  %1268 = vst.msk [vmem:[%s2389_s2 + $0xbc] sm:$0xf] %vm1220_vm2, %v1468_v21 }
 0x102   :  { %v879_v39 = vadd.f32 %v878_v31, %v877_v27  ;;  %v684_v40 = vadd.f32 %v683_v33, %v682_v26  ;;  %v1551_v41 = vpop.f32.mrf.mxu0  ;;  %1265 = vst.msk [vmem:[%s2389_s2 + $0xb0] sm:$0xf] %vm1220_vm2, %v1465_v14  ;;  %v2105_v26 = vpop.f32.mrf.mxu1  ;;  %v693_v29 = vsel %vm629_vm3, %v1821_v19, 0.0  ;;  %v1466_v31 = vpack.c.bf16 %v1975_v20, %v1975_v20 }
 0x103   :  { %1249 = vst.msk [vmem:[%s2389_s2 + $0x70] sm:$0xf] %vm1220_vm2, %v1449_v37  ;;  %v1452_v47 = vpack.c.bf16 %v1551_v41, %v1551_v41  ;;  %v882_v57 = vsel %vm629_vm3, %v791_v34, 0.0  ;;  %v794_v4 = vmul.f32 %v1551_v41, %v1551_v41  ;;  %v691_v17 = vsel %vm629_vm3, %v1551_v41, 0.0 }
 0x104   :  { %v686_v50 = vadd.f32 %v685_v46, %v684_v40  ;;  %v881_v51 = vadd.f32 %v880_v44, %v879_v39  ;;  %v489_v52 = vpop.f32.mrf.mxu0  ;;  %v1471_v37 = vpack.c.bf16 %v1985_v32, %v1985_v32  ;;  %v797_v39 = vmul.f32 %v1813_v11, %v1813_v11  ;;  %1266 = vst.msk [vmem:[%s2389_s2 + $0xb4] sm:$0xf] %vm1220_vm2, %v1466_v31 }
 0x105   :  { %1252 = vst.msk [vmem:[%s2389_s2 + $0x7c] sm:$0xf] %vm1220_vm2, %v1452_v47  ;;  %v687_v58 = vsel %vm629_vm3, %v489_v52, 0.0  ;;  %v792_v59 = vmul.f32 %v489_v52, %v489_v52  ;;  %v1450_v60 = vpack.c.bf16 %v489_v52, %v489_v52  ;;  %v888_v27 = vsel %vm629_vm3, %v794_v4, 0.0  ;;  %v2135_v47 = vpop.f32.mrf.mxu1 }
 0x106   :  { %v883_v1 = vadd.f32 %v882_v57, %v881_v51  ;;  %v688_v2 = vadd.f32 %v687_v58, %v686_v50  ;;  %v890_v19 = vsel %vm629_vm3, %v795_v18, 0.0  ;;  %v695_v40 = vsel %vm629_vm3, %v1843_v35, 0.0  ;;  %1271 = vst.msk [vmem:[%s2389_s2 + $0xc8] sm:$0xf] %vm1220_vm2, %v1471_v37 }
 0x107   :  { %v884_v6 = vsel %vm629_vm3, %v792_v59, 0.0  ;;  %1250 = vst.msk [vmem:[%s2389_s2 + $0x74] sm:$0xf] %vm1220_vm2, %v1450_v60  ;;  %v1469_v41 = vpack.c.bf16 %v1997_v42, %v1997_v42  ;;  %v697_v35 = vsel %vm629_vm3, %v1813_v11, 0.0  ;;  %v798_v49 = vmul.f32 %v1831_v28, %v1831_v28 }
 0x108   :  { %v690_v9 = vadd.f32 %v689_v3, %v688_v2  ;;  %v885_v12 = vadd.f32 %v884_v6, %v883_v1  ;;  %v892_v50 = vsel %vm629_vm3, %v796_v30, 0.0  ;;  %v1472_v51 = vpack.c.bf16 %v2007_v54, %v2007_v54  ;;  %v2165_v3 = vpop.f32.mrf.mxu1 }
 0x109   :  { %1269 = vst.msk [vmem:[%s2389_s2 + $0xc0] sm:$0xf] %vm1220_vm2, %v1469_v41  ;;  %v1470_v57 = vpack.c.bf16 %v2019_v63, %v2019_v63  ;;  %v894_v11 = vsel %vm629_vm3, %v797_v39, 0.0  ;;  %v699_v58 = vsel %vm629_vm3, %v1831_v28, 0.0  ;;  %v799_v59 = vmul.f32 %v1865_v53, %v1865_v53 }
 0x10a   :  { %v692_v22 = vadd.f32 %v691_v17, %v690_v9  ;;  %v887_v23 = vadd.f32 %v886_v15, %v885_v12  ;;  %1272 = vst.msk [vmem:[%s2389_s2 + $0xcc] sm:$0xf] %vm1220_vm2, %v1472_v51  ;;  %v1475_v60 = vpack.c.bf16 %v2029_v13, %v2029_v13  ;;  %v896_v28 = vsel %vm629_vm3, %v798_v49, 0.0 }
 0x10b   :  { %1270 = vst.msk [vmem:[%s2389_s2 + $0xc4] sm:$0xf] %vm1220_vm2, %v1470_v57  ;;  %v701_v4 = vsel %vm629_vm3, %v1865_v53, 0.0  ;;  %v800_v6 = vmul.f32 %v1887_v5, %v1887_v5  ;;  %v1473_v7 = vpack.c.bf16 %v2041_v24, %v2041_v24  ;;  %v1476_v14 = vpack.c.bf16 %v2051_v38, %v2051_v38 }
 0x10c   :  { %v889_v33 = vadd.f32 %v888_v27, %v887_v23  ;;  %v694_v34 = vadd.f32 %v693_v29, %v692_v22  ;;  %1275 = vst.msk [vmem:[%s2389_s2 + $0xd8] sm:$0xf] %vm1220_vm2, %v1475_v60  ;;  %v801_v15 = vmul.f32 %v1853_v45, %v1853_v45  ;;  %v898_v53 = vsel %vm629_vm3, %v799_v59, 0.0  ;;  %v2195_v23 = vpop.f32.mrf.mxu1 }
 0x10d   :  { %v703_v17 = vsel %vm629_vm3, %v1887_v5, 0.0  ;;  %1273 = vst.msk [vmem:[%s2389_s2 + $0xd0] sm:$0xf] %vm1220_vm2, %v1473_v7  ;;  %v1474_v18 = vpack.c.bf16 %v2063_v48, %v2063_v48  ;;  %1276 = vst.msk [vmem:[%s2389_s2 + $0xdc] sm:$0xf] %vm1220_vm2, %v1476_v14  ;;  %v705_v5 = vsel %vm629_vm3, %v1853_v45, 0.0  ;;  %v802_v27 = vmul.f32 %v1875_v62, %v1875_v62 }
 0x10e   :  { %v696_v44 = vadd.f32 %v695_v40, %v694_v34  ;;  %v891_v46 = vadd.f32 %v890_v19, %v889_v33  ;;  %v900_v29 = vsel %vm629_vm3, %v800_v6, 0.0  ;;  %v1479_v30 = vpack.c.bf16 %v2073_v61, %v2073_v61 }
 0x10f   :  { %1274 = vst.msk [vmem:[%s2389_s2 + $0xd4] sm:$0xf] %vm1220_vm2, %v1474_v18  ;;  %v1477_v34 = vpack.c.bf16 %v2087_v8, %v2087_v8  ;;  %v902_v45 = vsel %vm629_vm3, %v801_v15, 0.0  ;;  %v707_v37 = vsel %vm629_vm3, %v1875_v62, 0.0  ;;  %v803_v39 = vmul.f32 %v1909_v25, %v1909_v25 }
 0x110   :  { %v698_v52 = vadd.f32 %v697_v35, %v696_v44  ;;  %v893_v56 = vadd.f32 %v892_v50, %v891_v46  ;;  %1279 = vst.msk [vmem:[%s2389_s2 + $0xe8] sm:$0xf] %vm1220_vm2, %v1479_v30  ;;  %v1480_v19 = vpack.c.bf16 %v2105_v26, %v2105_v26  ;;  %v2225_v44 = vpop.f32.mrf.mxu1  ;;  %v904_v62 = vsel %vm629_vm3, %v802_v27, 0.0 }
 0x111   :  { %1277 = vst.msk [vmem:[%s2389_s2 + $0xe0] sm:$0xf] %vm1220_vm2, %v1477_v34  ;;  %v709_v46 = vsel %vm629_vm3, %v1909_v25, 0.0  ;;  %v804_v35 = vmul.f32 %v1931_v43, %v1931_v43  ;;  %v1478_v49 = vpack.c.bf16 %v2135_v47, %v2135_v47  ;;  %v906_v25 = vsel %vm629_vm3, %v803_v39, 0.0 }
 0x112   :  { %v895_v1 = vadd.f32 %v894_v11, %v893_v56  ;;  %v700_v2 = vadd.f32 %v699_v58, %v698_v52  ;;  %1280 = vst.msk [vmem:[%s2389_s2 + $0xec] sm:$0xf] %vm1220_vm2, %v1480_v19  ;;  %v1483_v52 = vpack.c.bf16 %v2165_v3, %v2165_v3  ;;  %v805_v56 = vmul.f32 %v1897_v16, %v1897_v16  ;;  %v2255_v60 = vpop.f32.mrf.mxu1 }
 0x113   :  { %v711_v57 = vsel %vm629_vm3, %v1931_v43, 0.0  ;;  %1278 = vst.msk [vmem:[%s2389_s2 + $0xe4] sm:$0xf] %vm1220_vm2, %v1478_v49  ;;  %v1481_v11 = vpack.c.bf16 %v2195_v23, %v2195_v23  ;;  %v713_v43 = vsel %vm629_vm3, %v1897_v16, 0.0  ;;  %v715_v16 = vsel %vm629_vm3, %v1919_v36, 0.0 }
 0x114   :  { %v702_v9 = vadd.f32 %v701_v4, %v700_v2  ;;  %v897_v12 = vadd.f32 %v896_v28, %v895_v1  ;;  %1283 = vst.msk [vmem:[%s2389_s2 + $0xf8] sm:$0xf] %vm1220_vm2, %v1483_v52  ;;  %v806_v1 = vmul.f32 %v1919_v36, %v1919_v36  ;;  %v908_v2 = vsel %vm629_vm3, %v804_v35, 0.0 }
 0x115   :  { %1281 = vst.msk [vmem:[%s2389_s2 + $0xf0] sm:$0xf] %vm1220_vm2, %v1481_v11  ;;  %v1484_v28 = vpack.c.bf16 %v2225_v44, %v2225_v44  ;;  %v910_v7 = vsel %vm629_vm3, %v805_v56, 0.0  ;;  %v808_v36 = vmul.f32 %v1975_v20, %v1975_v20  ;;  %v719_v27 = vsel %vm629_vm3, %v1975_v20, 0.0 }
 0x116   :  { %v899_v21 = vadd.f32 %v898_v53, %v897_v12  ;;  %v704_v22 = vadd.f32 %v703_v17, %v702_v9  ;;  %v807_v9 = vmul.f32 %v1953_v0, %v1953_v0  ;;  %v1482_v12 = vpack.c.bf16 %v2255_v60, %v2255_v60 }
 0x117   :  { %1284 = vst.msk [vmem:[%s2389_s2 + $0xfc] sm:$0xf] %vm1220_vm2, %v1484_v28  ;;  %v912_v53 = vsel %vm629_vm3, %v806_v1, 0.0  ;;  %v717_v17 = vsel %vm629_vm3, %v1953_v0, 0.0  ;;  %v721_v30 = vsel %vm629_vm3, %v1941_v55, 0.0  ;;  %v723_v39 = vsel %vm629_vm3, %v1963_v10, 0.0 }
 0x118   :  { %v706_v31 = vadd.f32 %v705_v5, %v704_v22  ;;  %v901_v33 = vadd.f32 %v900_v29, %v899_v21  ;;  %1282 = vst.msk [vmem:[%s2389_s2 + $0xf4] sm:$0xf] %vm1220_vm2, %v1482_v12  ;;  %v809_v22 = vmul.f32 %v1941_v55, %v1941_v55  ;;  %v914_v5 = vsel %vm629_vm3, %v807_v9, 0.0 }
 0x119   :  { %v811_v20 = vmul.f32 %v1997_v42, %v1997_v42  ;;  %v725_v55 = vsel %vm629_vm3, %v1997_v42, 0.0  ;;  %v813_v49 = vmul.f32 %v1985_v32, %v1985_v32  ;;  %v729_v56 = vsel %vm629_vm3, %v1985_v32, 0.0 }
 0x11a   :  { %v903_v40 = vadd.f32 %v902_v45, %v901_v33  ;;  %v708_v41 = vadd.f32 %v707_v37, %v706_v31  ;;  %v810_v31 = vmul.f32 %v1963_v10, %v1963_v10  ;;  %v916_v33 = vsel %vm629_vm3, %v808_v36, 0.0 }
 0x11b   :  { %v918_v37 = vsel %vm629_vm3, %v809_v22, 0.0  ;;  %v922_v10 = vsel %vm629_vm3, %v811_v20, 0.0  ;;  %v814_v42 = vmul.f32 %v2007_v54, %v2007_v54  ;;  %v733_v32 = vsel %vm629_vm3, %v2041_v24, 0.0 }
 0x11c   :  { %v710_v50 = vadd.f32 %v709_v46, %v708_v41  ;;  %v905_v51 = vadd.f32 %v904_v62, %v903_v40  ;;  %v920_v41 = vsel %vm629_vm3, %v810_v31, 0.0  ;;  %v812_v62 = vmul.f32 %v2019_v63, %v2019_v63 }
 0x11d   :  { %v816_v28 = vmul.f32 %v2063_v48, %v2063_v48  ;;  %v743_v31 = vsel %vm629_vm3, %v2135_v47, 0.0 }
 0x11e   :  { %v907_v58 = vadd.f32 %v906_v25, %v905_v51  ;;  %v712_v59 = vadd.f32 %v711_v57, %v710_v50  ;;  %v727_v50 = vsel %vm629_vm3, %v2019_v63, 0.0  ;;  %v924_v25 = vsel %vm629_vm3, %v812_v62, 0.0 }
 0x11f   :  { %v815_v63 = vmul.f32 %v2041_v24, %v2041_v24  ;;  %v818_v24 = vmul.f32 %v2051_v38, %v2051_v38 }
 0x120   :  { %v714_v4 = vadd.f32 %v713_v43, %v712_v59  ;;  %v909_v6 = vadd.f32 %v908_v2, %v907_v58  ;;  %v926_v58 = vsel %vm629_vm3, %v813_v49, 0.0  ;;  %v731_v59 = vsel %vm629_vm3, %v2007_v54, 0.0 }
 0x121   :  { %v928_v2 = vsel %vm629_vm3, %v814_v42, 0.0  ;;  %v930_v54 = vsel %vm629_vm3, %v815_v63, 0.0 }
 0x122   :  { %v911_v14 = vadd.f32 %v910_v7, %v909_v6  ;;  %v716_v15 = vadd.f32 %v715_v16, %v714_v4  ;;  %v817_v7 = vmul.f32 %v2029_v13, %v2029_v13  ;;  %v735_v16 = vsel %vm629_vm3, %v2063_v48, 0.0 }
 0x123   :  { %v819_v48 = vmul.f32 %v2087_v8, %v2087_v8 }
 0x124   :  { %v718_v18 = vadd.f32 %v717_v17, %v716_v15  ;;  %v913_v21 = vadd.f32 %v912_v53, %v911_v14  ;;  %v737_v14 = vsel %vm629_vm3, %v2029_v13, 0.0  ;;  %v932_v15 = vsel %vm629_vm3, %v816_v28, 0.0 }
 0x125   :  { %v934_v36 = vsel %vm629_vm3, %v817_v7, 0.0  ;;  %v741_v13 = vsel %vm629_vm3, %v2087_v8, 0.0  ;;  %v822_v8 = vmul.f32 %v2105_v26, %v2105_v26 }
 0x126   :  { %v915_v29 = vadd.f32 %v914_v5, %v913_v21  ;;  %v720_v0 = vadd.f32 %v719_v27, %v718_v18  ;;  %v739_v18 = vsel %vm629_vm3, %v2051_v38, 0.0  ;;  %v936_v5 = vsel %vm629_vm3, %v818_v24, 0.0 }
 0x127   :  { %v820_v27 = vmul.f32 %v2135_v47, %v2135_v47  ;;  %v938_v38 = vsel %vm629_vm3, %v819_v48, 0.0  ;;  %v823_v47 = vmul.f32 %v2195_v23, %v2195_v23  ;;  %v944_v62 = vsel %vm629_vm3, %v822_v8, 0.0 }
 0x128   :  { %v722_v34 = vadd.f32 %v721_v30, %v720_v0  ;;  %v917_v45 = vadd.f32 %v916_v33, %v915_v29  ;;  %v821_v30 = vmul.f32 %v2073_v61, %v2073_v61 }
 0x12a   :  { %v919_v19 = vadd.f32 %v918_v37, %v917_v45  ;;  %v724_v40 = vadd.f32 %v723_v39, %v722_v34  ;;  %v745_v45 = vsel %vm629_vm3, %v2073_v61, 0.0  ;;  %v940_v37 = vsel %vm629_vm3, %v820_v27, 0.0 }
 0x12b   :  { %v749_v61 = vsel %vm629_vm3, %v2195_v23, 0.0  ;;  %v826_v23 = vmul.f32 %v2225_v44, %v2225_v44 }
 0x12c   :  { %v726_v46 = vadd.f32 %v725_v55, %v724_v40  ;;  %v921_v35 = vadd.f32 %v920_v41, %v919_v19  ;;  %v942_v19 = vsel %vm629_vm3, %v821_v30, 0.0  ;;  %v747_v40 = vsel %vm629_vm3, %v2105_v26, 0.0 }
 0x12d   :  { %v946_v26 = vsel %vm629_vm3, %v823_v47, 0.0 }
 0x12e   :  { %v923_v51 = vadd.f32 %v922_v10, %v921_v35  ;;  %v728_v52 = vadd.f32 %v727_v50, %v726_v46  ;;  %v824_v46 = vmul.f32 %v2255_v60, %v2255_v60  ;;  %v825_v10 = vmul.f32 %v2165_v3, %v2165_v3 }
 0x12f   :  { %v751_v50 = vsel %vm629_vm3, %v2255_v60, 0.0  ;;  %v952_v60 = vsel %vm629_vm3, %v826_v23, 0.0 }
 0x130   :  { %v730_v57 = vadd.f32 %v729_v56, %v728_v52  ;;  %v925_v11 = vadd.f32 %v924_v25, %v923_v51  ;;  %v753_v56 = vsel %vm629_vm3, %v2165_v3, 0.0  ;;  %v948_v42 = vsel %vm629_vm3, %v824_v46, 0.0 }
 0x132   :  { %v927_v43 = vadd.f32 %v926_v58, %v925_v11  ;;  %v732_v1 = vadd.f32 %v731_v59, %v730_v57  ;;  %v950_v11 = vsel %vm629_vm3, %v825_v10, 0.0  ;;  %v755_v58 = vsel %vm629_vm3, %v2225_v44, 0.0 }
 0x134   :  { %v734_v4 = vadd.f32 %v733_v32, %v732_v1  ;;  %v929_v6 = vadd.f32 %v928_v2, %v927_v43 }
 0x136   :  { %v931_v9 = vadd.f32 %v930_v54, %v929_v6  ;;  %v736_v12 = vadd.f32 %v735_v16, %v734_v4 }
 0x138   :  { %v738_v53 = vadd.f32 %v737_v14, %v736_v12  ;;  %v933_v17 = vadd.f32 %v932_v15, %v931_v9 }
 0x13a   :  { %v935_v21 = vadd.f32 %v934_v36, %v933_v17  ;;  %v740_v22 = vadd.f32 %v739_v18, %v738_v53 }
 0x13c   :  { %v742_v29 = vadd.f32 %v741_v13, %v740_v22  ;;  %v937_v0 = vadd.f32 %v936_v5, %v935_v21 }
 0x13e   :  { %v939_v33 = vadd.f32 %v938_v38, %v937_v0  ;;  %v744_v34 = vadd.f32 %v743_v31, %v742_v29 }
 0x140   :  { %v746_v39 = vadd.f32 %v745_v45, %v744_v34  ;;  %v941_v20 = vadd.f32 %v940_v37, %v939_v33 }
 0x142   :  { %v943_v41 = vadd.f32 %v942_v19, %v941_v20  ;;  %v748_v55 = vadd.f32 %v747_v40, %v746_v39 }
 0x144   :  { %v750_v35 = vadd.f32 %v749_v61, %v748_v55  ;;  %v945_v49 = vadd.f32 %v944_v62, %v943_v41 }
 0x146   :  { %v947_v51 = vadd.f32 %v946_v26, %v945_v49  ;;  %v752_v52 = vadd.f32 %v751_v50, %v750_v35 }
 0x148   :  { %v754_v25 = vadd.f32 %v753_v56, %v752_v52  ;;  %v949_v57 = vadd.f32 %v948_v42, %v947_v51 }
 0x14a   :  { %v756_v59 = vadd.f32 %v755_v58, %v754_v25  ;;  %v951_v63 = vadd.f32 %v950_v11, %v949_v57 }
 0x14c   :  { %v757_v43 = vrot.slane %v756_v59, 4  ;;  %v953_v1 = vadd.f32 %v952_v60, %v951_v63 }
 0x14e   :  { %v758_v2 = vadd.f32 %v757_v43, %v756_v59  ;;  %v954_v3 = vrot.slane %v953_v1, 4 }
 0x150   :  { %v759_v32 = vrot.slane %v758_v2, 2  ;;  %v955_v28 = vadd.f32 %v954_v3, %v953_v1 }
 0x152   :  { %v760_v4 = vadd.f32 %v759_v32, %v758_v2  ;;  %v956_v6 = vrot.slane %v955_v28, 2 }
 0x154   :  { %v761_v7 = vrot.slane %v760_v4, 1  ;;  %v957_v54 = vadd.f32 %v956_v6, %v955_v28 }
 0x156   :  { %v958_v16 = vrot.slane %v957_v54, 1  ;;  %v762_v9 = vadd.f32 %v761_v7, %v760_v4 }
 0x158   :  { %v959_v12 = vadd.f32 %v958_v16, %v957_v54 }
 0x15a   :  { %v961_v14 = vsel %vm960_vm4, %v762_v9, %v959_v12 }
 0x15b   :  { %v962_v44 = vsel %vm336_vm0, %v961_v14, 0.0 }
 0x15c   :  { %963 = vst.msk [vmem:[%s2390_s3] sm:$0xff] %vm629_vm3, %v962_v44 }

// kernel: fbnet_unit_forward.6
= control target key start
LH: loop header
LB: loop body
LE: loop exit
PB: predicated region body
PF: predicated region fallthrough
CT: control target
= control target key end

     0   :  { %vm864_vm0 = vcmask 1043456   ;;  %vm767_vm1 = vcmask 64512   ;;  %vm1157_vm2 = vcmask 31744   ;;  %vm1488_vm3 = vcmask 1040384   ;;  %s2765_s2 = inlined_call_operand.vmem [shape: bf16[8,4], index: 2, kind: input, shape index: {}]   ;;  %s2766_s0 = inlined_call_operand.vmem [shape: bf16[512,8], index: 0, kind: input, shape index: {}]   ;;  %s2767_s1 = inlined_call_operand.vmem [shape: f32[2,8], index: 1, kind: input, shape index: {}]   ;;  %s2768_s3 = inlined_call_operand.vmem [shape: f32[512,4], index: 3, kind: output, shape index: {0}]   ;;  %s2769_s4 = inlined_call_operand.vmem [shape: f32[1,8,4], index: 4, kind: output, shape index: {1}]  }
   0x1   :  { %v766_v0 = vld [vmem:[%s2765_s2] sm:$0xf]  ;;  %v1727_v4 = vld [vmem:[%s2766_s0 + $0x8] sm:$0xff]   ;;  %v1728_v5 = vld [vmem:[%s2766_s0 + $0x10] sm:$0xff]   ;;  %vm1490_vm4 = vcmask 1041408  }
   0x2   :  { %v1892_v1 = vld [vmem:[%s2767_s1] ss:$0 sm:$0xff]  ;;  %1859 = vmatprep.subr.msk.bf16.mxu0 %vm864_vm0, %v766_v0  ;;  %v866_v2 = vsel %vm864_vm0, %v766_v0, 0  ;;  %1860 = vmatprep.subr.msk.bf16.mxu1 %vm864_vm0, %v766_v0  ;;  %v1605_v8 = vunpack.c.l.bf16 %v1727_v4  ;;  %v1606_v9 = vunpack.c.h.bf16 %v1727_v4  ;;  %v1729_v10 = vld [vmem:[%s2766_s0 + $0x18] sm:$0xff]   ;;  %v1909_v11 = vld [vmem:[%s2767_s1 + $0x1] ss:$0 sm:$0xff]  ;;  %v1609_v12 = vunpack.c.l.bf16 %v1728_v5 }
   0x3   :  { %v1600_v3 = vld [vmem:[%s2766_s0] sm:$0xff]   ;;  %1792 = vmatpush3.bf16.msra.mxu0 %v866_v2  ;;  %1858 = vmatpush3.bf16.msra.mxu1 %v866_v2  ;;  %v1610_v13 = vunpack.c.h.bf16 %v1728_v5  ;;  %v1613_v14 = vunpack.c.l.bf16 %v1729_v10  ;;  %v1614_v15 = vunpack.c.h.bf16 %v1729_v10  ;;  %v1731_v36 = vld [vmem:[%s2766_s0 + $0x28] sm:$0xff]   ;;  %v1732_v40 = vld [vmem:[%s2766_s0 + $0x30] sm:$0xff]  }
   0x4   :  { %v1601_v6 = vunpack.c.l.bf16 %v1600_v3  ;;  %v1602_v7 = vunpack.c.h.bf16 %v1600_v3  ;;  %v284_v18 = vmul.f32 %v1605_v8, %v1892_v1  ;;  %v285_v19 = vmul.f32 %v1606_v9, %v1892_v1  ;;  %v1730_v31 = vld [vmem:[%s2766_s0 + $0x20] sm:$0xff]   ;;  %v1733_v45 = vld [vmem:[%s2766_s0 + $0x38] sm:$0xff]   ;;  %v1735_v8 = vld [vmem:[%s2766_s0 + $0x48] sm:$0xff]  }
   0x5   :  { %v286_v20 = vmul.f32 %v1609_v12, %v1892_v1  ;;  %v287_v21 = vmul.f32 %v1610_v13, %v1892_v1  ;;  %v288_v22 = vmul.f32 %v1613_v14, %v1892_v1  ;;  %v289_v23 = vmul.f32 %v1614_v15, %v1892_v1  ;;  %v1734_v2 = vld [vmem:[%s2766_s0 + $0x40] sm:$0xff]   ;;  %v1736_v13 = vld [vmem:[%s2766_s0 + $0x50] sm:$0xff]  }
   0x6   :  { %v282_v16 = vmul.f32 %v1601_v6, %v1892_v1  ;;  %v283_v17 = vmul.f32 %v1602_v7, %v1892_v1  ;;  %v352_v26 = vadd.f32 %v1909_v11, %v284_v18  ;;  %v353_v27 = vadd.f32 %v1909_v11, %v285_v19  ;;  %v1737_v18 = vld [vmem:[%s2766_s0 + $0x58] sm:$0xff]  }
   0x7   :  { %v354_v28 = vadd.f32 %v1909_v11, %v286_v20  ;;  %v355_v29 = vadd.f32 %v1909_v11, %v287_v21  ;;  %v356_v30 = vadd.f32 %v1909_v11, %v288_v22  ;;  %v357_v39 = vadd.f32 %v1909_v11, %v289_v23 }
   0x8   :  { %v350_v24 = vadd.f32 %v1909_v11, %v282_v16  ;;  %v351_v25 = vadd.f32 %v1909_v11, %v283_v17  ;;  %v416_v34 = vmax.f32 %v352_v26, 0.0  ;;  %v417_v35 = vmax.f32 %v353_v27, 0.0 }
   0x9   :  { %v418_v37 = vmax.f32 %v354_v28, 0.0  ;;  %v419_v38 = vmax.f32 %v355_v29, 0.0  ;;  %v1617_v43 = vunpack.c.l.bf16 %v1730_v31  ;;  %v1618_v44 = vunpack.c.h.bf16 %v1730_v31 }
   0xa   :  { %v414_v32 = vmax.f32 %v350_v24, 0.0  ;;  %v415_v33 = vmax.f32 %v351_v25, 0.0  ;;  %v735_v42 = vpack.c.bf16 %v417_v35, %v416_v34  ;;  %v420_v47 = vmax.f32 %v356_v30, 0.0 }
   0xb   :  { %v736_v46 = vpack.c.bf16 %v419_v38, %v418_v37  ;;  %v1621_v48 = vunpack.c.l.bf16 %v1731_v36  ;;  %v1622_v49 = vunpack.c.h.bf16 %v1731_v36  ;;  %v290_v50 = vmul.f32 %v1617_v43, %v1892_v1 }
   0xc   :  { %v734_v41 = vpack.c.bf16 %v415_v33, %v414_v32  ;;  %v291_v51 = vmul.f32 %v1618_v44, %v1892_v1  ;;  %v1625_v52 = vunpack.c.l.bf16 %v1732_v40  ;;  %v1626_v53 = vunpack.c.h.bf16 %v1732_v40  ;;  %v1738_v33 = vld [vmem:[%s2766_s0 + $0x60] sm:$0xff]  }
   0xd   :  { %v421_v54 = vmax.f32 %v357_v39, 0.0  ;;  %v292_v55 = vmul.f32 %v1621_v48, %v1892_v1  ;;  %v293_v56 = vmul.f32 %v1622_v49, %v1892_v1  ;;  %v1629_v57 = vunpack.c.l.bf16 %v1733_v45 }
   0xe   :  { %1793 = vmatprep.mubr.msk.bf16.mxu0 %vm767_vm1, %v734_v41  ;;  %v358_v58 = vadd.f32 %v1909_v11, %v290_v50  ;;  %v359_v59 = vadd.f32 %v1909_v11, %v291_v51  ;;  %v294_v60 = vmul.f32 %v1625_v52, %v1892_v1  ;;  %v295_v61 = vmul.f32 %v1626_v53, %v1892_v1 }
   0xf   :  { %1794 = vmatmul.mubr.msk.bf16.vlgmr.msra.gmra.mxu0 %vm767_vm1, %v735_v42  ;;  %v360_v62 = vadd.f32 %v1909_v11, %v292_v55  ;;  %v361_v63 = vadd.f32 %v1909_v11, %v293_v56  ;;  %v1630_v0 = vunpack.c.h.bf16 %v1733_v45  ;;  %v737_v7 = vpack.c.bf16 %v421_v54, %v420_v47  ;;  %v1740_v54 = vld [vmem:[%s2766_s0 + $0x70] sm:$0xff]  }
  0x10   :  { %1797 = vmatprep.mubr.msk.bf16.mxu0 %vm767_vm1, %v736_v46  ;;  %v422_v3 = vmax.f32 %v358_v58, 0.0  ;;  %v423_v4 = vmax.f32 %v359_v59, 0.0  ;;  %v362_v5 = vadd.f32 %v1909_v11, %v294_v60  ;;  %v363_v6 = vadd.f32 %v1909_v11, %v295_v61  ;;  %v1739_v46 = vld [vmem:[%s2766_s0 + $0x68] sm:$0xff]  }
  0x11   :  { %v296_v10 = vmul.f32 %v1629_v57, %v1892_v1  ;;  %v1633_v12 = vunpack.c.l.bf16 %v1734_v2  ;;  %v424_v14 = vmax.f32 %v360_v62, 0.0  ;;  %v425_v15 = vmax.f32 %v361_v63, 0.0  ;;  %v2004_v63 = vld [vmem:[%s2766_s0 + $0x78] sm:$0xff]  }
  0x12   :  { %v738_v9 = vpack.c.bf16 %v423_v4, %v422_v3  ;;  %v297_v16 = vmul.f32 %v1630_v0, %v1892_v1  ;;  %v1634_v17 = vunpack.c.h.bf16 %v1734_v2  ;;  %v426_v19 = vmax.f32 %v362_v5, 0.0  ;;  %v1742_v5 = vld [vmem:[%s2766_s0 + $0x80] sm:$0xff]  }
  0x13   :  { %v427_v20 = vmax.f32 %v363_v6, 0.0  ;;  %v1637_v21 = vunpack.c.l.bf16 %v1735_v8  ;;  %v1638_v22 = vunpack.c.h.bf16 %v1735_v8  ;;  %v298_v23 = vmul.f32 %v1633_v12, %v1892_v1 }
  0x14   :  { %v299_v24 = vmul.f32 %v1634_v17, %v1892_v1  ;;  %v1641_v25 = vunpack.c.l.bf16 %v1736_v13  ;;  %v1642_v26 = vunpack.c.h.bf16 %v1736_v13  ;;  %v1645_v29 = vunpack.c.l.bf16 %v1737_v18 }
  0x15   :  { %v300_v27 = vmul.f32 %v1637_v21, %v1892_v1  ;;  %v301_v28 = vmul.f32 %v1638_v22, %v1892_v1  ;;  %v1646_v32 = vunpack.c.h.bf16 %v1737_v18  ;;  %v739_v34 = vpack.c.bf16 %v425_v15, %v424_v14 }
  0x16   :  { %v302_v30 = vmul.f32 %v1641_v25, %v1892_v1  ;;  %v303_v31 = vmul.f32 %v1642_v26, %v1892_v1  ;;  %v364_v35 = vadd.f32 %v1909_v11, %v296_v10  ;;  %v365_v36 = vadd.f32 %v1909_v11, %v297_v16  ;;  %v1744_v25 = vld [vmem:[%s2766_s0 + $0x90] sm:$0xff]  }
  0x17   :  { %1798 = vmatmul.mubr.msk.bf16.gmra.mxu0 %vm767_vm1, %v737_v7  ;;  %v304_v37 = vmul.f32 %v1645_v29, %v1892_v1  ;;  %v740_v38 = vpack.c.bf16 %v427_v20, %v426_v19  ;;  %v366_v39 = vadd.f32 %v1909_v11, %v298_v23  ;;  %v367_v40 = vadd.f32 %v1909_v11, %v299_v24  ;;  %v1743_v20 = vld [vmem:[%s2766_s0 + $0x88] sm:$0xff]  }
  0x18   :  { %1801 = vmatprep.mubr.msk.bf16.mxu0 %vm767_vm1, %v738_v9  ;;  %v305_v41 = vmul.f32 %v1646_v32, %v1892_v1  ;;  %v368_v42 = vadd.f32 %v1909_v11, %v300_v27  ;;  %v369_v43 = vadd.f32 %v1909_v11, %v301_v28  ;;  %v370_v44 = vadd.f32 %v1909_v11, %v302_v30  ;;  %v1745_v30 = vld [vmem:[%s2766_s0 + $0x98] sm:$0xff]  }
  0x19   :  { %v1649_v45 = vunpack.c.l.bf16 %v1738_v33  ;;  %v371_v47 = vadd.f32 %v1909_v11, %v303_v31  ;;  %v372_v48 = vadd.f32 %v1909_v11, %v304_v37  ;;  %v428_v50 = vmax.f32 %v364_v35, 0.0 }
  0x1a   :  { %v373_v49 = vadd.f32 %v1909_v11, %v305_v41  ;;  %v429_v51 = vmax.f32 %v365_v36, 0.0  ;;  %v1650_v52 = vunpack.c.h.bf16 %v1738_v33  ;;  %v430_v55 = vmax.f32 %v366_v39, 0.0 }
  0x1b   :  { %v306_v53 = vmul.f32 %v1649_v45, %v1892_v1  ;;  %v431_v56 = vmax.f32 %v367_v40, 0.0  ;;  %v1653_v57 = vunpack.c.l.bf16 %v1739_v46  ;;  %v1654_v58 = vunpack.c.h.bf16 %v1739_v46 }
  0x1c   :  { %v432_v59 = vmax.f32 %v368_v42, 0.0  ;;  %v433_v60 = vmax.f32 %v369_v43, 0.0  ;;  %v434_v61 = vmax.f32 %v370_v44, 0.0  ;;  %v307_v62 = vmul.f32 %v1650_v52, %v1892_v1  ;;  %v1746_v43 = vld [vmem:[%s2766_s0 + $0xa0] sm:$0xff]  }
  0x1d   :  { %v435_v0 = vmax.f32 %v371_v47, 0.0  ;;  %v436_v2 = vmax.f32 %v372_v48, 0.0  ;;  %v437_v3 = vmax.f32 %v373_v49, 0.0  ;;  %v1657_v4 = vunpack.c.l.bf16 %v1740_v54 }
  0x1e   :  { %v2010_v6 = vadd.f32 %v1909_v11, %v306_v53  ;;  %v308_v7 = vmul.f32 %v1653_v57, %v1892_v1  ;;  %v1658_v8 = vunpack.c.h.bf16 %v1740_v54  ;;  %v741_v9 = vpack.c.bf16 %v429_v51, %v428_v50 }
  0x1f   :  { %1802 = vmatmul.mubr.msk.bf16.gmra.mxu0 %vm767_vm1, %v739_v34  ;;  %v309_v10 = vmul.f32 %v1654_v58, %v1892_v1  ;;  %v1661_v12 = vunpack.c.l.bf16 %v2004_v63  ;;  %v742_v13 = vpack.c.bf16 %v431_v56, %v430_v55  ;;  %v2016_v14 = vadd.f32 %v1909_v11, %v307_v62  ;;  %v1747_v56 = vld [vmem:[%s2766_s0 + $0xa8] sm:$0xff]  }
  0x20   :  { %1805 = vmatprep.mubr.msk.bf16.mxu0 %vm767_vm1, %v740_v38  ;;  %v1665_v15 = vunpack.c.l.bf16 %v1742_v5  ;;  %v743_v16 = vpack.c.bf16 %v433_v60, %v432_v59  ;;  %v744_v17 = vpack.c.bf16 %v435_v0, %v434_v61  ;;  %v2018_v18 = vpack.c.bf16 %v437_v3, %v436_v2  ;;  %v1748_v2 = vld [vmem:[%s2766_s0 + $0xb0] sm:$0xff]  }
  0x21   :  { %v310_v19 = vmul.f32 %v1657_v4, %v1892_v1  ;;  %v438_v21 = vmax.f32 %v2010_v6, 0.0  ;;  %v2026_v22 = vadd.f32 %v1909_v11, %v308_v7  ;;  %v311_v23 = vmul.f32 %v1658_v8, %v1892_v1 }
  0x22   :  { %v1666_v24 = vunpack.c.h.bf16 %v1742_v5  ;;  %v2034_v26 = vadd.f32 %v1909_v11, %v309_v10  ;;  %v1662_v27 = vunpack.c.h.bf16 %v2004_v63  ;;  %v2038_v28 = vmul.f32 %v1661_v12, %v1892_v1 }
  0x23   :  { %v314_v29 = vmul.f32 %v1665_v15, %v1892_v1  ;;  %v439_v31 = vmax.f32 %v2016_v14, 0.0  ;;  %v1669_v33 = vunpack.c.l.bf16 %v1743_v20  ;;  %v1670_v34 = vunpack.c.h.bf16 %v1743_v20 }
  0x24   :  { %v315_v32 = vmul.f32 %v1666_v24, %v1892_v1  ;;  %v2048_v35 = vadd.f32 %v1909_v11, %v310_v19  ;;  %v1673_v37 = vunpack.c.l.bf16 %v1744_v25  ;;  %v1674_v38 = vunpack.c.h.bf16 %v1744_v25  ;;  %v1750_v25 = vld [vmem:[%s2766_s0 + $0xc0] sm:$0xff]  }
  0x25   :  { %v382_v36 = vadd.f32 %v1909_v11, %v314_v29  ;;  %v316_v40 = vmul.f32 %v1669_v33, %v1892_v1  ;;  %v317_v41 = vmul.f32 %v1670_v34, %v1892_v1  ;;  %v1677_v42 = vunpack.c.l.bf16 %v1745_v30 }
  0x26   :  { %v383_v39 = vadd.f32 %v1909_v11, %v315_v32  ;;  %v2058_v44 = vadd.f32 %v1909_v11, %v311_v23  ;;  %v318_v46 = vmul.f32 %v1673_v37, %v1892_v1  ;;  %v319_v47 = vmul.f32 %v1674_v38, %v1892_v1 }
  0x27   :  { %1806 = vmatmul.mubr.msk.bf16.gmra.mxu0 %vm767_vm1, %v741_v9  ;;  %v446_v45 = vmax.f32 %v382_v36, 0.0  ;;  %v384_v49 = vadd.f32 %v1909_v11, %v316_v40  ;;  %v385_v50 = vadd.f32 %v1909_v11, %v317_v41  ;;  %v1678_v51 = vunpack.c.h.bf16 %v1745_v30 }
  0x28   :  { %1809 = vmatprep.mubr.msk.bf16.mxu0 %vm767_vm1, %v742_v13  ;;  %v447_v48 = vmax.f32 %v383_v39, 0.0  ;;  %v386_v52 = vadd.f32 %v1909_v11, %v318_v46  ;;  %v387_v53 = vadd.f32 %v1909_v11, %v319_v47  ;;  %v320_v54 = vmul.f32 %v1677_v42, %v1892_v1  ;;  %v1749_v13 = vld [vmem:[%s2766_s0 + $0xb8] sm:$0xff]  }
  0x29   :  { %v1681_v55 = vunpack.c.l.bf16 %v1746_v43  ;;  %v448_v58 = vmax.f32 %v384_v49, 0.0  ;;  %v449_v59 = vmax.f32 %v385_v50, 0.0  ;;  %v321_v60 = vmul.f32 %v1678_v51, %v1892_v1 }
  0x2a   :  { %v750_v57 = vpack.c.bf16 %v447_v48, %v446_v45  ;;  %v450_v61 = vmax.f32 %v386_v52, 0.0  ;;  %v451_v62 = vmax.f32 %v387_v53, 0.0  ;;  %v388_v63 = vadd.f32 %v1909_v11, %v320_v54  ;;  %v1751_v52 = vld [vmem:[%s2766_s0 + $0xc8] sm:$0xff]   ;;  %v1752_v54 = vld [vmem:[%s2766_s0 + $0xd0] sm:$0xff]  }
  0x2b   :  { %v1682_v0 = vunpack.c.h.bf16 %v1746_v43  ;;  %v751_v3 = vpack.c.bf16 %v449_v59, %v448_v58  ;;  %v389_v4 = vadd.f32 %v1909_v11, %v321_v60  ;;  %v322_v5 = vmul.f32 %v1681_v55, %v1892_v1 }
  0x2c   :  { %1825 = vmatprep.mubr.msk.bf16.mxu1 %vm767_vm1, %v750_v57  ;;  %v1685_v7 = vunpack.c.l.bf16 %v1747_v56  ;;  %v752_v8 = vpack.c.bf16 %v451_v62, %v450_v61  ;;  %v452_v9 = vmax.f32 %v388_v63, 0.0  ;;  %v1686_v12 = vunpack.c.h.bf16 %v1747_v56 }
  0x2d   :  { %v323_v10 = vmul.f32 %v1682_v0, %v1892_v1  ;;  %1826 = vmatmul.mubr.msk.bf16.vlgmr.msra.gmra.mxu1 %vm767_vm1, %v751_v3  ;;  %v453_v14 = vmax.f32 %v389_v4, 0.0  ;;  %v390_v15 = vadd.f32 %v1909_v11, %v322_v5  ;;  %v313_v19 = vmul.f32 %v1662_v27, %v1892_v1 }
  0x2e   :  { %1829 = vmatprep.mubr.msk.bf16.mxu1 %vm767_vm1, %v752_v8  ;;  %v325_v23 = vmul.f32 %v1686_v12, %v1892_v1  ;;  %v1690_v24 = vunpack.c.h.bf16 %v1748_v2  ;;  %v746_v29 = vpack.c.bf16 %v439_v31, %v438_v21  ;;  %v1693_v33 = vunpack.c.l.bf16 %v1749_v13 }
  0x2f   :  { %1810 = vmatmul.mubr.msk.bf16.gmra.mxu0 %vm767_vm1, %v743_v16  ;;  %v324_v16 = vmul.f32 %v1685_v7, %v1892_v1  ;;  %v391_v20 = vadd.f32 %v1909_v11, %v323_v10  ;;  %v454_v30 = vmax.f32 %v390_v15, 0.0  ;;  %v440_v38 = vmax.f32 %v2026_v22, 0.0  ;;  %v1753_v10 = vld [vmem:[%s2766_s0 + $0xd8] sm:$0xff]  }
  0x30   :  { %1813 = vmatprep.mubr.msk.bf16.mxu0 %vm767_vm1, %v744_v17  ;;  %v1689_v17 = vunpack.c.l.bf16 %v1748_v2  ;;  %v393_v36 = vadd.f32 %v1909_v11, %v325_v23  ;;  %v327_v37 = vmul.f32 %v1690_v24, %v1892_v1  ;;  %v753_v39 = vpack.c.bf16 %v453_v14, %v452_v9 }
  0x31   :  { %v455_v34 = vmax.f32 %v391_v20, 0.0  ;;  %v392_v27 = vadd.f32 %v1909_v11, %v324_v16  ;;  %v1694_v40 = vunpack.c.h.bf16 %v1749_v13  ;;  %v1697_v41 = vunpack.c.l.bf16 %v1750_v25  ;;  %v1754_v16 = vld [vmem:[%s2766_s0 + $0xe0] sm:$0xff]  }
  0x32   :  { %v326_v32 = vmul.f32 %v1689_v17, %v1892_v1  ;;  %v441_v6 = vmax.f32 %v2034_v26, 0.0  ;;  %v395_v42 = vadd.f32 %v1909_v11, %v327_v37  ;;  %v442_v43 = vmax.f32 %v2048_v35, 0.0 }
  0x33   :  { %v754_v21 = vpack.c.bf16 %v455_v34, %v454_v30  ;;  %v443_v45 = vmax.f32 %v2058_v44, 0.0  ;;  %v380_v22 = vadd.f32 %v1909_v11, %v2038_v28  ;;  %v1698_v46 = vunpack.c.h.bf16 %v1750_v25 }
  0x34   :  { %v394_v31 = vadd.f32 %v1909_v11, %v326_v32  ;;  %v381_v47 = vadd.f32 %v1909_v11, %v313_v19  ;;  %v457_v48 = vmax.f32 %v393_v36, 0.0  ;;  %v328_v26 = vmul.f32 %v1693_v33, %v1892_v1 }
  0x35   :  { %1830 = vmatmul.mubr.msk.bf16.gmra.mxu1 %vm767_vm1, %v753_v39  ;;  %v329_v49 = vmul.f32 %v1694_v40, %v1892_v1  ;;  %v330_v50 = vmul.f32 %v1697_v41, %v1892_v1  ;;  %v747_v51 = vpack.c.bf16 %v441_v6, %v440_v38  ;;  %v459_v44 = vmax.f32 %v395_v42, 0.0  ;;  %v1755_v6 = vld [vmem:[%s2766_s0 + $0xe8] sm:$0xff]  }
  0x36   :  { %1833 = vmatprep.mubr.msk.bf16.mxu1 %vm767_vm1, %v754_v21  ;;  %v458_v35 = vmax.f32 %v394_v31, 0.0  ;;  %v331_v28 = vmul.f32 %v1698_v46, %v1892_v1  ;;  %v748_v53 = vpack.c.bf16 %v443_v45, %v442_v43  ;;  %v444_v55 = vmax.f32 %v380_v22, 0.0  ;;  %v1756_v21 = vld [vmem:[%s2766_s0 + $0xf0] sm:$0xff]  }
  0x37   :  { %1814 = vmatmul.mubr.msk.bf16.gmra.mxu0 %vm767_vm1, %v2018_v18  ;;  %v456_v18 = vmax.f32 %v392_v27, 0.0  ;;  %v445_v56 = vmax.f32 %v381_v47, 0.0  ;;  %v396_v58 = vadd.f32 %v1909_v11, %v328_v26  ;;  %v397_v59 = vadd.f32 %v1909_v11, %v329_v49 }
  0x38   :  { %1817 = vmatprep.mubr.msk.bf16.mxu0 %vm767_vm1, %v746_v29  ;;  %v398_v60 = vadd.f32 %v1909_v11, %v330_v50  ;;  %v1701_v61 = vunpack.c.l.bf16 %v1751_v52  ;;  %v1702_v62 = vunpack.c.h.bf16 %v1751_v52  ;;  %v756_v63 = vpack.c.bf16 %v459_v44, %v458_v35 }
  0x39   :  { %v755_v57 = vpack.c.bf16 %v457_v48, %v456_v18  ;;  %v399_v0 = vadd.f32 %v1909_v11, %v331_v28  ;;  %v1705_v2 = vunpack.c.l.bf16 %v1752_v54  ;;  %v1706_v3 = vunpack.c.h.bf16 %v1752_v54  ;;  %v1757_v54 = vld [vmem:[%s2766_s0 + $0xf8] sm:$0xff]  }
  0x3a   :  { %v749_v4 = vpack.c.bf16 %v445_v56, %v444_v55  ;;  %v460_v5 = vmax.f32 %v396_v58, 0.0  ;;  %v461_v7 = vmax.f32 %v397_v59, 0.0  ;;  %v332_v8 = vmul.f32 %v1701_v61, %v1892_v1 }
  0x3b   :  { %v333_v9 = vmul.f32 %v1702_v62, %v1892_v1  ;;  %v462_v12 = vmax.f32 %v398_v60, 0.0  ;;  %v463_v13 = vmax.f32 %v399_v0, 0.0  ;;  %v334_v14 = vmul.f32 %v1705_v2, %v1892_v1 }
  0x3c   :  { %v335_v15 = vmul.f32 %v1706_v3, %v1892_v1  ;;  %v1709_v17 = vunpack.c.l.bf16 %v1753_v10  ;;  %v1710_v19 = vunpack.c.h.bf16 %v1753_v10  ;;  %v757_v20 = vpack.c.bf16 %v461_v7, %v460_v5 }
  0x3d   :  { %1834 = vmatmul.mubr.msk.bf16.gmra.mxu1 %vm767_vm1, %v755_v57  ;;  %v400_v23 = vadd.f32 %v1909_v11, %v332_v8  ;;  %v401_v24 = vadd.f32 %v1909_v11, %v333_v9  ;;  %v1713_v25 = vunpack.c.l.bf16 %v1754_v16  ;;  %v758_v29 = vpack.c.bf16 %v463_v13, %v462_v12 }
  0x3e   :  { %1837 = vmatprep.mubr.msk.bf16.mxu1 %vm767_vm1, %v756_v63  ;;  %v402_v30 = vadd.f32 %v1909_v11, %v334_v14  ;;  %v403_v32 = vadd.f32 %v1909_v11, %v335_v15  ;;  %v1714_v33 = vunpack.c.h.bf16 %v1754_v16  ;;  %v336_v34 = vmul.f32 %v1709_v17, %v1892_v1 }
  0x3f   :  { %1818 = vmatmul.mubr.msk.bf16.gmra.mxu0 %vm767_vm1, %v747_v51  ;;  %v337_v27 = vmul.f32 %v1710_v19, %v1892_v1  ;;  %v464_v36 = vmax.f32 %v400_v23, 0.0  ;;  %v465_v37 = vmax.f32 %v401_v24, 0.0  ;;  %v338_v38 = vmul.f32 %v1713_v25, %v1892_v1 }
  0x40   :  { %1821 = vmatprep.mubr.msk.bf16.mxu0 %vm767_vm1, %v748_v53  ;;  %v466_v39 = vmax.f32 %v402_v30, 0.0  ;;  %v467_v40 = vmax.f32 %v403_v32, 0.0  ;;  %v339_v41 = vmul.f32 %v1714_v33, %v1892_v1  ;;  %v404_v31 = vadd.f32 %v1909_v11, %v336_v34 }
  0x41   :  { %v405_v42 = vadd.f32 %v1909_v11, %v337_v27  ;;  %v759_v43 = vpack.c.bf16 %v465_v37, %v464_v36  ;;  %v406_v45 = vadd.f32 %v1909_v11, %v338_v38  ;;  %v1717_v22 = vunpack.c.l.bf16 %v1755_v6 }
  0x42   :  { %v1718_v46 = vunpack.c.h.bf16 %v1755_v6  ;;  %v760_v47 = vpack.c.bf16 %v467_v40, %v466_v39  ;;  %v407_v18 = vadd.f32 %v1909_v11, %v339_v41  ;;  %v1721_v48 = vunpack.c.l.bf16 %v1756_v21 }
  0x43   :  { %v1722_v26 = vunpack.c.h.bf16 %v1756_v21  ;;  %v468_v49 = vmax.f32 %v404_v31, 0.0  ;;  %v469_v50 = vmax.f32 %v405_v42, 0.0  ;;  %v340_v51 = vmul.f32 %v1717_v22, %v1892_v1 }
  0x44   :  { %v341_v35 = vmul.f32 %v1718_v46, %v1892_v1  ;;  %v470_v44 = vmax.f32 %v406_v45, 0.0  ;;  %v471_v28 = vmax.f32 %v407_v18, 0.0  ;;  %v342_v52 = vmul.f32 %v1721_v48, %v1892_v1 }
  0x45   :  { %1838 = vmatmul.mubr.msk.bf16.gmra.mxu1 %vm767_vm1, %v757_v20  ;;  %v343_v53 = vmul.f32 %v1722_v26, %v1892_v1  ;;  %v761_v55 = vpack.c.bf16 %v469_v50, %v468_v49  ;;  %v408_v56 = vadd.f32 %v1909_v11, %v340_v51  ;;  %v1725_v58 = vunpack.c.l.bf16 %v1757_v54 }
  0x46   :  { %1841 = vmatprep.mubr.msk.bf16.mxu1 %vm767_vm1, %v758_v29  ;;  %v409_v57 = vadd.f32 %v1909_v11, %v341_v35  ;;  %v1726_v59 = vunpack.c.h.bf16 %v1757_v54  ;;  %v762_v60 = vpack.c.bf16 %v471_v28, %v470_v44  ;;  %v410_v61 = vadd.f32 %v1909_v11, %v342_v52 }
  0x47   :  { %1822 = vmatmul.mubr.msk.bf16.gmra.mxu0 %vm767_vm1, %v749_v4  ;;  %v411_v62 = vadd.f32 %v1909_v11, %v343_v53  ;;  %v472_v63 = vmax.f32 %v408_v56, 0.0  ;;  %v344_v2 = vmul.f32 %v1725_v58, %v1892_v1 }
  0x48   :  { %v473_v0 = vmax.f32 %v409_v57, 0.0  ;;  %v345_v3 = vmul.f32 %v1726_v59, %v1892_v1  ;;  %v474_v4 = vmax.f32 %v410_v61, 0.0 }
  0x49   :  { %v475_v5 = vmax.f32 %v411_v62, 0.0  ;;  %v412_v8 = vadd.f32 %v1909_v11, %v344_v2 }
  0x4a   :  { %v763_v7 = vpack.c.bf16 %v473_v0, %v472_v63  ;;  %v413_v9 = vadd.f32 %v1909_v11, %v345_v3 }
  0x4b   :  { %v764_v10 = vpack.c.bf16 %v475_v5, %v474_v4  ;;  %v476_v12 = vmax.f32 %v412_v8, 0.0 }
  0x4c   :  { %v477_v13 = vmax.f32 %v413_v9, 0.0 }
  0x4d   :  { %1842 = vmatmul.mubr.msk.bf16.gmra.mxu1 %vm767_vm1, %v759_v43 }
  0x4e   :  { %1845 = vmatprep.mubr.msk.bf16.mxu1 %vm767_vm1, %v760_v47  ;;  %v765_v14 = vpack.c.bf16 %v477_v13, %v476_v12 }
  0x55   :  { %1846 = vmatmul.mubr.msk.bf16.gmra.mxu1 %vm767_vm1, %v761_v55 }
  0x56   :  { %1849 = vmatprep.mubr.msk.bf16.mxu1 %vm767_vm1, %v762_v60 }
  0x5d   :  { %1850 = vmatmul.mubr.msk.bf16.gmra.mxu1 %vm767_vm1, %v763_v7 }
  0x5e   :  { %1853 = vmatprep.mubr.msk.bf16.mxu1 %vm767_vm1, %v764_v10 }
  0x65   :  { %1854 = vmatmul.mubr.msk.bf16.gmra.mxu1 %vm767_vm1, %v765_v14 }
  0xcf   :  { %v1795_v1 = vpop.f32.mrf.mxu0 }
  0xd0   :  { %1495 = vst.msk [vmem:[%s2768_s3 + $0x10] sm:$0xff] %vm1157_vm2, %v1795_v1  ;;  %v1293_v19 = vmul.f32 %v1795_v1, %v1795_v1  ;;  %v1161_v30 = vsel %vm1157_vm2, %v1795_v1, 0.0 }
  0xd1   :  { %v902_v15 = vpop.f32.mrf.mxu0 }
  0xd2   :  { %1493 = vst.msk [vmem:[%s2768_s3] sm:$0xff] %vm1157_vm2, %v902_v15  ;;  %v1291_v16 = vmul.f32 %v902_v15, %v902_v15  ;;  %v1158_v20 = vsel %vm1157_vm2, %v902_v15, 0.0  ;;  %v1358_v38 = vsel %vm1157_vm2, %v1293_v19, 0.0 }
  0xd3   :  { %v1796_v11 = vpop.f32.mrf.mxu0 }
  0xd4   :  { %1496 = vst.msk [vmem:[%s2768_s3 + $0x18] sm:$0xff] %vm1157_vm2, %v1796_v11  ;;  %v1355_v32 = vsel %vm1157_vm2, %v1291_v16, 0.0  ;;  %v1294_v33 = vmul.f32 %v1796_v11, %v1796_v11  ;;  %v1163_v39 = vsel %vm1157_vm2, %v1796_v11, 0.0 }
  0xd5   :  { %v905_v17 = vpop.f32.mrf.mxu0 }
  0xd6   :  { %v1159_v23 = vsel %vm1157_vm2, %v905_v17, 0.0  ;;  %v1292_v24 = vmul.f32 %v905_v17, %v905_v17  ;;  %1494 = vst.msk [vmem:[%s2768_s3 + $0x8] sm:$0xff] %vm1157_vm2, %v905_v17  ;;  %v1360_v31 = vsel %vm1157_vm2, %v1294_v33, 0.0 }
  0xd7   :  { %v1160_v25 = vadd.f32 %v1159_v23, %v1158_v20  ;;  %v1799_v29 = vpop.f32.mrf.mxu0 }
  0xd8   :  { %v1356_v34 = vsel %vm1157_vm2, %v1292_v24, 0.0  ;;  %1499 = vst.msk [vmem:[%s2768_s3 + $0x30] sm:$0xff] %vm1157_vm2, %v1799_v29  ;;  %v1297_v46 = vmul.f32 %v1799_v29, %v1799_v29  ;;  %v1169_v51 = vsel %vm1157_vm2, %v1799_v29, 0.0 }
  0xd9   :  { %v1162_v27 = vadd.f32 %v1161_v30, %v1160_v25  ;;  %v1357_v36 = vadd.f32 %v1356_v34, %v1355_v32  ;;  %v918_v37 = vpop.f32.mrf.mxu0 }
  0xda   :  { %v1295_v40 = vmul.f32 %v918_v37, %v918_v37  ;;  %1497 = vst.msk [vmem:[%s2768_s3 + $0x20] sm:$0xff] %vm1157_vm2, %v918_v37  ;;  %v1165_v42 = vsel %vm1157_vm2, %v918_v37, 0.0  ;;  %v1366_v54 = vsel %vm1157_vm2, %v1297_v46, 0.0 }
  0xdb   :  { %v1359_v41 = vadd.f32 %v1358_v38, %v1357_v36  ;;  %v1164_v6 = vadd.f32 %v1163_v39, %v1162_v27  ;;  %v1800_v21 = vpop.f32.mrf.mxu0 }
  0xdc   :  { %1500 = vst.msk [vmem:[%s2768_s3 + $0x38] sm:$0xff] %vm1157_vm2, %v1800_v21  ;;  %v1362_v47 = vsel %vm1157_vm2, %v1295_v40, 0.0  ;;  %v1298_v35 = vmul.f32 %v1800_v21, %v1800_v21  ;;  %v1171_v55 = vsel %vm1157_vm2, %v1800_v21, 0.0 }
  0xdd   :  { %v1166_v43 = vadd.f32 %v1165_v42, %v1164_v6  ;;  %v1361_v45 = vadd.f32 %v1360_v31, %v1359_v41  ;;  %v921_v22 = vpop.f32.mrf.mxu0 }
  0xde   :  { %v1167_v18 = vsel %vm1157_vm2, %v921_v22, 0.0  ;;  %v1296_v48 = vmul.f32 %v921_v22, %v921_v22  ;;  %1498 = vst.msk [vmem:[%s2768_s3 + $0x28] sm:$0xff] %vm1157_vm2, %v921_v22  ;;  %v1368_v60 = vsel %vm1157_vm2, %v1298_v35, 0.0 }
  0xdf   :  { %v1363_v26 = vadd.f32 %v1362_v47, %v1361_v45  ;;  %v1168_v49 = vadd.f32 %v1167_v18, %v1166_v43  ;;  %v1803_v50 = vpop.f32.mrf.mxu0 }
  0xe0   :  { %v1364_v44 = vsel %vm1157_vm2, %v1296_v48, 0.0  ;;  %1503 = vst.msk [vmem:[%s2768_s3 + $0x50] sm:$0xff] %vm1157_vm2, %v1803_v50  ;;  %v1301_v2 = vmul.f32 %v1803_v50, %v1803_v50  ;;  %v1177_v10 = vsel %vm1157_vm2, %v1803_v50, 0.0 }
  0xe1   :  { %v1170_v28 = vadd.f32 %v1169_v51, %v1168_v49  ;;  %v1365_v52 = vadd.f32 %v1364_v44, %v1363_v26  ;;  %v934_v53 = vpop.f32.mrf.mxu0 }
  0xe2   :  { %v1299_v56 = vmul.f32 %v934_v53, %v934_v53  ;;  %1501 = vst.msk [vmem:[%s2768_s3 + $0x40] sm:$0xff] %vm1157_vm2, %v934_v53  ;;  %v1173_v61 = vsel %vm1157_vm2, %v934_v53, 0.0  ;;  %v1374_v11 = vsel %vm1157_vm2, %v1301_v2, 0.0 }
  0xe3   :  { %v1367_v57 = vadd.f32 %v1366_v54, %v1365_v52  ;;  %v1172_v58 = vadd.f32 %v1171_v55, %v1170_v28  ;;  %v1804_v59 = vpop.f32.mrf.mxu0 }
  0xe4   :  { %1504 = vst.msk [vmem:[%s2768_s3 + $0x58] sm:$0xff] %vm1157_vm2, %v1804_v59  ;;  %v1370_v3 = vsel %vm1157_vm2, %v1299_v56, 0.0  ;;  %v1302_v12 = vmul.f32 %v1804_v59, %v1804_v59  ;;  %v1179_v16 = vsel %vm1157_vm2, %v1804_v59, 0.0 }
  0xe5   :  { %v1174_v62 = vadd.f32 %v1173_v61, %v1172_v58  ;;  %v1369_v63 = vadd.f32 %v1368_v60, %v1367_v57  ;;  %v937_v0 = vpop.f32.mrf.mxu0 }
  0xe6   :  { %v1175_v4 = vsel %vm1157_vm2, %v937_v0, 0.0  ;;  %v1300_v5 = vmul.f32 %v937_v0, %v937_v0  ;;  %1502 = vst.msk [vmem:[%s2768_s3 + $0x48] sm:$0xff] %vm1157_vm2, %v937_v0  ;;  %v1376_v24 = vsel %vm1157_vm2, %v1302_v12, 0.0 }
  0xe7   :  { %v1371_v7 = vadd.f32 %v1370_v3, %v1369_v63  ;;  %v1176_v8 = vadd.f32 %v1175_v4, %v1174_v62  ;;  %v1807_v9 = vpop.f32.mrf.mxu0 }
  0xe8   :  { %v1372_v13 = vsel %vm1157_vm2, %v1300_v5, 0.0  ;;  %1507 = vst.msk [vmem:[%s2768_s3 + $0x70] sm:$0xff] %vm1157_vm2, %v1807_v9  ;;  %v1305_v33 = vmul.f32 %v1807_v9, %v1807_v9  ;;  %v1185_v40 = vsel %vm1157_vm2, %v1807_v9, 0.0 }
  0xe9   :  { %v1178_v14 = vadd.f32 %v1177_v10, %v1176_v8  ;;  %v1373_v1 = vadd.f32 %v1372_v13, %v1371_v7  ;;  %v950_v15 = vpop.f32.mrf.mxu0 }
  0xea   :  { %v1303_v17 = vmul.f32 %v950_v15, %v950_v15  ;;  %1505 = vst.msk [vmem:[%s2768_s3 + $0x60] sm:$0xff] %vm1157_vm2, %v950_v15  ;;  %v1181_v25 = vsel %vm1157_vm2, %v950_v15, 0.0  ;;  %v1382_v43 = vsel %vm1157_vm2, %v1305_v33, 0.0 }
  0xeb   :  { %v1375_v19 = vadd.f32 %v1374_v11, %v1373_v1  ;;  %v1180_v20 = vadd.f32 %v1179_v16, %v1178_v14  ;;  %v1808_v23 = vpop.f32.mrf.mxu0 }
  0xec   :  { %1508 = vst.msk [vmem:[%s2768_s3 + $0x78] sm:$0xff] %vm1157_vm2, %v1808_v23  ;;  %v1378_v34 = vsel %vm1157_vm2, %v1303_v17, 0.0  ;;  %v1306_v41 = vmul.f32 %v1808_v23, %v1808_v23  ;;  %v1187_v45 = vsel %vm1157_vm2, %v1808_v23, 0.0 }
  0xed   :  { %v1182_v29 = vadd.f32 %v1181_v25, %v1180_v20  ;;  %v1377_v30 = vadd.f32 %v1376_v24, %v1375_v19  ;;  %v953_v32 = vpop.f32.mrf.mxu0  ;;  %v2288_v46 = vpop.f32.mrf.mxu1 }
  0xee   :  { %v1183_v27 = vsel %vm1157_vm2, %v953_v32, 0.0  ;;  %v1304_v36 = vmul.f32 %v953_v32, %v953_v32  ;;  %1506 = vst.msk [vmem:[%s2768_s3 + $0x68] sm:$0xff] %vm1157_vm2, %v953_v32  ;;  %1527 = vst.msk [vmem:[%s2768_s3 + $0x110] sm:$0xff] %vm1157_vm2, %v2288_v46  ;;  %v1384_v26 = vsel %vm1157_vm2, %v1306_v41, 0.0 }
  0xef   :  { %v1379_v37 = vadd.f32 %v1378_v34, %v1377_v30  ;;  %v1184_v38 = vadd.f32 %v1183_v27, %v1182_v29  ;;  %v1811_v39 = vpop.f32.mrf.mxu0  ;;  %v2301_v50 = vpop.f32.mrf.mxu1 }
  0xf0   :  { %v1380_v6 = vsel %vm1157_vm2, %v1304_v36, 0.0  ;;  %1511 = vst.msk [vmem:[%s2768_s3 + $0x90] sm:$0xff] %vm1157_vm2, %v1811_v39  ;;  %1525 = vst.msk [vmem:[%s2768_s3 + $0x100] sm:$0xff] %vm1157_vm2, %v2301_v50  ;;  %v1309_v28 = vmul.f32 %v1811_v39, %v1811_v39  ;;  %v1193_v59 = vsel %vm1157_vm2, %v1811_v39, 0.0 }
  0xf1   :  { %v1186_v21 = vadd.f32 %v1185_v40, %v1184_v38  ;;  %v1381_v31 = vadd.f32 %v1380_v6, %v1379_v37  ;;  %v966_v42 = vpop.f32.mrf.mxu0  ;;  %v2314_v55 = vpop.f32.mrf.mxu1 }
  0xf2   :  { %v1307_v22 = vmul.f32 %v966_v42, %v966_v42  ;;  %1509 = vst.msk [vmem:[%s2768_s3 + $0x80] sm:$0xff] %vm1157_vm2, %v966_v42  ;;  %v1189_v49 = vsel %vm1157_vm2, %v966_v42, 0.0  ;;  %1528 = vst.msk [vmem:[%s2768_s3 + $0x118] sm:$0xff] %vm1157_vm2, %v2314_v55  ;;  %v1390_v3 = vsel %vm1157_vm2, %v1309_v28, 0.0 }
  0xf3   :  { %v1383_v47 = vadd.f32 %v1382_v43, %v1381_v31  ;;  %v1188_v18 = vadd.f32 %v1187_v45, %v1186_v21  ;;  %v1812_v48 = vpop.f32.mrf.mxu0  ;;  %v2327_v62 = vpop.f32.mrf.mxu1 }
  0xf4   :  { %1512 = vst.msk [vmem:[%s2768_s3 + $0x98] sm:$0xff] %vm1157_vm2, %v1812_v48  ;;  %v1386_v52 = vsel %vm1157_vm2, %v1307_v22, 0.0  ;;  %v1310_v60 = vmul.f32 %v1812_v48, %v1812_v48  ;;  %1526 = vst.msk [vmem:[%s2768_s3 + $0x108] sm:$0xff] %vm1157_vm2, %v2327_v62  ;;  %v1195_v4 = vsel %vm1157_vm2, %v1812_v48, 0.0 }
  0xf5   :  { %v1190_v51 = vadd.f32 %v1189_v49, %v1188_v18  ;;  %v1385_v35 = vadd.f32 %v1384_v26, %v1383_v47  ;;  %v969_v44 = vpop.f32.mrf.mxu0  ;;  %v2340_v7 = vpop.f32.mrf.mxu1 }
  0xf6   :  { %v1191_v53 = vsel %vm1157_vm2, %v969_v44, 0.0  ;;  %v1308_v54 = vmul.f32 %v969_v44, %v969_v44  ;;  %1510 = vst.msk [vmem:[%s2768_s3 + $0x88] sm:$0xff] %vm1157_vm2, %v969_v44  ;;  %1531 = vst.msk [vmem:[%s2768_s3 + $0x130] sm:$0xff] %vm1157_vm2, %v2340_v7  ;;  %v1392_v12 = vsel %vm1157_vm2, %v1310_v60, 0.0 }
  0xf7   :  { %v1387_v56 = vadd.f32 %v1386_v52, %v1385_v35  ;;  %v1192_v57 = vadd.f32 %v1191_v53, %v1190_v51  ;;  %v1815_v58 = vpop.f32.mrf.mxu0  ;;  %v2353_v14 = vpop.f32.mrf.mxu1 }
  0xf8   :  { %v1388_v61 = vsel %vm1157_vm2, %v1308_v54, 0.0  ;;  %1515 = vst.msk [vmem:[%s2768_s3 + $0xb0] sm:$0xff] %vm1157_vm2, %v1815_v58  ;;  %1529 = vst.msk [vmem:[%s2768_s3 + $0x120] sm:$0xff] %vm1157_vm2, %v2353_v14  ;;  %v1313_v16 = vmul.f32 %v1815_v58, %v1815_v58  ;;  %v1201_v30 = vsel %vm1157_vm2, %v1815_v58, 0.0 }
  0xf9   :  { %v1194_v63 = vadd.f32 %v1193_v59, %v1192_v57  ;;  %v1389_v0 = vadd.f32 %v1388_v61, %v1387_v56  ;;  %v982_v2 = vpop.f32.mrf.mxu0  ;;  %v2366_v23 = vpop.f32.mrf.mxu1 }
  0xfa   :  { %v1311_v5 = vmul.f32 %v982_v2, %v982_v2  ;;  %1513 = vst.msk [vmem:[%s2768_s3 + $0xa0] sm:$0xff] %vm1157_vm2, %v982_v2  ;;  %v1197_v13 = vsel %vm1157_vm2, %v982_v2, 0.0  ;;  %1532 = vst.msk [vmem:[%s2768_s3 + $0x138] sm:$0xff] %vm1157_vm2, %v2366_v23  ;;  %v1398_v38 = vsel %vm1157_vm2, %v1313_v16, 0.0 }
  0xfb   :  { %v1391_v8 = vadd.f32 %v1390_v3, %v1389_v0  ;;  %v1196_v9 = vadd.f32 %v1195_v4, %v1194_v63  ;;  %v1816_v10 = vpop.f32.mrf.mxu0  ;;  %v2379_v34 = vpop.f32.mrf.mxu1 }
  0xfc   :  { %1516 = vst.msk [vmem:[%s2768_s3 + $0xb8] sm:$0xff] %vm1157_vm2, %v1816_v10  ;;  %v1394_v17 = vsel %vm1157_vm2, %v1311_v5, 0.0  ;;  %v1314_v32 = vmul.f32 %v1816_v10, %v1816_v10  ;;  %1530 = vst.msk [vmem:[%s2768_s3 + $0x128] sm:$0xff] %vm1157_vm2, %v2379_v34  ;;  %v1203_v39 = vsel %vm1157_vm2, %v1816_v10, 0.0 }
  0xfd   :  { %v1198_v1 = vadd.f32 %v1197_v13, %v1196_v9  ;;  %v1393_v15 = vadd.f32 %v1392_v12, %v1391_v8  ;;  %v985_v11 = vpop.f32.mrf.mxu0  ;;  %v2392_v41 = vpop.f32.mrf.mxu1 }
  0xfe   :  { %v1199_v19 = vsel %vm1157_vm2, %v985_v11, 0.0  ;;  %v1312_v20 = vmul.f32 %v985_v11, %v985_v11  ;;  %1514 = vst.msk [vmem:[%s2768_s3 + $0xa8] sm:$0xff] %vm1157_vm2, %v985_v11  ;;  %1535 = vst.msk [vmem:[%s2768_s3 + $0x150] sm:$0xff] %vm1157_vm2, %v2392_v41  ;;  %v1400_v42 = vsel %vm1157_vm2, %v1314_v32, 0.0 }
  0xff   :  { %v1395_v24 = vadd.f32 %v1394_v17, %v1393_v15  ;;  %v1200_v25 = vadd.f32 %v1199_v19, %v1198_v1  ;;  %v1819_v29 = vpop.f32.mrf.mxu0  ;;  %v2405_v45 = vpop.f32.mrf.mxu1 }
 0x100   :  { %v1396_v33 = vsel %vm1157_vm2, %v1312_v20, 0.0  ;;  %1519 = vst.msk [vmem:[%s2768_s3 + $0xd0] sm:$0xff] %vm1157_vm2, %v1819_v29  ;;  %1533 = vst.msk [vmem:[%s2768_s3 + $0x140] sm:$0xff] %vm1157_vm2, %v2405_v45  ;;  %v1317_v48 = vmul.f32 %v1819_v29, %v1819_v29  ;;  %v1209_v53 = vsel %vm1157_vm2, %v1819_v29, 0.0 }
 0x101   :  { %v1202_v27 = vadd.f32 %v1201_v30, %v1200_v25  ;;  %v1397_v36 = vadd.f32 %v1396_v33, %v1395_v24  ;;  %v998_v37 = vpop.f32.mrf.mxu0  ;;  %v2418_v35 = vpop.f32.mrf.mxu1 }
 0x102   :  { %v1315_v40 = vmul.f32 %v998_v37, %v998_v37  ;;  %1517 = vst.msk [vmem:[%s2768_s3 + $0xc0] sm:$0xff] %vm1157_vm2, %v998_v37  ;;  %v1205_v43 = vsel %vm1157_vm2, %v998_v37, 0.0  ;;  %1536 = vst.msk [vmem:[%s2768_s3 + $0x158] sm:$0xff] %vm1157_vm2, %v2418_v35  ;;  %v1406_v61 = vsel %vm1157_vm2, %v1317_v48, 0.0 }
 0x103   :  { %v1399_v6 = vadd.f32 %v1398_v38, %v1397_v36  ;;  %v1204_v21 = vadd.f32 %v1203_v39, %v1202_v27  ;;  %v1820_v31 = vpop.f32.mrf.mxu0  ;;  %v2431_v57 = vpop.f32.mrf.mxu1  ;;  %v1323_v38 = vmul.f32 %v2301_v50, %v2301_v50 }
 0x104   :  { %1520 = vst.msk [vmem:[%s2768_s3 + $0xd8] sm:$0xff] %vm1157_vm2, %v1820_v31  ;;  %v1402_v26 = vsel %vm1157_vm2, %v1315_v40, 0.0  ;;  %v1318_v54 = vmul.f32 %v1820_v31, %v1820_v31  ;;  %1534 = vst.msk [vmem:[%s2768_s3 + $0x148] sm:$0xff] %vm1157_vm2, %v2431_v57  ;;  %v1211_v63 = vsel %vm1157_vm2, %v1820_v31, 0.0  ;;  %v1221_v31 = vsel %vm1157_vm2, %v2301_v50, 0.0 }
 0x105   :  { %v1206_v22 = vadd.f32 %v1205_v43, %v1204_v21  ;;  %v1401_v47 = vadd.f32 %v1400_v42, %v1399_v6  ;;  %v1001_v18 = vpop.f32.mrf.mxu0  ;;  %v2444_v2 = vpop.f32.mrf.mxu1  ;;  %v1324_v42 = vmul.f32 %v2327_v62, %v2327_v62  ;;  %v1418_v48 = vsel %vm1157_vm2, %v1323_v38, 0.0 }
 0x106   :  { %v1207_v49 = vsel %vm1157_vm2, %v1001_v18, 0.0  ;;  %v1316_v51 = vmul.f32 %v1001_v18, %v1001_v18  ;;  %1518 = vst.msk [vmem:[%s2768_s3 + $0xc8] sm:$0xff] %vm1157_vm2, %v1001_v18  ;;  %1539 = vst.msk [vmem:[%s2768_s3 + $0x170] sm:$0xff] %vm1157_vm2, %v2444_v2  ;;  %v1408_v8 = vsel %vm1157_vm2, %v1318_v54, 0.0  ;;  %v1325_v18 = vmul.f32 %v2288_v46, %v2288_v46 }
 0x107   :  { %v1403_v44 = vadd.f32 %v1402_v26, %v1401_v47  ;;  %v1208_v28 = vadd.f32 %v1207_v49, %v1206_v22  ;;  %v1823_v52 = vpop.f32.mrf.mxu0  ;;  %v2457_v10 = vpop.f32.mrf.mxu1  ;;  %v1223_v50 = vsel %vm1157_vm2, %v2327_v62, 0.0 }
 0x108   :  { %v1404_v56 = vsel %vm1157_vm2, %v1316_v51, 0.0  ;;  %1523 = vst.msk [vmem:[%s2768_s3 + $0xf0] sm:$0xff] %vm1157_vm2, %v1823_v52  ;;  %1537 = vst.msk [vmem:[%s2768_s3 + $0x160] sm:$0xff] %vm1157_vm2, %v2457_v10  ;;  %v1321_v15 = vmul.f32 %v1823_v52, %v1823_v52  ;;  %v1217_v25 = vsel %vm1157_vm2, %v1823_v52, 0.0  ;;  %v1420_v52 = vsel %vm1157_vm2, %v1324_v42, 0.0 }
 0x109   :  { %v1210_v58 = vadd.f32 %v1209_v53, %v1208_v28  ;;  %v1405_v59 = vadd.f32 %v1404_v56, %v1403_v44  ;;  %v1014_v60 = vpop.f32.mrf.mxu0  ;;  %v2470_v19 = vpop.f32.mrf.mxu1  ;;  %v1225_v44 = vsel %vm1157_vm2, %v2288_v46, 0.0  ;;  %v1326_v28 = vmul.f32 %v2314_v55, %v2314_v55 }
 0x10a   :  { %v1319_v0 = vmul.f32 %v1014_v60, %v1014_v60  ;;  %1521 = vst.msk [vmem:[%s2768_s3 + $0xe0] sm:$0xff] %vm1157_vm2, %v1014_v60  ;;  %v1213_v9 = vsel %vm1157_vm2, %v1014_v60, 0.0  ;;  %1540 = vst.msk [vmem:[%s2768_s3 + $0x178] sm:$0xff] %vm1157_vm2, %v2470_v19  ;;  %v1414_v36 = vsel %vm1157_vm2, %v1321_v15, 0.0  ;;  %v1422_v56 = vsel %vm1157_vm2, %v1325_v18, 0.0 }
 0x10b   :  { %v1407_v3 = vadd.f32 %v1406_v61, %v1405_v59  ;;  %v1212_v4 = vadd.f32 %v1211_v63, %v1210_v58  ;;  %v1824_v5 = vpop.f32.mrf.mxu0  ;;  %v2479_v32 = vpop.f32.mrf.mxu1  ;;  %v1227_v46 = vsel %vm1157_vm2, %v2314_v55, 0.0  ;;  %v1327_v58 = vmul.f32 %v2353_v14, %v2353_v14 }
 0x10c   :  { %1524 = vst.msk [vmem:[%s2768_s3 + $0xf8] sm:$0xff] %vm1157_vm2, %v1824_v5  ;;  %v1410_v11 = vsel %vm1157_vm2, %v1319_v0, 0.0  ;;  %v1322_v29 = vmul.f32 %v1824_v5, %v1824_v5  ;;  %1538 = vst.msk [vmem:[%s2768_s3 + $0x168] sm:$0xff] %vm1157_vm2, %v2479_v32  ;;  %v1219_v37 = vsel %vm1157_vm2, %v1824_v5, 0.0  ;;  %v1424_v63 = vsel %vm1157_vm2, %v1326_v28, 0.0 }
 0x10d   :  { %v1214_v12 = vadd.f32 %v1213_v9, %v1212_v4  ;;  %v1409_v13 = vadd.f32 %v1408_v8, %v1407_v3  ;;  %v1017_v1 = vpop.f32.mrf.mxu0  ;;  %v2490_v39 = vpop.f32.mrf.mxu1  ;;  %v1229_v0 = vsel %vm1157_vm2, %v2353_v14, 0.0  ;;  %v1328_v55 = vmul.f32 %v2379_v34, %v2379_v34 }
 0x10e   :  { %v1215_v16 = vsel %vm1157_vm2, %v1017_v1, 0.0  ;;  %v1320_v17 = vmul.f32 %v1017_v1, %v1017_v1  ;;  %1522 = vst.msk [vmem:[%s2768_s3 + $0xe8] sm:$0xff] %vm1157_vm2, %v1017_v1  ;;  %1543 = vst.msk [vmem:[%s2768_s3 + $0x190] sm:$0xff] %vm1157_vm2, %v2490_v39  ;;  %v1416_v21 = vsel %vm1157_vm2, %v1322_v29, 0.0  ;;  %v1329_v8 = vmul.f32 %v2340_v7, %v2340_v7 }
 0x10f   :  { %v1411_v20 = vadd.f32 %v1410_v11, %v1409_v13  ;;  %v1216_v24 = vadd.f32 %v1215_v16, %v1214_v12  ;;  %v2502_v43 = vpop.f32.mrf.mxu1  ;;  %v1426_v9 = vsel %vm1157_vm2, %v1327_v58, 0.0  ;;  %v1231_v14 = vsel %vm1157_vm2, %v2379_v34, 0.0 }
 0x110   :  { %v1412_v30 = vsel %vm1157_vm2, %v1320_v17, 0.0  ;;  %1541 = vst.msk [vmem:[%s2768_s3 + $0x180] sm:$0xff] %vm1157_vm2, %v2502_v43  ;;  %v1233_v15 = vsel %vm1157_vm2, %v2340_v7, 0.0  ;;  %v1330_v11 = vmul.f32 %v2366_v23, %v2366_v23  ;;  %v1428_v16 = vsel %vm1157_vm2, %v1328_v55, 0.0 }
 0x111   :  { %v1218_v33 = vadd.f32 %v1217_v25, %v1216_v24  ;;  %v1413_v27 = vadd.f32 %v1412_v30, %v1411_v20  ;;  %v2514_v26 = vpop.f32.mrf.mxu1  ;;  %v1430_v24 = vsel %vm1157_vm2, %v1329_v8, 0.0  ;;  %v1235_v7 = vsel %vm1157_vm2, %v2366_v23, 0.0 }
 0x112   :  { %1544 = vst.msk [vmem:[%s2768_s3 + $0x198] sm:$0xff] %vm1157_vm2, %v2514_v26  ;;  %v1331_v25 = vmul.f32 %v2405_v45, %v2405_v45  ;;  %v1332_v23 = vmul.f32 %v2431_v57, %v2431_v57  ;;  %v1334_v18 = vmul.f32 %v2418_v35, %v2418_v35  ;;  %v1338_v8 = vmul.f32 %v2470_v19, %v2470_v19 }
 0x113   :  { %v1220_v40 = vadd.f32 %v1219_v37, %v1218_v33  ;;  %v1415_v6 = vadd.f32 %v1414_v36, %v1413_v27  ;;  %v2526_v53 = vpop.f32.mrf.mxu1  ;;  %v1432_v27 = vsel %vm1157_vm2, %v1330_v11, 0.0  ;;  %v1237_v36 = vsel %vm1157_vm2, %v2405_v45, 0.0 }
 0x114   :  { %1542 = vst.msk [vmem:[%s2768_s3 + $0x188] sm:$0xff] %vm1157_vm2, %v2526_v53  ;;  %v1239_v45 = vsel %vm1157_vm2, %v2431_v57, 0.0 }
 0x115   :  { %v1417_v22 = vadd.f32 %v1416_v21, %v1415_v6  ;;  %v1222_v47 = vadd.f32 %v1221_v31, %v1220_v40  ;;  %v2538_v59 = vpop.f32.mrf.mxu1  ;;  %v1333_v6 = vmul.f32 %v2392_v41, %v2392_v41  ;;  %v1434_v21 = vsel %vm1157_vm2, %v1331_v25, 0.0 }
 0x116   :  { %1547 = vst.msk [vmem:[%s2768_s3 + $0x1b0] sm:$0xff] %vm1157_vm2, %v2538_v59 }
 0x117   :  { %v1224_v49 = vadd.f32 %v1223_v50, %v1222_v47  ;;  %v1419_v51 = vadd.f32 %v1418_v48, %v1417_v22  ;;  %v2550_v3 = vpop.f32.mrf.mxu1  ;;  %v1241_v47 = vsel %vm1157_vm2, %v2392_v41, 0.0  ;;  %v1436_v48 = vsel %vm1157_vm2, %v1332_v23, 0.0 }
 0x118   :  { %1545 = vst.msk [vmem:[%s2768_s3 + $0x1a0] sm:$0xff] %vm1157_vm2, %v2550_v3  ;;  %v1243_v41 = vsel %vm1157_vm2, %v2418_v35, 0.0  ;;  %v1336_v35 = vmul.f32 %v2479_v32, %v2479_v32  ;;  %v1257_v23 = vsel %vm1157_vm2, %v2490_v39, 0.0 }
 0x119   :  { %v1226_v62 = vadd.f32 %v1225_v44, %v1224_v49  ;;  %v1421_v54 = vadd.f32 %v1420_v52, %v1419_v51  ;;  %v2562_v12 = vpop.f32.mrf.mxu1  ;;  %v1438_v51 = vsel %vm1157_vm2, %v1333_v6, 0.0  ;;  %v1335_v44 = vmul.f32 %v2457_v10, %v2457_v10 }
 0x11a   :  { %1548 = vst.msk [vmem:[%s2768_s3 + $0x1b8] sm:$0xff] %vm1157_vm2, %v2562_v12 }
 0x11b   :  { %v1423_v60 = vadd.f32 %v1422_v56, %v1421_v54  ;;  %v1228_v61 = vadd.f32 %v1227_v46, %v1226_v62  ;;  %v2574_v17 = vpop.f32.mrf.mxu1  ;;  %v1440_v54 = vsel %vm1157_vm2, %v1334_v18, 0.0  ;;  %v1245_v56 = vsel %vm1157_vm2, %v2457_v10, 0.0 }
 0x11c   :  { %1546 = vst.msk [vmem:[%s2768_s3 + $0x1a8] sm:$0xff] %vm1157_vm2, %v2574_v17  ;;  %v1247_v10 = vsel %vm1157_vm2, %v2479_v32, 0.0  ;;  %v1344_v18 = vmul.f32 %v2574_v17, %v2574_v17 }
 0x11d   :  { %v1230_v4 = vadd.f32 %v1229_v0, %v1228_v61  ;;  %v1425_v5 = vadd.f32 %v1424_v63, %v1423_v60  ;;  %v2586_v29 = vpop.f32.mrf.mxu1  ;;  %v1337_v61 = vmul.f32 %v2444_v2, %v2444_v2  ;;  %v1442_v63 = vsel %vm1157_vm2, %v1335_v44, 0.0 }
 0x11e   :  { %1551 = vst.msk [vmem:[%s2768_s3 + $0x1d0] sm:$0xff] %vm1157_vm2, %v2586_v29 }
 0x11f   :  { %v1427_v13 = vadd.f32 %v1426_v9, %v1425_v5  ;;  %v1232_v1 = vadd.f32 %v1231_v14, %v1230_v4  ;;  %v2598_v37 = vpop.f32.mrf.mxu1  ;;  %v1249_v5 = vsel %vm1157_vm2, %v2444_v2, 0.0  ;;  %v1444_v9 = vsel %vm1157_vm2, %v1336_v35, 0.0 }
 0x120   :  { %1549 = vst.msk [vmem:[%s2768_s3 + $0x1c0] sm:$0xff] %vm1157_vm2, %v2598_v37  ;;  %v1251_v2 = vsel %vm1157_vm2, %v2470_v19, 0.0 }
 0x121   :  { %v1234_v34 = vadd.f32 %v1233_v15, %v1232_v1  ;;  %v1429_v20 = vadd.f32 %v1428_v16, %v1427_v13  ;;  %v2610_v31 = vpop.f32.mrf.mxu1  ;;  %v1446_v1 = vsel %vm1157_vm2, %v1337_v61, 0.0  ;;  %v1339_v15 = vmul.f32 %v2502_v43, %v2502_v43 }
 0x122   :  { %1552 = vst.msk [vmem:[%s2768_s3 + $0x1d8] sm:$0xff] %vm1157_vm2, %v2610_v31 }
 0x123   :  { %v1431_v30 = vadd.f32 %v1430_v24, %v1429_v20  ;;  %v1236_v33 = vadd.f32 %v1235_v7, %v1234_v34  ;;  %v2622_v50 = vpop.f32.mrf.mxu1  ;;  %v1448_v34 = vsel %vm1157_vm2, %v1338_v8, 0.0  ;;  %v1253_v20 = vsel %vm1157_vm2, %v2502_v43, 0.0 }
 0x124   :  { %1550 = vst.msk [vmem:[%s2768_s3 + $0x1c8] sm:$0xff] %vm1157_vm2, %v2622_v50  ;;  %v1340_v24 = vmul.f32 %v2526_v53, %v2526_v53  ;;  %v1450_v19 = vsel %vm1157_vm2, %v1339_v15, 0.0  ;;  %v1342_v43 = vmul.f32 %v2514_v26, %v2514_v26  ;;  %v1271_v8 = vsel %vm1157_vm2, %v2622_v50, 0.0 }
 0x125   :  { %v1238_v38 = vadd.f32 %v1237_v36, %v1236_v33  ;;  %v1433_v40 = vadd.f32 %v1432_v27, %v1431_v30  ;;  %v2634_v28 = vpop.f32.mrf.mxu1  ;;  %v1341_v30 = vmul.f32 %v2490_v39, %v2490_v39  ;;  %v1255_v33 = vsel %vm1157_vm2, %v2526_v53, 0.0 }
 0x126   :  { %1555 = vst.msk [vmem:[%s2768_s3 + $0x1f0] sm:$0xff] %vm1157_vm2, %v2634_v28  ;;  %v1343_v53 = vmul.f32 %v2550_v3, %v2550_v3  ;;  %v1261_v39 = vsel %vm1157_vm2, %v2550_v3, 0.0  ;;  %v1346_v3 = vmul.f32 %v2562_v12, %v2562_v12 }
 0x127   :  { %v1435_v42 = vadd.f32 %v1434_v21, %v1433_v40  ;;  %v1240_v22 = vadd.f32 %v1239_v45, %v1238_v38  ;;  %v2646_v46 = vpop.f32.mrf.mxu1  ;;  %v1452_v38 = vsel %vm1157_vm2, %v1340_v24, 0.0  ;;  %v1454_v21 = vsel %vm1157_vm2, %v1341_v30, 0.0 }
 0x128   :  { %1553 = vst.msk [vmem:[%s2768_s3 + $0x1e0] sm:$0xff] %vm1157_vm2, %v2646_v46  ;;  %v1259_v45 = vsel %vm1157_vm2, %v2514_v26, 0.0  ;;  %v1458_v26 = vsel %vm1157_vm2, %v1343_v53, 0.0 }
 0x129   :  { %v1242_v57 = vadd.f32 %v1241_v47, %v1240_v22  ;;  %v1437_v49 = vadd.f32 %v1436_v48, %v1435_v42  ;;  %v2658_v0 = vpop.f32.mrf.mxu1  ;;  %v1456_v47 = vsel %vm1157_vm2, %v1342_v43, 0.0 }
 0x12a   :  { %1556 = vst.msk [vmem:[%s2768_s3 + $0x1f8] sm:$0xff] %vm1157_vm2, %v2658_v0 }
 0x12b   :  { %v1439_v52 = vadd.f32 %v1438_v51, %v1437_v49  ;;  %v1244_v62 = vadd.f32 %v1243_v41, %v1242_v57  ;;  %v2670_v14 = vpop.f32.mrf.mxu1  ;;  %v1345_v49 = vmul.f32 %v2538_v59, %v2538_v59  ;;  %v1263_v51 = vsel %vm1157_vm2, %v2574_v17, 0.0 }
 0x12c   :  { %1554 = vst.msk [vmem:[%s2768_s3 + $0x1e8] sm:$0xff] %vm1157_vm2, %v2670_v14  ;;  %v1347_v17 = vmul.f32 %v2598_v37, %v2598_v37 }
 0x12d   :  { %v1246_v58 = vadd.f32 %v1245_v56, %v1244_v62  ;;  %v1441_v60 = vadd.f32 %v1440_v54, %v1439_v52  ;;  %v1265_v52 = vsel %vm1157_vm2, %v2538_v59, 0.0  ;;  %v1460_v62 = vsel %vm1157_vm2, %v1344_v18, 0.0 }
 0x12e   :  { %v1462_v35 = vsel %vm1157_vm2, %v1345_v49, 0.0  ;;  %v1269_v59 = vsel %vm1157_vm2, %v2598_v37, 0.0  ;;  %v1350_v37 = vmul.f32 %v2610_v31, %v2610_v31 }
 0x12f   :  { %v1443_v55 = vadd.f32 %v1442_v63, %v1441_v60  ;;  %v1248_v4 = vadd.f32 %v1247_v10, %v1246_v58  ;;  %v1267_v58 = vsel %vm1157_vm2, %v2562_v12, 0.0  ;;  %v1464_v63 = vsel %vm1157_vm2, %v1346_v3, 0.0 }
 0x130   :  { %v1348_v10 = vmul.f32 %v2622_v50, %v2622_v50  ;;  %v1466_v12 = vsel %vm1157_vm2, %v1347_v17, 0.0  ;;  %v1351_v50 = vmul.f32 %v2646_v46, %v2646_v46  ;;  %v1472_v24 = vsel %vm1157_vm2, %v1350_v37, 0.0 }
 0x131   :  { %v1250_v32 = vadd.f32 %v1249_v5, %v1248_v4  ;;  %v1445_v13 = vadd.f32 %v1444_v9, %v1443_v55  ;;  %v1349_v5 = vmul.f32 %v2586_v29, %v2586_v29 }
 0x133   :  { %v1447_v11 = vadd.f32 %v1446_v1, %v1445_v13  ;;  %v1252_v16 = vadd.f32 %v1251_v2, %v1250_v32  ;;  %v1273_v13 = vsel %vm1157_vm2, %v2586_v29, 0.0  ;;  %v1468_v1 = vsel %vm1157_vm2, %v1348_v10, 0.0 }
 0x134   :  { %v1277_v29 = vsel %vm1157_vm2, %v2646_v46, 0.0  ;;  %v1354_v46 = vmul.f32 %v2658_v0, %v2658_v0 }
 0x135   :  { %v1254_v7 = vadd.f32 %v1253_v20, %v1252_v16  ;;  %v1449_v25 = vadd.f32 %v1448_v34, %v1447_v11  ;;  %v1470_v11 = vsel %vm1157_vm2, %v1349_v5, 0.0  ;;  %v1275_v16 = vsel %vm1157_vm2, %v2610_v31, 0.0 }
 0x136   :  { %v1474_v31 = vsel %vm1157_vm2, %v1351_v50, 0.0 }
 0x137   :  { %v1451_v27 = vadd.f32 %v1450_v19, %v1449_v25  ;;  %v1256_v36 = vadd.f32 %v1255_v33, %v1254_v7  ;;  %v1352_v7 = vmul.f32 %v2670_v14, %v2670_v14  ;;  %v1353_v19 = vmul.f32 %v2634_v28, %v2634_v28 }
 0x138   :  { %v1279_v33 = vsel %vm1157_vm2, %v2670_v14, 0.0  ;;  %v1480_v14 = vsel %vm1157_vm2, %v1354_v46, 0.0 }
 0x139   :  { %v1258_v40 = vadd.f32 %v1257_v23, %v1256_v36  ;;  %v1453_v6 = vadd.f32 %v1452_v38, %v1451_v27  ;;  %v1281_v23 = vsel %vm1157_vm2, %v2634_v28, 0.0  ;;  %v1476_v43 = vsel %vm1157_vm2, %v1352_v7, 0.0 }
 0x13b   :  { %v1455_v42 = vadd.f32 %v1454_v21, %v1453_v6  ;;  %v1260_v22 = vadd.f32 %v1259_v45, %v1258_v40  ;;  %v1478_v6 = vsel %vm1157_vm2, %v1353_v19, 0.0  ;;  %v1283_v21 = vsel %vm1157_vm2, %v2658_v0, 0.0 }
 0x13d   :  { %v1262_v48 = vadd.f32 %v1261_v39, %v1260_v22  ;;  %v1457_v57 = vadd.f32 %v1456_v47, %v1455_v42 }
 0x13f   :  { %v1459_v41 = vadd.f32 %v1458_v26, %v1457_v57  ;;  %v1264_v44 = vadd.f32 %v1263_v51, %v1262_v48 }
 0x141   :  { %v1266_v54 = vadd.f32 %v1265_v52, %v1264_v44  ;;  %v1461_v56 = vadd.f32 %v1460_v62, %v1459_v41 }
 0x143   :  { %v1463_v60 = vadd.f32 %v1462_v35, %v1461_v56  ;;  %v1268_v61 = vadd.f32 %v1267_v58, %v1266_v54 }
 0x145   :  { %v1270_v55 = vadd.f32 %v1269_v59, %v1268_v61  ;;  %v1465_v4 = vadd.f32 %v1464_v63, %v1463_v60 }
 0x147   :  { %v1467_v9 = vadd.f32 %v1466_v12, %v1465_v4  ;;  %v1272_v32 = vadd.f32 %v1271_v8, %v1270_v55 }
 0x149   :  { %v1274_v2 = vadd.f32 %v1273_v13, %v1272_v32  ;;  %v1469_v15 = vadd.f32 %v1468_v1, %v1467_v9 }
 0x14b   :  { %v1471_v34 = vadd.f32 %v1470_v11, %v1469_v15  ;;  %v1276_v20 = vadd.f32 %v1275_v16, %v1274_v2 }
 0x14d   :  { %v1278_v25 = vadd.f32 %v1277_v29, %v1276_v20  ;;  %v1473_v30 = vadd.f32 %v1472_v24, %v1471_v34 }
 0x14f   :  { %v1475_v27 = vadd.f32 %v1474_v31, %v1473_v30  ;;  %v1280_v36 = vadd.f32 %v1279_v33, %v1278_v25 }
 0x151   :  { %v1282_v38 = vadd.f32 %v1281_v23, %v1280_v36  ;;  %v1477_v40 = vadd.f32 %v1476_v43, %v1475_v27 }
 0x153   :  { %v1284_v45 = vadd.f32 %v1283_v21, %v1282_v38  ;;  %v1479_v53 = vadd.f32 %v1478_v6, %v1477_v40 }
 0x155   :  { %v1285_v42 = vrot.slane %v1284_v45, 4  ;;  %v1481_v22 = vadd.f32 %v1480_v14, %v1479_v53 }
 0x157   :  { %v1286_v47 = vadd.f32 %v1285_v42, %v1284_v45  ;;  %v1482_v28 = vrot.slane %v1481_v22, 4 }
 0x159   :  { %v1287_v39 = vrot.slane %v1286_v47, 2  ;;  %v1483_v18 = vadd.f32 %v1482_v28, %v1481_v22 }
 0x15b   :  { %v1288_v48 = vadd.f32 %v1287_v39, %v1286_v47  ;;  %v1484_v57 = vrot.slane %v1483_v18, 2 }
 0x15d   :  { %v1289_v49 = vrot.slane %v1288_v48, 1  ;;  %v1485_v26 = vadd.f32 %v1484_v57, %v1483_v18 }
 0x15f   :  { %v1486_v51 = vrot.slane %v1485_v26, 1  ;;  %v1290_v41 = vadd.f32 %v1289_v49, %v1288_v48 }
 0x161   :  { %v1487_v44 = vadd.f32 %v1486_v51, %v1485_v26 }
 0x163   :  { %v1489_v0 = vsel %vm1488_vm3, %v1290_v41, %v1487_v44 }
 0x164   :  { %v1491_v52 = vsel %vm1490_vm4, %v1489_v0, 0.0 }
 0x165   :  { %1492 = vst.msk [vmem:[%s2769_s4] sm:$0xff] %vm1157_vm2, %v1491_v52 }

// kernel: fbnet_unit_forward.5
= control target key start
LH: loop header
LB: loop body
LE: loop exit
PB: predicated region body
PF: predicated region fallthrough
CT: control target
= control target key end

     0   :  { %s2198_s15 = smov 0   ;;  %s2200_s16 = smov 0   ;;  %s3348_s0 = inlined_call_operand.vmem [shape: bf16[2,16,16,8], index: 0, kind: input, shape index: {}]   ;;  %s3349_s1 = inlined_call_operand.vmem [shape: f32[2,8], index: 1, kind: input, shape index: {}]   ;;  %s3350_s2 = inlined_call_operand.vmem [shape: f32[9,8], index: 2, kind: input, shape index: {}]   ;;  %s3351_s3 = inlined_call_operand.vmem [shape: bf16[2,16,16,8], index: 3, kind: output, shape index: {0}]   ;;  %s3352_s4 = inlined_call_operand.vmem [shape: f32[2,8,8], index: 4, kind: output, shape index: {1}]  }
   0x1   :  { %s2202_s17 = smov 0  }
   0x2 LB: > { %s27_s18 = sadd.s32 1, %s2166_s16  ;;  %p1948_p0 = scmp.ge.s32.totalorder %s2170_s17, 1  ;;  %s2170_s17 = sphi %s2202_s17, %s15_s17   ;;  %s2166_s16 = sphi %s2200_s16, %s3354_s16   ;;  %s2162_s15 = sphi %s2198_s15, %s3353_s15  }
   0x3   : > { %p29_p1 = scmp.ge.s32.totalorder %s27_s18, 2  ;;  %p204_p2 = scmp.lt.s32.totalorder %s2170_s17, 3 }
   0x5   : > { %s3356_s18 = smov (%p29_p1, %s27_s18), 0  ;;  %p205_p3 = pnand %p1948_p0, %p204_p2 }
   0x6   : > { %p251_p4 = scmp.lt.s32.totalorder (!%p205_p3), %s2162_s15, 1 }
   0x7   : > { %208 = sbr.rel (%p205_p3) target bundleno = 267 (0x10b), region = 32 }
   0xc   : > { %vm452_vm0 = vcmask 64512   ;;  %vm455_vm1 = vcmask 58368   ;;  %v2172_v0 = vmov 0.0   ;;  %s3358_s15 = smov (!%p251_p4, %s2162_s15), 1  ;;  %v2289_v1 = vld [vmem:[%s3349_s1] ss:$0 sm:$0xff] }
   0xd   : > { %453 = vst.msk [vmem:[#allocation2] sm:$0xff] %vm452_vm0, %v2172_v0  ;;  %454 = vst.msk [vmem:[#allocation2 + $0x8] sm:$0xff] %vm452_vm0, %v2172_v0  ;;  %s1999_s19 = sshll.u32 %s3358_s15, 7  ;;  %v2298_v10 = vld [vmem:[%s3349_s1 + $0x1] ss:$0 sm:$0xff]  ;;  %vm1754_vm2 = vcmask 60416  }
   0xe   : > { %457 = vst.msk [vmem:[#allocation2 + $0x18] sm:$0xff] %vm452_vm0, %v2172_v0  ;;  %458 = vst.msk [vmem:[#allocation2 + $0x20] sm:$0xff] %vm452_vm0, %v2172_v0  ;;  %s2284_s22 = scalar_lea.vmem %s3348_s0, %s1999_s19  ;;  %v2339_v59 = vld [vmem:[%s3350_s2] ss:$0 sm:$0xff]  ;;  %v2344_v60 = vld [vmem:[%s3350_s2 + $0x1] ss:$0 sm:$0xff]  ;;  %s2487_s27 = scalar_lea.vmem %s3351_s3, %s1999_s19 }
   0xf   : > { %460 = vst.msk [vmem:[#allocation2 + $0x30] sm:$0xff] %vm452_vm0, %v2172_v0  ;;  %461 = vst.msk [vmem:[#allocation2 + $0x38] sm:$0xff] %vm452_vm0, %v2172_v0  ;;  %v2034_v2 = vld [vmem:[%s2284_s22] sm:$0xff]   ;;  %v2097_v3 = vld [vmem:[%s2284_s22 + $0x8] sm:$0xff]   ;;  %vm1621_vm3 = vcmask 1040384   ;;  %vm1623_vm4 = vcmask 1041408  }
  0x10   : > { %463 = vst.msk [vmem:[#allocation2 + $0x48] sm:$0xff] %vm452_vm0, %v2172_v0  ;;  %464 = vst.msk [vmem:[#allocation2 + $0x50] sm:$0xff] %vm452_vm0, %v2172_v0  ;;  %v2098_v4 = vld [vmem:[%s2284_s22 + $0x10] sm:$0xff]   ;;  %v2035_v5 = vunpack.c.l.bf16 %v2034_v2  ;;  %v2036_v6 = vunpack.c.h.bf16 %v2034_v2  ;;  %v2039_v7 = vunpack.c.l.bf16 %v2097_v3  ;;  %v2040_v8 = vunpack.c.h.bf16 %v2097_v3  ;;  %v2099_v9 = vld [vmem:[%s2284_s22 + $0x18] sm:$0xff]  }
  0x11   : > { %466 = vst.msk [vmem:[#allocation2 + $0x60] sm:$0xff] %vm452_vm0, %v2172_v0  ;;  %467 = vst.msk [vmem:[#allocation2 + $0x68] sm:$0xff] %vm452_vm0, %v2172_v0  ;;  %v2043_v11 = vunpack.c.l.bf16 %v2098_v4  ;;  %v2044_v12 = vunpack.c.h.bf16 %v2098_v4  ;;  %v2047_v13 = vunpack.c.l.bf16 %v2099_v9  ;;  %v2048_v14 = vunpack.c.h.bf16 %v2099_v9  ;;  %v2100_v31 = vld [vmem:[%s2284_s22 + $0x20] sm:$0xff]   ;;  %v2101_v32 = vld [vmem:[%s2284_s22 + $0x28] sm:$0xff]  }
  0x12   : > { %469 = vst.msk [vmem:[#allocation2 + $0x78] sm:$0xff] %vm452_vm0, %v2172_v0  ;;  %470 = vst.msk [vmem:[#allocation2 + $0x80] sm:$0xff] %vm452_vm0, %v2172_v0  ;;  %v352_v15 = vmul.f32 %v2035_v5, %v2289_v1  ;;  %v353_v16 = vmul.f32 %v2036_v6, %v2289_v1  ;;  %v354_v17 = vmul.f32 %v2039_v7, %v2289_v1  ;;  %v2102_v37 = vld [vmem:[%s2284_s22 + $0x30] sm:$0xff]   ;;  %v2103_v38 = vld [vmem:[%s2284_s22 + $0x38] sm:$0xff]   ;;  %v2051_v43 = vunpack.c.l.bf16 %v2100_v31 }
  0x13   : > { %472 = vst.msk [vmem:[#allocation2 + $0x90] sm:$0xff] %vm452_vm0, %v2172_v0  ;;  %473 = vst.msk [vmem:[#allocation2 + $0x98] sm:$0xff] %vm452_vm0, %v2172_v0  ;;  %v355_v18 = vmul.f32 %v2040_v8, %v2289_v1  ;;  %v356_v19 = vmul.f32 %v2043_v11, %v2289_v1  ;;  %v357_v20 = vmul.f32 %v2044_v12, %v2289_v1  ;;  %v2052_v44 = vunpack.c.h.bf16 %v2100_v31  ;;  %v2349_v61 = vld [vmem:[%s3350_s2 + $0x2] ss:$0 sm:$0xff]  ;;  %v2358_v3 = vld [vmem:[%s3350_s2 + $0x3] ss:$0 sm:$0xff] }
  0x14   : > { %475 = vst.msk [vmem:[#allocation2 + $0xa8] sm:$0xff] %vm452_vm0, %v2172_v0  ;;  %476 = vst.msk [vmem:[#allocation2 + $0xb0] sm:$0xff] %vm452_vm0, %v2172_v0  ;;  %v358_v21 = vmul.f32 %v2047_v13, %v2289_v1  ;;  %v359_v22 = vmul.f32 %v2048_v14, %v2289_v1  ;;  %v388_v23 = vadd.f32 %v2298_v10, %v352_v15  ;;  %v2055_v45 = vunpack.c.l.bf16 %v2101_v32  ;;  %v2363_v4 = vld [vmem:[%s3350_s2 + $0x4] ss:$0 sm:$0xff]  ;;  %v2368_v5 = vld [vmem:[%s3350_s2 + $0x5] ss:$0 sm:$0xff] }
  0x15   : > { %478 = vst.msk [vmem:[#allocation2 + $0xc0] sm:$0xff] %vm452_vm0, %v2172_v0  ;;  %479 = vst.msk [vmem:[#allocation2 + $0xc8] sm:$0xff] %vm452_vm0, %v2172_v0  ;;  %v389_v24 = vadd.f32 %v2298_v10, %v353_v16  ;;  %v390_v25 = vadd.f32 %v2298_v10, %v354_v17  ;;  %v391_v26 = vadd.f32 %v2298_v10, %v355_v18  ;;  %v2056_v46 = vunpack.c.h.bf16 %v2101_v32  ;;  %v541_v11 = vld [vmem:[#allocation2] sm:$0xff]  ;;  %v2394_v32 = vld [vmem:[%s3350_s2 + $0x8] ss:$0 sm:$0xff] }
  0x16   : > { %481 = vst.msk [vmem:[#allocation2 + $0xd8] sm:$0xff] %vm452_vm0, %v2172_v0  ;;  %482 = vst.msk [vmem:[#allocation2 + $0xe0] sm:$0xff] %vm452_vm0, %v2172_v0  ;;  %v392_v27 = vadd.f32 %v2298_v10, %v356_v19  ;;  %v393_v28 = vadd.f32 %v2298_v10, %v357_v20  ;;  %v394_v29 = vadd.f32 %v2298_v10, %v358_v21  ;;  %v420_v33 = vmax.f32 %v388_v23, 0.0  ;;  %v642_v12 = vld [vmem:[#allocation2 + $0x1] sm:$0xff] }
  0x17   : > { %484 = vst.msk [vmem:[#allocation2 + $0xf0] sm:$0xff] %vm452_vm0, %v2172_v0  ;;  %485 = vst.msk [vmem:[#allocation2 + $0xf8] sm:$0xff] %vm452_vm0, %v2172_v0  ;;  %v395_v30 = vadd.f32 %v2298_v10, %v359_v22  ;;  %v421_v34 = vmax.f32 %v389_v24, 0.0  ;;  %v422_v35 = vmax.f32 %v390_v25, 0.0  ;;  %v423_v36 = vmax.f32 %v391_v26, 0.0  ;;  %v743_v13 = vld [vmem:[#allocation2 + $0x2] sm:$0xff] }
  0x18   : > { %487 = vst.msk [vmem:[#allocation2 + $0x108] sm:$0xff] %vm452_vm0, %v2172_v0  ;;  %488 = vst.msk [vmem:[#allocation2 + $0x110] sm:$0xff] %vm452_vm0, %v2172_v0  ;;  %v424_v39 = vmax.f32 %v392_v27, 0.0  ;;  %v425_v40 = vmax.f32 %v393_v28, 0.0  ;;  %v426_v41 = vmax.f32 %v394_v29, 0.0  ;;  %v2059_v47 = vunpack.c.l.bf16 %v2102_v37  ;;  %v542_v20 = vld [vmem:[#allocation2 + $0x8] sm:$0xff] }
  0x19   : > { %490 = vst.msk [vmem:[#allocation2 + $0x120] sm:$0xff] %vm452_vm0, %v2172_v0  ;;  %491 = vst.msk [vmem:[#allocation2 + $0x128] sm:$0xff] %vm452_vm0, %v2172_v0  ;;  %v427_v42 = vmax.f32 %v395_v30, 0.0  ;;  %v2060_v48 = vunpack.c.h.bf16 %v2102_v37  ;;  %v2063_v49 = vunpack.c.l.bf16 %v2103_v38  ;;  %v2064_v50 = vunpack.c.h.bf16 %v2103_v38  ;;  %v2377_v14 = vld [vmem:[%s3350_s2 + $0x6] ss:$0 sm:$0xff] }
  0x1a   : > { %493 = vst.msk [vmem:[#allocation2 + $0x138] sm:$0xff] %vm452_vm0, %v2172_v0  ;;  %494 = vst.msk [vmem:[#allocation2 + $0x140] sm:$0xff] %vm452_vm0, %v2172_v0  ;;  %v360_v51 = vmul.f32 %v2051_v43, %v2289_v1  ;;  %v361_v52 = vmul.f32 %v2052_v44, %v2289_v1  ;;  %v362_v53 = vmul.f32 %v2055_v45, %v2289_v1  ;;  %v2382_v19 = vld [vmem:[%s3350_s2 + $0x7] ss:$0 sm:$0xff] }
  0x1b   : > { %496 = vst.msk [vmem:[#allocation2 + $0x150] sm:$0xff] %vm452_vm0, %v2172_v0  ;;  %497 = vst.msk [vmem:[#allocation2 + $0x158] sm:$0xff] %vm452_vm0, %v2172_v0  ;;  %v363_v54 = vmul.f32 %v2056_v46, %v2289_v1  ;;  %v364_v55 = vmul.f32 %v2059_v47, %v2289_v1  ;;  %v365_v56 = vmul.f32 %v2060_v48, %v2289_v1 }
  0x1c   : > { %499 = vst.msk [vmem:[#allocation2 + $0x168] sm:$0xff] %vm452_vm0, %v2172_v0  ;;  %500 = vst.msk [vmem:[#allocation2 + $0x170] sm:$0xff] %vm452_vm0, %v2172_v0  ;;  %v366_v57 = vmul.f32 %v2063_v49, %v2289_v1  ;;  %v367_v58 = vmul.f32 %v2064_v50, %v2289_v1  ;;  %v396_v62 = vadd.f32 %v2298_v10, %v360_v51 }
  0x1d   : > { %502 = vst.msk [vmem:[#allocation2 + $0x180] sm:$0xff] %vm452_vm0, %v2172_v0  ;;  %503 = vst.msk [vmem:[#allocation2 + $0x188] sm:$0xff] %vm452_vm0, %v2172_v0  ;;  %v397_v63 = vadd.f32 %v2298_v10, %v361_v52  ;;  %v399_v2 = vadd.f32 %v2298_v10, %v363_v54  ;;  %v400_v6 = vadd.f32 %v2298_v10, %v364_v55 }
  0x1e   : > { %505 = vst.msk [vmem:[#allocation2 + $0x198] sm:$0xff] %vm452_vm0, %v2172_v0  ;;  %506 = vst.msk [vmem:[#allocation2 + $0x1a0] sm:$0xff] %vm452_vm0, %v2172_v0  ;;  %v401_v7 = vadd.f32 %v2298_v10, %v365_v56  ;;  %v402_v8 = vadd.f32 %v2298_v10, %v366_v57  ;;  %v403_v9 = vadd.f32 %v2298_v10, %v367_v58  ;;  %v428_v15 = vmax.f32 %v396_v62, 0.0 }
  0x1f   : > { %456 = vst.msk [vmem:[#allocation2 + $0x10] sm:$0x3] %vm455_vm1, %v2172_v0  ;;  %459 = vst.msk [vmem:[#allocation2 + $0x28] sm:$0x3] %vm455_vm1, %v2172_v0  ;;  %v429_v16 = vmax.f32 %v397_v63, 0.0  ;;  %v431_v18 = vmax.f32 %v399_v2, 0.0  ;;  %v578_v28 = vmul.f32 %v2339_v59, %v541_v11  ;;  %v679_v29 = vmul.f32 %v2344_v60, %v642_v12 }
  0x20   : > { %462 = vst.msk [vmem:[#allocation2 + $0x40] sm:$0x3] %vm455_vm1, %v2172_v0  ;;  %465 = vst.msk [vmem:[#allocation2 + $0x58] sm:$0x3] %vm455_vm1, %v2172_v0  ;;  %v432_v22 = vmax.f32 %v400_v6, 0.0  ;;  %v433_v23 = vmax.f32 %v401_v7, 0.0  ;;  %v780_v30 = vmul.f32 %v2349_v61, %v743_v13  ;;  %v579_v44 = vmul.f32 %v2339_v59, %v542_v20 }
  0x21   : > { %468 = vst.msk [vmem:[#allocation2 + $0x70] sm:$0x3] %vm455_vm1, %v2172_v0  ;;  %471 = vst.msk [vmem:[#allocation2 + $0x88] sm:$0x3] %vm455_vm1, %v2172_v0  ;;  %v434_v24 = vmax.f32 %v402_v8, 0.0  ;;  %v435_v25 = vmax.f32 %v403_v9, 0.0 }
  0x22   : > { %474 = vst.msk [vmem:[#allocation2 + $0xa0] sm:$0x3] %vm455_vm1, %v2172_v0  ;;  %477 = vst.msk [vmem:[#allocation2 + $0xb8] sm:$0x3] %vm455_vm1, %v2172_v0 }
  0x23   : > { %480 = vst.msk [vmem:[#allocation2 + $0xd0] sm:$0x3] %vm455_vm1, %v2172_v0  ;;  %483 = vst.msk [vmem:[#allocation2 + $0xe8] sm:$0x3] %vm455_vm1, %v2172_v0 }
  0x24   : > { %486 = vst.msk [vmem:[#allocation2 + $0x100] sm:$0x3] %vm455_vm1, %v2172_v0  ;;  %489 = vst.msk [vmem:[#allocation2 + $0x118] sm:$0x3] %vm455_vm1, %v2172_v0 }
  0x25   : > { %492 = vst.msk [vmem:[#allocation2 + $0x130] sm:$0x3] %vm455_vm1, %v2172_v0  ;;  %495 = vst.msk [vmem:[#allocation2 + $0x148] sm:$0x3] %vm455_vm1, %v2172_v0 }
  0x26   : > { %498 = vst.msk [vmem:[#allocation2 + $0x160] sm:$0x3] %vm455_vm1, %v2172_v0  ;;  %501 = vst.msk [vmem:[#allocation2 + $0x178] sm:$0x3] %vm455_vm1, %v2172_v0  ;;  %v643_v21 = vld [vmem:[#allocation2 + $0x9] sm:$0xff] }
  0x27   : > { %504 = vst.msk [vmem:[#allocation2 + $0x190] sm:$0x3] %vm455_vm1, %v2172_v0  ;;  %507 = vst.msk [vmem:[#allocation2 + $0x1a8] sm:$0x3] %vm455_vm1, %v2172_v0  ;;  %v398_v0 = vadd.f32 %v2298_v10, %v362_v53  ;;  %v680_v45 = vmul.f32 %v2344_v60, %v643_v21 }
  0x28   : > { %509 = vst.msk [vmem:[#allocation2 + $0x19] sm:$0xff] %vm452_vm0, %v420_v33  ;;  %510 = vst.msk [vmem:[#allocation2 + $0x21] sm:$0xff] %vm452_vm0, %v421_v34  ;;  %v744_v33 = vld [vmem:[#allocation2 + $0xa] sm:$0xff] }
  0x29   : > { %511 = vst.msk [vmem:[#allocation2 + $0x31] sm:$0xff] %vm452_vm0, %v422_v35  ;;  %512 = vst.msk [vmem:[#allocation2 + $0x39] sm:$0xff] %vm452_vm0, %v423_v36  ;;  %v430_v17 = vmax.f32 %v398_v0, 0.0  ;;  %v781_v49 = vmul.f32 %v2349_v61, %v744_v33  ;;  %v712_v53 = vadd.f32 %v680_v45, %v579_v44 }
  0x2a   : > { %513 = vst.msk [vmem:[#allocation2 + $0x49] sm:$0xff] %vm452_vm0, %v424_v39  ;;  %514 = vst.msk [vmem:[#allocation2 + $0x51] sm:$0xff] %vm452_vm0, %v425_v40  ;;  %v2104_v39 = vld [vmem:[%s2284_s22 + $0x40] sm:$0xff]   ;;  %v711_v40 = vadd.f32 %v679_v29, %v578_v28 }
  0x2b   : > { %515 = vst.msk [vmem:[#allocation2 + $0x61] sm:$0xff] %vm452_vm0, %v426_v41  ;;  %516 = vst.msk [vmem:[#allocation2 + $0x69] sm:$0xff] %vm452_vm0, %v427_v42  ;;  %v2067_v62 = vunpack.c.l.bf16 %v2104_v39  ;;  %v2068_v63 = vunpack.c.h.bf16 %v2104_v39  ;;  %v813_v6 = vadd.f32 %v781_v49, %v712_v53 }
  0x2c   : > { %517 = vst.msk [vmem:[#allocation2 + $0x79] sm:$0xff] %vm452_vm0, %v428_v15  ;;  %518 = vst.msk [vmem:[#allocation2 + $0x81] sm:$0xff] %vm452_vm0, %v429_v16  ;;  %v812_v52 = vadd.f32 %v780_v30, %v711_v40 }
  0x2d   : > { %519 = vst.msk [vmem:[#allocation2 + $0x91] sm:$0xff] %vm452_vm0, %v430_v17  ;;  %520 = vst.msk [vmem:[#allocation2 + $0x99] sm:$0xff] %vm452_vm0, %v431_v18  ;;  %v368_v12 = vmul.f32 %v2067_v62, %v2289_v1  ;;  %v369_v13 = vmul.f32 %v2068_v63, %v2289_v1 }
  0x2e   : > { %521 = vst.msk [vmem:[#allocation2 + $0xa9] sm:$0xff] %vm452_vm0, %v432_v22  ;;  %522 = vst.msk [vmem:[#allocation2 + $0xb1] sm:$0xff] %vm452_vm0, %v433_v23 }
  0x2f   : > { %v844_v26 = vld [vmem:[#allocation2 + $0x18] sm:$0xff]  ;;  %523 = vst.msk [vmem:[#allocation2 + $0xc1] sm:$0xff] %vm452_vm0, %v434_v24  ;;  %524 = vst.msk [vmem:[#allocation2 + $0xc9] sm:$0xff] %vm452_vm0, %v435_v25  ;;  %v845_v38 = vld [vmem:[#allocation2 + $0x20] sm:$0xff]  ;;  %v404_v21 = vadd.f32 %v2298_v10, %v368_v12  ;;  %v405_v22 = vadd.f32 %v2298_v10, %v369_v13 }
  0x30   : > { %v945_v27 = vld [vmem:[#allocation2 + $0x19] sm:$0xff]  ;;  %v881_v34 = vmul.f32 %v2358_v3, %v844_v26  ;;  %v2403_v37 = vld [vmem:[#allocation2 + $0x30] sm:$0xff]  ;;  %v1047_v46 = vld [vmem:[#allocation2 + $0x22] sm:$0xff]  ;;  %v882_v50 = vmul.f32 %v2358_v3, %v845_v38  ;;  %v580_v0 = vmul.f32 %v2339_v59, %v844_v26  ;;  %v581_v33 = vmul.f32 %v2339_v59, %v845_v38 }
  0x31   : > { %v1046_v31 = vld [vmem:[#allocation2 + $0x1a] sm:$0xff]  ;;  %v982_v35 = vmul.f32 %v2363_v4, %v945_v27  ;;  %v1185_v41 = vmul.f32 %v2377_v14, %v2403_v37  ;;  %v2408_v42 = vld [vmem:[#allocation2 + $0x31] sm:$0xff]  ;;  %v1084_v55 = vmul.f32 %v2368_v5, %v1047_v46  ;;  %v681_v9 = vmul.f32 %v2344_v60, %v945_v27  ;;  %v2447_v25 = vld [vmem:[#allocation2 + $0x48] sm:$0xff] }
  0x32   : > { %v1083_v36 = vmul.f32 %v2368_v5, %v1046_v31  ;;  %v2410_v43 = vld [vmem:[#allocation2 + $0x32] sm:$0xff]  ;;  %v1286_v47 = vmul.f32 %v2382_v19, %v2408_v42  ;;  %v946_v51 = vld [vmem:[#allocation2 + $0x21] sm:$0xff]  ;;  %v913_v2 = vadd.f32 %v881_v34, %v812_v52  ;;  %v782_v15 = vmul.f32 %v2349_v61, %v1046_v31  ;;  %v2453_v44 = vld [vmem:[#allocation2 + $0x49] sm:$0xff] }
  0x33   : > { %v1387_v48 = vmul.f32 %v2394_v32, %v2410_v43  ;;  %v983_v54 = vmul.f32 %v2363_v4, %v946_v51  ;;  %v2422_v56 = vld [vmem:[#allocation2 + $0x38] sm:$0xff]  ;;  %v914_v17 = vadd.f32 %v882_v50, %v813_v6  ;;  %v713_v18 = vadd.f32 %v681_v9, %v580_v0  ;;  %v2455_v45 = vld [vmem:[#allocation2 + $0x4a] sm:$0xff] }
  0x34   : > { %v1186_v57 = vmul.f32 %v2377_v14, %v2422_v56  ;;  %v2426_v58 = vld [vmem:[#allocation2 + $0x39] sm:$0xff]  ;;  %v1014_v16 = vadd.f32 %v982_v35, %v913_v2  ;;  %v883_v20 = vmul.f32 %v2358_v3, %v2403_v37  ;;  %v984_v23 = vmul.f32 %v2363_v4, %v2408_v42 }
  0x35   : > { %v1287_v7 = vmul.f32 %v2382_v19, %v2426_v58  ;;  %v2431_v8 = vld [vmem:[#allocation2 + $0x3a] sm:$0xff]  ;;  %v1085_v24 = vmul.f32 %v2368_v5, %v2410_v43  ;;  %v1015_v27 = vadd.f32 %v983_v54, %v914_v17  ;;  %v814_v28 = vadd.f32 %v782_v15, %v713_v18  ;;  %v2468_v54 = vld [vmem:[#allocation2 + $0x50] sm:$0xff] }
  0x36   : > { %v1388_v11 = vmul.f32 %v2394_v32, %v2431_v8  ;;  %v1115_v26 = vadd.f32 %v1083_v36, %v1014_v16  ;;  %v1187_v29 = vmul.f32 %v2377_v14, %v2447_v25  ;;  %v436_v30 = vmax.f32 %v404_v21, 0.0  ;;  %v2478_v9 = vld [vmem:[#allocation2 + $0x52] sm:$0xff] }
  0x37   : > { %v437_v31 = vmax.f32 %v405_v22, 0.0  ;;  %v682_v34 = vmul.f32 %v2344_v60, %v946_v51  ;;  %v1116_v39 = vadd.f32 %v1084_v55, %v1015_v27  ;;  %v915_v40 = vadd.f32 %v883_v20, %v814_v28 }
  0x38   : > { %v1217_v35 = vadd.f32 %v1185_v41, %v1115_v26  ;;  %v783_v36 = vmul.f32 %v2349_v61, %v1047_v46  ;;  %525 = vst.msk [vmem:[#allocation2 + $0xd9] sm:$0xff] %vm452_vm0, %v436_v30  ;;  %v1288_v49 = vmul.f32 %v2382_v19, %v2453_v44  ;;  %v1389_v38 = vmul.f32 %v2394_v32, %v2455_v45 }
  0x39   : > { %526 = vst.msk [vmem:[#allocation2 + $0xe1] sm:$0xff] %vm452_vm0, %v437_v31  ;;  %v714_v50 = vadd.f32 %v682_v34, %v581_v33  ;;  %v884_v41 = vmul.f32 %v2358_v3, %v2422_v56  ;;  %v1218_v52 = vadd.f32 %v1186_v57, %v1116_v39  ;;  %v1016_v53 = vadd.f32 %v984_v23, %v915_v40  ;;  %v2476_v57 = vld [vmem:[#allocation2 + $0x51] sm:$0xff] }
  0x3a   : > { %v1318_v51 = vadd.f32 %v1286_v47, %v1217_v35  ;;  %v985_v46 = vmul.f32 %v2363_v4, %v2426_v58  ;;  %v1086_v62 = vmul.f32 %v2368_v5, %v2431_v8  ;;  %v1188_v63 = vmul.f32 %v2377_v14, %v2468_v54 }
  0x3b   : > { %v815_v55 = vadd.f32 %v783_v36, %v714_v50  ;;  %v582_v0 = vmul.f32 %v2339_v59, %v2403_v37  ;;  %v1319_v6 = vadd.f32 %v1287_v7, %v1218_v52  ;;  %v1117_v47 = vadd.f32 %v1085_v24, %v1016_v53  ;;  %v2513_v50 = vld [vmem:[#allocation2 + $0x61] sm:$0xff] }
  0x3c   : > { %v1419_v2 = vadd.f32 %v1387_v48, %v1318_v51  ;;  %v683_v12 = vmul.f32 %v2344_v60, %v2408_v42  ;;  %v1289_v37 = vmul.f32 %v2382_v19, %v2476_v57  ;;  %v1390_v48 = vmul.f32 %v2394_v32, %v2478_v9 }
  0x3d   : > { %v916_v13 = vadd.f32 %v884_v41, %v815_v55  ;;  %v784_v7 = vmul.f32 %v2349_v61, %v2410_v43  ;;  %v1420_v17 = vadd.f32 %v1388_v11, %v1319_v6  ;;  %v1219_v18 = vadd.f32 %v1187_v29, %v1117_v47  ;;  %v2502_v11 = vld [vmem:[#allocation2 + $0x60] sm:$0xff] }
  0x3e   : > { %v1451_v15 = vsel %vm452_vm0, %v1419_v2, 0.0  ;;  %v1520_v42 = vmul.f32 %v1419_v2, %v1419_v2  ;;  %v2001_v16 = vpack.c.bf16 %v1419_v2, %v1419_v2  ;;  %v715_v21 = vadd.f32 %v683_v12, %v582_v0  ;;  %v2524_v2 = vld [vmem:[#allocation2 + $0x62] sm:$0xff] }
  0x3f   : > { %v1017_v20 = vadd.f32 %v985_v46, %v916_v13  ;;  %v885_v22 = vmul.f32 %v2358_v3, %v2447_v25  ;;  %v1452_v24 = vsel %vm452_vm0, %v1420_v17, 0.0  ;;  %v1521_v26 = vmul.f32 %v1420_v17, %v1420_v17  ;;  %v2105_v13 = vld [vmem:[%s2284_s22 + $0x48] sm:$0xff]  }
  0x40   : > { %v1552_v23 = vsel %vm452_vm0, %v1520_v42, 0.0  ;;  %1755 = vst.msk [vmem:[%s2487_s27] sm:$0xf] %vm1754_vm2, %v2001_v16  ;;  %v2002_v43 = vpack.c.bf16 %v1420_v17, %v1420_v17  ;;  %v1453_v27 = vadd.f32 %v1452_v24, %v1451_v15  ;;  %v1320_v28 = vadd.f32 %v1288_v49, %v1219_v18  ;;  %v2538_v16 = vld [vmem:[#allocation2 + $0x68] sm:$0xff] }
  0x41   : > { %v1118_v30 = vadd.f32 %v1086_v62, %v1017_v20  ;;  %v816_v31 = vadd.f32 %v784_v7, %v715_v21  ;;  %v1553_v29 = vsel %vm452_vm0, %v1521_v26, 0.0  ;;  %v986_v33 = vmul.f32 %v2363_v4, %v2453_v44 }
  0x42   : > { %1756 = vst.msk [vmem:[%s2487_s27 + $0x4] sm:$0xf] %vm1754_vm2, %v2002_v43  ;;  %v1087_v34 = vmul.f32 %v2368_v5, %v2455_v45  ;;  %v1189_v35 = vmul.f32 %v2377_v14, %v2502_v11  ;;  %v1554_v39 = vadd.f32 %v1553_v29, %v1552_v23  ;;  %v1421_v40 = vadd.f32 %v1389_v38, %v1320_v28 }
  0x43   : > { %v1220_v36 = vadd.f32 %v1188_v63, %v1118_v30  ;;  %v917_v49 = vadd.f32 %v885_v22, %v816_v31  ;;  %v1290_v41 = vmul.f32 %v2382_v19, %v2513_v50  ;;  %v583_v51 = vmul.f32 %v2339_v59, %v2422_v56 }
  0x44   : > { %v684_v52 = vmul.f32 %v2344_v60, %v2426_v58  ;;  %v785_v53 = vmul.f32 %v2349_v61, %v2431_v8  ;;  %v1454_v38 = vsel %vm452_vm0, %v1421_v40, 0.0  ;;  %v1522_v46 = vmul.f32 %v1421_v40, %v1421_v40 }
  0x45   : > { %v2003_v55 = vpack.c.bf16 %v1421_v40, %v1421_v40  ;;  %v1321_v62 = vadd.f32 %v1289_v37, %v1220_v36  ;;  %v1455_v63 = vadd.f32 %v1454_v38, %v1453_v27  ;;  %v1018_v0 = vadd.f32 %v986_v33, %v917_v49  ;;  %v2552_v33 = vld [vmem:[#allocation2 + $0x69] sm:$0xff] }
  0x46   : > { %v716_v6 = vadd.f32 %v684_v52, %v583_v51  ;;  %v886_v56 = vmul.f32 %v2358_v3, %v2468_v54  ;;  %v1555_v47 = vsel %vm452_vm0, %v1522_v46, 0.0  ;;  %v1391_v8 = vmul.f32 %v2394_v32, %v2524_v2  ;;  %v2566_v51 = vld [vmem:[#allocation2 + $0x78] sm:$0xff] }
  0x47   : > { %1757 = vst.msk [vmem:[%s2487_s27 + $0x8] sm:$0xf] %vm1754_vm2, %v2003_v55  ;;  %v1422_v58 = vadd.f32 %v1390_v48, %v1321_v62  ;;  %v987_v12 = vmul.f32 %v2363_v4, %v2476_v57  ;;  %v1556_v37 = vadd.f32 %v1555_v47, %v1554_v39  ;;  %v1119_v7 = vadd.f32 %v1087_v34, %v1018_v0  ;;  %v2554_v34 = vld [vmem:[#allocation2 + $0x6a] sm:$0xff] }
  0x48   : > { %v817_v15 = vadd.f32 %v785_v53, %v716_v6  ;;  %v1088_v42 = vmul.f32 %v2368_v5, %v2478_v9  ;;  %v1190_v20 = vmul.f32 %v2377_v14, %v2538_v16  ;;  %v2071_v24 = vunpack.c.l.bf16 %v2105_v13 }
  0x49   : > { %v1456_v17 = vsel %vm452_vm0, %v1422_v58, 0.0  ;;  %v1523_v18 = vmul.f32 %v1422_v58, %v1422_v58  ;;  %v2004_v48 = vpack.c.bf16 %v1422_v58, %v1422_v58  ;;  %v1221_v22 = vadd.f32 %v1189_v35, %v1119_v7 }
  0x4a   : > { %v1457_v21 = vadd.f32 %v1456_v17, %v1455_v63  ;;  %v918_v23 = vadd.f32 %v886_v56, %v817_v15  ;;  %v584_v43 = vmul.f32 %v2339_v59, %v2447_v25  ;;  %v685_v27 = vmul.f32 %v2344_v60, %v2453_v44 }
  0x4b   : > { %v1557_v26 = vsel %vm452_vm0, %v1523_v18, 0.0  ;;  %1758 = vst.msk [vmem:[%s2487_s27 + $0xc] sm:$0xf] %vm1754_vm2, %v2004_v48  ;;  %v786_v28 = vmul.f32 %v2349_v61, %v2455_v45  ;;  %v1322_v31 = vadd.f32 %v1290_v41, %v1221_v22  ;;  %v370_v35 = vmul.f32 %v2071_v24, %v2289_v1 }
  0x4c   : > { %v1558_v30 = vadd.f32 %v1557_v26, %v1556_v37  ;;  %v1019_v29 = vadd.f32 %v987_v12, %v918_v23  ;;  %v1291_v39 = vmul.f32 %v2382_v19, %v2552_v33  ;;  %v1392_v25 = vmul.f32 %v2394_v32, %v2554_v34 }
  0x4d   : > { %v717_v40 = vadd.f32 %v685_v27, %v584_v43  ;;  %v887_v44 = vmul.f32 %v2358_v3, %v2502_v11  ;;  %v1423_v45 = vadd.f32 %v1391_v8, %v1322_v31  ;;  %v406_v49 = vadd.f32 %v2298_v10, %v370_v35  ;;  %v2599_v31 = vld [vmem:[#allocation2 + $0x80] sm:$0xff] }
  0x4e   : > { %v1120_v36 = vadd.f32 %v1088_v42, %v1019_v29  ;;  %v988_v41 = vmul.f32 %v2363_v4, %v2513_v50  ;;  %v1089_v53 = vmul.f32 %v2368_v5, %v2524_v2  ;;  %v1191_v38 = vmul.f32 %v2377_v14, %v2566_v51  ;;  %v2582_v42 = vld [vmem:[#allocation2 + $0x79] sm:$0xff] }
  0x4f   : > { %v818_v52 = vadd.f32 %v786_v28, %v717_v40  ;;  %v2072_v46 = vunpack.c.h.bf16 %v2105_v13  ;;  %v1458_v55 = vsel %vm452_vm0, %v1423_v45, 0.0  ;;  %v1524_v62 = vmul.f32 %v1423_v45, %v1423_v45 }
  0x50   : > { %v2005_v63 = vpack.c.bf16 %v1423_v45, %v1423_v45  ;;  %v1222_v0 = vadd.f32 %v1190_v20, %v1120_v36  ;;  %v1459_v6 = vadd.f32 %v1458_v55, %v1457_v21  ;;  %v438_v56 = vmax.f32 %v406_v49, 0.0 }
  0x51   : > { %v919_v47 = vadd.f32 %v887_v44, %v818_v52  ;;  %v371_v58 = vmul.f32 %v2072_v46, %v2289_v1  ;;  %v1559_v8 = vsel %vm452_vm0, %v1524_v62, 0.0  ;;  %v585_v37 = vmul.f32 %v2339_v59, %v2468_v54  ;;  %v2589_v54 = vld [vmem:[#allocation2 + $0x7a] sm:$0xff] }
  0x52   : > { %1759 = vst.msk [vmem:[%s2487_s27 + $0x10] sm:$0xf] %vm1754_vm2, %v2005_v63  ;;  %v1323_v12 = vadd.f32 %v1291_v39, %v1222_v0  ;;  %v686_v13 = vmul.f32 %v2344_v60, %v2476_v57  ;;  %v1560_v7 = vadd.f32 %v1559_v8, %v1558_v30  ;;  %v787_v18 = vmul.f32 %v2349_v61, %v2478_v9  ;;  %v2106_v9 = vld [vmem:[%s2284_s22 + $0x50] sm:$0xff]   ;;  %v2611_v52 = vld [vmem:[#allocation2 + $0x81] sm:$0xff] }
  0x53   : > { %527 = vst.msk [vmem:[#allocation2 + $0xf1] sm:$0xff] %vm452_vm0, %v438_v56  ;;  %v1020_v15 = vadd.f32 %v988_v41, %v919_v47  ;;  %v407_v17 = vadd.f32 %v2298_v10, %v371_v58  ;;  %v1292_v20 = vmul.f32 %v2382_v19, %v2582_v42  ;;  %v888_v57 = vmul.f32 %v2358_v3, %v2538_v16  ;;  %v2628_v47 = vld [vmem:[#allocation2 + $0x90] sm:$0xff] }
  0x54   : > { %v1424_v48 = vadd.f32 %v1392_v25, %v1323_v12  ;;  %v718_v21 = vadd.f32 %v686_v13, %v585_v37  ;;  %v1393_v23 = vmul.f32 %v2394_v32, %v2589_v54  ;;  %v989_v26 = vmul.f32 %v2363_v4, %v2552_v33 }
  0x55   : > { %v1121_v22 = vadd.f32 %v1089_v53, %v1020_v15  ;;  %v439_v24 = vmax.f32 %v407_v17, 0.0  ;;  %v1090_v39 = vmul.f32 %v2368_v5, %v2554_v34  ;;  %v1192_v25 = vmul.f32 %v2377_v14, %v2599_v31  ;;  %v2613_v53 = vld [vmem:[#allocation2 + $0x82] sm:$0xff] }
  0x56   : > { %v1460_v43 = vsel %vm452_vm0, %v1424_v48, 0.0  ;;  %v1525_v27 = vmul.f32 %v1424_v48, %v1424_v48  ;;  %v2006_v28 = vpack.c.bf16 %v1424_v48, %v1424_v48  ;;  %v819_v30 = vadd.f32 %v787_v18, %v718_v21 }
  0x57   : > { %v1461_v29 = vadd.f32 %v1460_v43, %v1459_v6  ;;  %v1223_v35 = vadd.f32 %v1191_v38, %v1121_v22  ;;  %528 = vst.msk [vmem:[#allocation2 + $0xf9] sm:$0xff] %vm452_vm0, %v439_v24  ;;  %v2075_v45 = vunpack.c.l.bf16 %v2106_v9  ;;  %v586_v36 = vmul.f32 %v2339_v59, %v2502_v11  ;;  %v2644_v43 = vld [vmem:[#allocation2 + $0x91] sm:$0xff] }
  0x58   : > { %v1561_v40 = vsel %vm452_vm0, %v1525_v27, 0.0  ;;  %1760 = vst.msk [vmem:[%s2487_s27 + $0x14] sm:$0xf] %vm1754_vm2, %v2006_v28  ;;  %v920_v44 = vadd.f32 %v888_v57, %v819_v30  ;;  %v687_v38 = vmul.f32 %v2344_v60, %v2513_v50  ;;  %v788_v46 = vmul.f32 %v2349_v61, %v2524_v2 }
  0x59   : > { %v1562_v49 = vadd.f32 %v1561_v40, %v1560_v7  ;;  %v1324_v41 = vadd.f32 %v1292_v20, %v1223_v35  ;;  %v1293_v62 = vmul.f32 %v2382_v19, %v2611_v52  ;;  %v1394_v63 = vmul.f32 %v2394_v32, %v2613_v53 }
  0x5a   : > { %v1021_v55 = vadd.f32 %v989_v26, %v920_v44  ;;  %v372_v11 = vmul.f32 %v2075_v45, %v2289_v1  ;;  %v719_v6 = vadd.f32 %v687_v38, %v586_v36  ;;  %v889_v56 = vmul.f32 %v2358_v3, %v2566_v51  ;;  %v2107_v44 = vld [vmem:[%s2284_s22 + $0x58] sm:$0xff]  }
  0x5b   : > { %v1425_v0 = vadd.f32 %v1393_v23, %v1324_v41  ;;  %v990_v50 = vmul.f32 %v2363_v4, %v2582_v42  ;;  %v1091_v8 = vmul.f32 %v2368_v5, %v2589_v54  ;;  %v1193_v12 = vmul.f32 %v2377_v14, %v2628_v47 }
  0x5c   : > { %v1122_v2 = vadd.f32 %v1090_v39, %v1021_v55  ;;  %v408_v58 = vadd.f32 %v2298_v10, %v372_v11  ;;  %v820_v15 = vadd.f32 %v788_v46, %v719_v6  ;;  %v2076_v20 = vunpack.c.h.bf16 %v2106_v9 }
  0x5d   : > { %v1462_v37 = vsel %vm452_vm0, %v1425_v0, 0.0  ;;  %v1526_v13 = vmul.f32 %v1425_v0, %v1425_v0  ;;  %v2007_v7 = vpack.c.bf16 %v1425_v0, %v1425_v0  ;;  %v587_v22 = vmul.f32 %v2339_v59, %v2538_v16  ;;  %v2651_v16 = vld [vmem:[#allocation2 + $0x92] sm:$0xff] }
  0x5e   : > { %v1463_v17 = vadd.f32 %v1462_v37, %v1461_v29  ;;  %v1224_v18 = vadd.f32 %v1192_v25, %v1122_v2  ;;  %v440_v48 = vmax.f32 %v408_v58, 0.0  ;;  %v921_v57 = vadd.f32 %v889_v56, %v820_v15 }
  0x5f   : > { %v1563_v21 = vsel %vm452_vm0, %v1526_v13, 0.0  ;;  %1761 = vst.msk [vmem:[%s2487_s27 + $0x18] sm:$0xf] %vm1754_vm2, %v2007_v7  ;;  %v688_v23 = vmul.f32 %v2344_v60, %v2552_v33  ;;  %v373_v9 = vmul.f32 %v2076_v20, %v2289_v1  ;;  %v789_v27 = vmul.f32 %v2349_v61, %v2554_v34  ;;  %v2660_v34 = vld [vmem:[#allocation2 + $0x98] sm:$0xff] }
  0x60   : > { %v1564_v24 = vadd.f32 %v1563_v21, %v1562_v49  ;;  %v1325_v26 = vadd.f32 %v1293_v62, %v1224_v18  ;;  %529 = vst.msk [vmem:[#allocation2 + $0x109] sm:$0xff] %vm452_vm0, %v440_v48  ;;  %v1022_v28 = vadd.f32 %v990_v50, %v921_v57  ;;  %v1294_v30 = vmul.f32 %v2382_v19, %v2644_v43  ;;  %v2678_v13 = vld [vmem:[#allocation2 + $0x99] sm:$0xff]  ;;  %v2692_v57 = vld [vmem:[#allocation2 + $0xa8] sm:$0xff] }
  0x61   : > { %v720_v29 = vadd.f32 %v688_v23, %v587_v22  ;;  %v890_v33 = vmul.f32 %v2358_v3, %v2599_v31  ;;  %v1395_v39 = vmul.f32 %v2394_v32, %v2651_v16  ;;  %v409_v25 = vadd.f32 %v2298_v10, %v373_v9  ;;  %v2680_v7 = vld [vmem:[#allocation2 + $0x9a] sm:$0xff] }
  0x62   : > { %v1426_v35 = vadd.f32 %v1394_v63, %v1325_v26  ;;  %v991_v40 = vmul.f32 %v2363_v4, %v2611_v52  ;;  %v1123_v45 = vadd.f32 %v1091_v8, %v1022_v28  ;;  %v1092_v49 = vmul.f32 %v2368_v5, %v2613_v53 }
  0x63   : > { %v821_v36 = vadd.f32 %v789_v27, %v720_v29  ;;  %v1194_v41 = vmul.f32 %v2377_v14, %v2660_v34  ;;  %v441_v62 = vmax.f32 %v409_v25, 0.0  ;;  %v2079_v6 = vunpack.c.l.bf16 %v2107_v44 }
  0x64   : > { %v1464_v38 = vsel %vm452_vm0, %v1426_v35, 0.0  ;;  %v1527_v46 = vmul.f32 %v1426_v35, %v1426_v35  ;;  %v2008_v55 = vpack.c.bf16 %v1426_v35, %v1426_v35  ;;  %v1225_v11 = vadd.f32 %v1193_v12, %v1123_v45 }
  0x65   : > { %v1465_v63 = vadd.f32 %v1464_v38, %v1463_v17  ;;  %v922_v0 = vadd.f32 %v890_v33, %v821_v36  ;;  %530 = vst.msk [vmem:[#allocation2 + $0x111] sm:$0xff] %vm452_vm0, %v441_v62  ;;  %v588_v50 = vmul.f32 %v2339_v59, %v2566_v51  ;;  %v689_v2 = vmul.f32 %v2344_v60, %v2582_v42 }
  0x66   : > { %v1565_v56 = vsel %vm452_vm0, %v1527_v46, 0.0  ;;  %1762 = vst.msk [vmem:[%s2487_s27 + $0x1c] sm:$0xf] %vm1754_vm2, %v2008_v55  ;;  %v790_v58 = vmul.f32 %v2349_v61, %v2589_v54  ;;  %v1326_v37 = vadd.f32 %v1294_v30, %v1225_v11  ;;  %v374_v15 = vmul.f32 %v2079_v6, %v2289_v1 }
  0x67   : > { %v1566_v8 = vadd.f32 %v1565_v56, %v1564_v24  ;;  %v1023_v12 = vadd.f32 %v991_v40, %v922_v0  ;;  %v1295_v17 = vmul.f32 %v2382_v19, %v2678_v13  ;;  %v1396_v51 = vmul.f32 %v2394_v32, %v2680_v7 }
  0x68   : > { %v721_v18 = vadd.f32 %v689_v2, %v588_v50  ;;  %v891_v42 = vmul.f32 %v2358_v3, %v2628_v47  ;;  %v1427_v54 = vadd.f32 %v1395_v39, %v1326_v37  ;;  %v410_v20 = vadd.f32 %v2298_v10, %v374_v15  ;;  %v2725_v37 = vld [vmem:[#allocation2 + $0xb0] sm:$0xff] }
  0x69   : > { %v1124_v48 = vadd.f32 %v1092_v49, %v1023_v12  ;;  %v992_v21 = vmul.f32 %v2363_v4, %v2644_v43  ;;  %v1093_v23 = vmul.f32 %v2368_v5, %v2651_v16  ;;  %v1195_v24 = vmul.f32 %v2377_v14, %v2692_v57 }
  0x6a   : > { %v822_v22 = vadd.f32 %v790_v58, %v721_v18  ;;  %v2080_v26 = vunpack.c.h.bf16 %v2107_v44  ;;  %v1466_v9 = vsel %vm452_vm0, %v1427_v54, 0.0  ;;  %v1528_v27 = vmul.f32 %v1427_v54, %v1427_v54 }
  0x6b   : > { %v2009_v28 = vpack.c.bf16 %v1427_v54, %v1427_v54  ;;  %v1226_v30 = vadd.f32 %v1194_v41, %v1124_v48  ;;  %v1467_v29 = vadd.f32 %v1466_v9, %v1465_v63  ;;  %v442_v33 = vmax.f32 %v410_v20, 0.0  ;;  %v2708_v41 = vld [vmem:[#allocation2 + $0xa9] sm:$0xff] }
  0x6c   : > { %v923_v35 = vadd.f32 %v891_v42, %v822_v22  ;;  %v375_v39 = vmul.f32 %v2080_v26, %v2289_v1  ;;  %v1567_v25 = vsel %vm452_vm0, %v1528_v27, 0.0  ;;  %v589_v45 = vmul.f32 %v2339_v59, %v2599_v31  ;;  %v2715_v31 = vld [vmem:[#allocation2 + $0xaa] sm:$0xff] }
  0x6d   : > { %1763 = vst.msk [vmem:[%s2487_s27 + $0x20] sm:$0xf] %vm1754_vm2, %v2009_v28  ;;  %v1327_v40 = vadd.f32 %v1295_v17, %v1226_v30  ;;  %v690_v44 = vmul.f32 %v2344_v60, %v2611_v52  ;;  %v1568_v36 = vadd.f32 %v1567_v25, %v1566_v8  ;;  %v791_v46 = vmul.f32 %v2349_v61, %v2613_v53  ;;  %v2108_v53 = vld [vmem:[%s2284_s22 + $0x60] sm:$0xff]   ;;  %v2737_v22 = vld [vmem:[#allocation2 + $0xb1] sm:$0xff] }
  0x6e   : > { %531 = vst.msk [vmem:[#allocation2 + $0x121] sm:$0xff] %vm452_vm0, %v442_v33  ;;  %v1024_v49 = vadd.f32 %v992_v21, %v923_v35  ;;  %v411_v38 = vadd.f32 %v2298_v10, %v375_v39  ;;  %v1296_v62 = vmul.f32 %v2382_v19, %v2708_v41  ;;  %v892_v52 = vmul.f32 %v2358_v3, %v2660_v34  ;;  %v2754_v35 = vld [vmem:[#allocation2 + $0xc0] sm:$0xff] }
  0x6f   : > { %v1428_v55 = vadd.f32 %v1396_v51, %v1327_v40  ;;  %v722_v63 = vadd.f32 %v690_v44, %v589_v45  ;;  %v1397_v0 = vmul.f32 %v2394_v32, %v2715_v31  ;;  %v993_v56 = vmul.f32 %v2363_v4, %v2678_v13 }
  0x70   : > { %v1125_v11 = vadd.f32 %v1093_v23, %v1024_v49  ;;  %v443_v6 = vmax.f32 %v411_v38, 0.0  ;;  %v1094_v17 = vmul.f32 %v2368_v5, %v2680_v7  ;;  %v1196_v51 = vmul.f32 %v2377_v14, %v2725_v37  ;;  %v2739_v23 = vld [vmem:[#allocation2 + $0xb2] sm:$0xff] }
  0x71   : > { %v1468_v50 = vsel %vm452_vm0, %v1428_v55, 0.0  ;;  %v1529_v2 = vmul.f32 %v1428_v55, %v1428_v55  ;;  %v2010_v58 = vpack.c.bf16 %v1428_v55, %v1428_v55  ;;  %v823_v8 = vadd.f32 %v791_v46, %v722_v63 }
  0x72   : > { %v1469_v12 = vadd.f32 %v1468_v50, %v1467_v29  ;;  %v1227_v15 = vadd.f32 %v1195_v24, %v1125_v11  ;;  %532 = vst.msk [vmem:[#allocation2 + $0x129] sm:$0xff] %vm452_vm0, %v443_v6  ;;  %v2083_v54 = vunpack.c.l.bf16 %v2108_v53  ;;  %v590_v48 = vmul.f32 %v2339_v59, %v2628_v47  ;;  %v2770_v50 = vld [vmem:[#allocation2 + $0xc1] sm:$0xff] }
  0x73   : > { %v1569_v18 = vsel %vm452_vm0, %v1529_v2, 0.0  ;;  %1764 = vst.msk [vmem:[%s2487_s27 + $0x24] sm:$0xf] %vm1754_vm2, %v2010_v58  ;;  %v924_v42 = vadd.f32 %v892_v52, %v823_v8  ;;  %v691_v24 = vmul.f32 %v2344_v60, %v2644_v43  ;;  %v792_v26 = vmul.f32 %v2349_v61, %v2651_v16 }
  0x74   : > { %v1570_v20 = vadd.f32 %v1569_v18, %v1568_v36  ;;  %v1328_v21 = vadd.f32 %v1296_v62, %v1227_v15  ;;  %v1297_v27 = vmul.f32 %v2382_v19, %v2737_v22  ;;  %v1398_v28 = vmul.f32 %v2394_v32, %v2739_v23  ;;  %v2109_v18 = vld [vmem:[%s2284_s22 + $0x68] sm:$0xff]  }
  0x75   : > { %v1025_v9 = vadd.f32 %v993_v56, %v924_v42  ;;  %v376_v47 = vmul.f32 %v2083_v54, %v2289_v1  ;;  %v723_v29 = vadd.f32 %v691_v24, %v590_v48  ;;  %v893_v33 = vmul.f32 %v2358_v3, %v2692_v57 }
  0x76   : > { %v1429_v30 = vadd.f32 %v1397_v0, %v1328_v21  ;;  %v994_v43 = vmul.f32 %v2363_v4, %v2708_v41  ;;  %v1095_v25 = vmul.f32 %v2368_v5, %v2715_v31  ;;  %v1197_v40 = vmul.f32 %v2377_v14, %v2754_v35 }
  0x77   : > { %v1126_v16 = vadd.f32 %v1094_v17, %v1025_v9  ;;  %v412_v39 = vadd.f32 %v2298_v10, %v376_v47  ;;  %v824_v49 = vadd.f32 %v792_v26, %v723_v29  ;;  %v2084_v62 = vunpack.c.h.bf16 %v2108_v53 }
  0x78   : > { %v1470_v45 = vsel %vm452_vm0, %v1429_v30, 0.0  ;;  %v1530_v44 = vmul.f32 %v1429_v30, %v1429_v30  ;;  %v2011_v36 = vpack.c.bf16 %v1429_v30, %v1429_v30  ;;  %v591_v11 = vmul.f32 %v2339_v59, %v2660_v34  ;;  %v2777_v34 = vld [vmem:[#allocation2 + $0xc2] sm:$0xff] }
  0x79   : > { %v1471_v38 = vadd.f32 %v1470_v45, %v1469_v12  ;;  %v1228_v46 = vadd.f32 %v1196_v51, %v1126_v16  ;;  %v444_v55 = vmax.f32 %v412_v39, 0.0  ;;  %v925_v52 = vadd.f32 %v893_v33, %v824_v49  ;;  %v2806_v45 = vld [vmem:[#allocation2 + $0xca] sm:$0xff] }
  0x7a   : > { %v1571_v63 = vsel %vm452_vm0, %v1530_v44, 0.0  ;;  %1765 = vst.msk [vmem:[%s2487_s27 + $0x28] sm:$0xf] %vm1754_vm2, %v2011_v36  ;;  %v692_v0 = vmul.f32 %v2344_v60, %v2678_v13  ;;  %v377_v53 = vmul.f32 %v2084_v62, %v2289_v1  ;;  %v793_v2 = vmul.f32 %v2349_v61, %v2680_v7  ;;  %v2786_v7 = vld [vmem:[#allocation2 + $0xc8] sm:$0xff]  ;;  %v2811_v44 = vld [vmem:[%s3349_s1] ss:$0 sm:$0xff] }
  0x7b   : > { %v1572_v6 = vadd.f32 %v1571_v63, %v1570_v20  ;;  %v1329_v56 = vadd.f32 %v1297_v27, %v1228_v46  ;;  %533 = vst.msk [vmem:[#allocation2 + $0x139] sm:$0xff] %vm452_vm0, %v444_v55  ;;  %v1026_v58 = vadd.f32 %v994_v43, %v925_v52  ;;  %v1298_v8 = vmul.f32 %v2382_v19, %v2770_v50  ;;  %v2823_v55 = vld [vmem:[%s3349_s1 + $0x1] ss:$0 sm:$0xff]  ;;  %v2828_v52 = vld [vmem:[#allocation2 + $0xd8] sm:$0xff] }
  0x7c   : > { %v724_v12 = vadd.f32 %v692_v0, %v591_v11  ;;  %v894_v13 = vmul.f32 %v2358_v3, %v2725_v37  ;;  %v1399_v17 = vmul.f32 %v2394_v32, %v2777_v34  ;;  %v413_v51 = vadd.f32 %v2298_v10, %v377_v53 }
  0x7d   : > { %v1430_v15 = vadd.f32 %v1398_v28, %v1329_v56  ;;  %v995_v1 = vmul.f32 %v2363_v4, %v2737_v22  ;;  %v1127_v42 = vadd.f32 %v1095_v25, %v1026_v58  ;;  %v1096_v48 = vmul.f32 %v2368_v5, %v2739_v23 }
  0x7e   : > { %v825_v54 = vadd.f32 %v793_v2, %v724_v12  ;;  %v1198_v20 = vmul.f32 %v2377_v14, %v2786_v7  ;;  %v445_v10 = vmax.f32 %v413_v51, 0.0  ;;  %v2087_v47 = vunpack.c.l.bf16 %v2109_v18 }
  0x7f   : > { %v1472_v21 = vsel %vm452_vm0, %v1430_v15, 0.0  ;;  %v1531_v24 = vmul.f32 %v1430_v15, %v1430_v15  ;;  %v2012_v26 = vpack.c.bf16 %v1430_v15, %v1430_v15  ;;  %v1229_v27 = vadd.f32 %v1197_v40, %v1127_v42  ;;  %v2804_v40 = vld [vmem:[#allocation2 + $0xc9] sm:$0xff] }
  0x80   : > { %v1473_v9 = vadd.f32 %v1472_v21, %v1471_v38  ;;  %v926_v28 = vadd.f32 %v894_v13, %v825_v54  ;;  %534 = vst.msk [vmem:[#allocation2 + $0x141] sm:$0xff] %vm452_vm0, %v445_v10  ;;  %v592_v29 = vmul.f32 %v2339_v59, %v2692_v57  ;;  %v693_v33 = vmul.f32 %v2344_v60, %v2708_v41 }
  0x81   : > { %v1573_v30 = vsel %vm452_vm0, %v1531_v24, 0.0  ;;  %1766 = vst.msk [vmem:[%s2487_s27 + $0x2c] sm:$0xf] %vm1754_vm2, %v2012_v26  ;;  %v794_v43 = vmul.f32 %v2349_v61, %v2715_v31  ;;  %v1330_v39 = vadd.f32 %v1298_v8, %v1229_v27  ;;  %v378_v57 = vmul.f32 %v2811_v44, %v2087_v47  ;;  %v2847_v26 = vld [vmem:[#allocation2 + $0xd9] sm:$0xff]  ;;  %v2110_v27 = vld [vmem:[%s2284_s22 + $0x70] sm:$0xff]  }
  0x82   : > { %v1574_v16 = vadd.f32 %v1573_v30, %v1572_v6  ;;  %v1027_v25 = vadd.f32 %v995_v1, %v926_v28  ;;  %v1299_v41 = vmul.f32 %v2382_v19, %v2804_v40  ;;  %v1400_v31 = vmul.f32 %v2394_v32, %v2806_v45  ;;  %v2857_v47 = vld [vmem:[#allocation2 + $0xda] sm:$0xff] }
  0x83   : > { %v725_v36 = vadd.f32 %v693_v33, %v592_v29  ;;  %v895_v49 = vmul.f32 %v2358_v3, %v2754_v35  ;;  %v1431_v38 = vadd.f32 %v1399_v17, %v1330_v39  ;;  %v414_v62 = vadd.f32 %v2823_v55, %v378_v57 }
  0x84   : > { %v1128_v46 = vadd.f32 %v1096_v48, %v1027_v25  ;;  %v996_v63 = vmul.f32 %v2363_v4, %v2770_v50  ;;  %v1097_v0 = vmul.f32 %v2368_v5, %v2777_v34  ;;  %v1199_v6 = vmul.f32 %v2377_v14, %v2828_v52  ;;  %v2870_v25 = vld [vmem:[%s3350_s2] ss:$0 sm:$0xff] }
  0x85   : > { %v826_v11 = vadd.f32 %v794_v43, %v725_v36  ;;  %v2088_v56 = vunpack.c.h.bf16 %v2109_v18  ;;  %v1474_v53 = vsel %vm452_vm0, %v1431_v38, 0.0  ;;  %v1532_v2 = vmul.f32 %v1431_v38, %v1431_v38  ;;  %v2874_v36 = vld [vmem:[#allocation2 + $0xe0] sm:$0xff] }
  0x86   : > { %v2013_v58 = vpack.c.bf16 %v1431_v38, %v1431_v38  ;;  %v1230_v8 = vadd.f32 %v1198_v20, %v1128_v46  ;;  %v1475_v12 = vadd.f32 %v1474_v53, %v1473_v9  ;;  %v446_v13 = vmax.f32 %v414_v62, 0.0  ;;  %v2888_v46 = vld [vmem:[%s3350_s2 + $0x2] ss:$0 sm:$0xff] }
  0x87   : > { %v927_v15 = vadd.f32 %v895_v49, %v826_v11  ;;  %v379_v17 = vmul.f32 %v2811_v44, %v2088_v56  ;;  %v1575_v51 = vsel %vm452_vm0, %v1532_v2, 0.0  ;;  %v593_v42 = vmul.f32 %v2339_v59, %v2725_v37  ;;  %v2876_v49 = vld [vmem:[#allocation2 + $0xe1] sm:$0xff] }
  0x88   : > { %1767 = vst.msk [vmem:[%s2487_s27 + $0x30] sm:$0xf] %vm1754_vm2, %v2013_v58  ;;  %v1331_v1 = vadd.f32 %v1299_v41, %v1230_v8  ;;  %v694_v18 = vmul.f32 %v2344_v60, %v2737_v22  ;;  %v1576_v54 = vadd.f32 %v1575_v51, %v1574_v16  ;;  %v795_v21 = vmul.f32 %v2349_v61, %v2739_v23  ;;  %v2912_v58 = vld [vmem:[%s3350_s2 + $0x4] ss:$0 sm:$0xff]  ;;  %v2919_v8 = vld [vmem:[%s3350_s2 + $0x5] ss:$0 sm:$0xff] }
  0x89   : > { %535 = vst.msk [vmem:[#allocation2 + $0x151] sm:$0xff] %vm452_vm0, %v446_v13  ;;  %v1028_v48 = vadd.f32 %v996_v63, %v927_v15  ;;  %v415_v20 = vadd.f32 %v2823_v55, %v379_v17  ;;  %v896_v9 = vmul.f32 %v2358_v3, %v2786_v7  ;;  %v1300_v60 = vmul.f32 %v2382_v19, %v2847_v26 }
  0x8a   : > { %v1432_v24 = vadd.f32 %v1400_v31, %v1331_v1  ;;  %v726_v10 = vadd.f32 %v694_v18, %v593_v42  ;;  %v997_v22 = vmul.f32 %v2363_v4, %v2804_v40  ;;  %v1401_v3 = vmul.f32 %v2394_v32, %v2857_v47 }
  0x8b   : > { %v1129_v59 = vadd.f32 %v1097_v0, %v1028_v48  ;;  %v447_v37 = vmax.f32 %v415_v20, 0.0  ;;  %v1098_v43 = vmul.f32 %v2368_v5, %v2806_v45  ;;  %v2091_v39 = vunpack.c.l.bf16 %v2110_v27  ;;  %v2881_v5 = vld [vmem:[%s3350_s2 + $0x1] ss:$0 sm:$0xff]  ;;  %v2896_v0 = vld [vmem:[#allocation2 + $0xe2] sm:$0xff] }
  0x8c   : > { %v1476_v28 = vsel %vm452_vm0, %v1432_v24, 0.0  ;;  %v1533_v61 = vmul.f32 %v1432_v24, %v1432_v24  ;;  %v2014_v23 = vpack.c.bf16 %v1432_v24, %v1432_v24  ;;  %v827_v30 = vadd.f32 %v795_v21, %v726_v10 }
  0x8d   : > { %v1477_v29 = vadd.f32 %v1476_v28, %v1475_v12  ;;  %v1231_v33 = vadd.f32 %v1199_v6, %v1129_v59  ;;  %536 = vst.msk [vmem:[#allocation2 + $0x159] sm:$0xff] %vm452_vm0, %v447_v37  ;;  %v594_v57 = vmul.f32 %v2870_v25, %v2754_v35  ;;  %v695_v38 = vmul.f32 %v2881_v5, %v2770_v50  ;;  %v2932_v59 = vld [vmem:[#allocation2 + $0xf0] sm:$0xff] }
  0x8e   : > { %v1577_v4 = vsel %vm452_vm0, %v1533_v61, 0.0  ;;  %1768 = vst.msk [vmem:[%s2487_s27 + $0x34] sm:$0xf] %vm1754_vm2, %v2014_v23  ;;  %v928_v16 = vadd.f32 %v896_v9, %v827_v30  ;;  %v796_v35 = vmul.f32 %v2888_v46, %v2777_v34  ;;  %v1200_v63 = vmul.f32 %v2377_v14, %v2874_v36  ;;  %v2904_v34 = vld [vmem:[%s3350_s2 + $0x3] ss:$0 sm:$0xff]  ;;  %v2946_v28 = vld [vmem:[#allocation2 + $0xf2] sm:$0xff] }
  0x8f   : > { %v1578_v41 = vadd.f32 %v1577_v4, %v1576_v54  ;;  %v1332_v31 = vadd.f32 %v1300_v60, %v1231_v33  ;;  %v1301_v11 = vmul.f32 %v2382_v19, %v2876_v49  ;;  %v380_v6 = vmul.f32 %v2811_v44, %v2091_v39  ;;  %v2960_v33 = vld [vmem:[%s3350_s2 + $0x8] ss:$0 sm:$0xff] }
  0x90   : > { %v1029_v62 = vadd.f32 %v997_v22, %v928_v16  ;;  %v1402_v56 = vmul.f32 %v2394_v32, %v2896_v0  ;;  %v727_v53 = vadd.f32 %v695_v38, %v594_v57  ;;  %v897_v14 = vmul.f32 %v2904_v34, %v2828_v52 }
  0x91   : > { %v1433_v50 = vadd.f32 %v1401_v3, %v1332_v31  ;;  %v416_v19 = vadd.f32 %v2823_v55, %v380_v6  ;;  %v998_v32 = vmul.f32 %v2912_v58, %v2847_v26  ;;  %v1099_v12 = vmul.f32 %v2919_v8, %v2857_v47 }
  0x92   : > { %v1130_v2 = vadd.f32 %v1098_v43, %v1029_v62  ;;  %v828_v51 = vadd.f32 %v796_v35, %v727_v53  ;;  %v2092_v54 = vunpack.c.h.bf16 %v2110_v27  ;;  %v595_v21 = vmul.f32 %v2870_v25, %v2786_v7  ;;  %v2940_v27 = vld [vmem:[%s3350_s2 + $0x6] ss:$0 sm:$0xff] }
  0x93   : > { %v1478_v13 = vsel %vm452_vm0, %v1433_v50, 0.0  ;;  %v1534_v15 = vmul.f32 %v1433_v50, %v1433_v50  ;;  %v2015_v17 = vpack.c.bf16 %v1433_v50, %v1433_v50  ;;  %v448_v18 = vmax.f32 %v416_v19, 0.0 }
  0x94   : > { %v1479_v1 = vadd.f32 %v1478_v13, %v1477_v29  ;;  %v1232_v42 = vadd.f32 %v1200_v63, %v1130_v2  ;;  %v929_v20 = vadd.f32 %v897_v14, %v828_v51  ;;  %v696_v24 = vmul.f32 %v2881_v5, %v2804_v40  ;;  %v2944_v40 = vld [vmem:[#allocation2 + $0xf1] sm:$0xff] }
  0x95   : > { %v1579_v48 = vsel %vm452_vm0, %v1534_v15, 0.0  ;;  %1769 = vst.msk [vmem:[%s2487_s27 + $0x38] sm:$0xf] %vm1754_vm2, %v2015_v17  ;;  %v381_v60 = vmul.f32 %v2811_v44, %v2092_v54  ;;  %v797_v37 = vmul.f32 %v2888_v46, %v2806_v45  ;;  %v1201_v7 = vmul.f32 %v2940_v27, %v2932_v59  ;;  %v2953_v45 = vld [vmem:[%s3350_s2 + $0x7] ss:$0 sm:$0xff] }
  0x96   : > { %v1580_v10 = vadd.f32 %v1579_v48, %v1578_v41  ;;  %v1333_v9 = vadd.f32 %v1301_v11, %v1232_v42  ;;  %537 = vst.msk [vmem:[#allocation2 + $0x169] sm:$0xff] %vm452_vm0, %v448_v18  ;;  %v1030_v22 = vadd.f32 %v998_v32, %v929_v20  ;;  %v728_v61 = vadd.f32 %v696_v24, %v595_v21 }
  0x97   : > { %v898_v23 = vmul.f32 %v2904_v34, %v2874_v36  ;;  %v1302_v29 = vmul.f32 %v2953_v45, %v2944_v40  ;;  %v1403_v3 = vmul.f32 %v2960_v33, %v2946_v28  ;;  %v417_v43 = vadd.f32 %v2823_v55, %v381_v60  ;;  %v3007_v60 = vld [vmem:[#allocation2 + $0x108] sm:$0xff] }
  0x98   : > { %v1434_v30 = vadd.f32 %v1402_v56, %v1333_v9  ;;  %v1131_v4 = vadd.f32 %v1099_v12, %v1030_v22  ;;  %v829_v16 = vadd.f32 %v797_v37, %v728_v61  ;;  %v999_v39 = vmul.f32 %v2912_v58, %v2876_v49  ;;  %v2976_v56 = vld [vmem:[#allocation2 + $0xf8] sm:$0xff]  ;;  %v3009_v37 = vld [vmem:[#allocation2 + $0x109] sm:$0xff] }
  0x99   : > { %v1100_v57 = vmul.f32 %v2919_v8, %v2896_v0  ;;  %v449_v35 = vmax.f32 %v417_v43, 0.0  ;;  %v596_v6 = vmul.f32 %v2870_v25, %v2828_v52  ;;  %v697_v53 = vmul.f32 %v2881_v5, %v2847_v26  ;;  %v2986_v12 = vld [vmem:[#allocation2 + $0xf9] sm:$0xff]  ;;  %v3011_v22 = vld [vmem:[#allocation2 + $0x10a] sm:$0xff] }
  0x9a   : > { %v1480_v41 = vsel %vm452_vm0, %v1434_v30, 0.0  ;;  %v1535_v31 = vmul.f32 %v1434_v30, %v1434_v30  ;;  %v2016_v38 = vpack.c.bf16 %v1434_v30, %v1434_v30  ;;  %v1233_v63 = vadd.f32 %v1201_v7, %v1131_v4 }
  0x9b   : > { %v1481_v62 = vadd.f32 %v1480_v41, %v1479_v1  ;;  %v930_v11 = vadd.f32 %v898_v23, %v829_v16  ;;  %538 = vst.msk [vmem:[#allocation2 + $0x171] sm:$0xff] %vm452_vm0, %v449_v35  ;;  %v798_v14 = vmul.f32 %v2888_v46, %v2857_v47  ;;  %v1202_v52 = vmul.f32 %v2940_v27, %v2976_v56  ;;  %v2994_v1 = vld [vmem:[#allocation2 + $0xfa] sm:$0xff] }
  0x9c   : > { %v1581_v50 = vsel %vm452_vm0, %v1535_v31, 0.0  ;;  %1770 = vst.msk [vmem:[%s2487_s27 + $0x3c] sm:$0xf] %vm1754_vm2, %v2016_v38  ;;  %v1334_v19 = vadd.f32 %v1302_v29, %v1233_v63  ;;  %v729_v13 = vadd.f32 %v697_v53, %v596_v6  ;;  %v899_v15 = vmul.f32 %v2904_v34, %v2932_v59  ;;  %v3032_v53 = vld [vmem:[#allocation2 + $0x110] sm:$0xff] }
  0x9d   : > { %v2982_v2 = vadd.f32 %v1581_v50, %v1580_v10  ;;  %v1031_v32 = vadd.f32 %v999_v39, %v930_v11  ;;  %v1303_v26 = vmul.f32 %v2953_v45, %v2986_v12  ;;  %v597_v47 = vmul.f32 %v2870_v25, %v2874_v36  ;;  %v2111_v10 = vld [vmem:[%s2284_s22 + $0x78] sm:$0xff]   ;;  %s1953_s22 = sshll.u32 %s3358_s15, 3 }
  0x9e   : > { %v1435_v17 = vadd.f32 %v1403_v3, %v1334_v19  ;;  %v830_v42 = vadd.f32 %v798_v14, %v729_v13  ;;  %v1000_v18 = vmul.f32 %v2912_v58, %v2944_v40  ;;  %v698_v54 = vmul.f32 %v2881_v5, %v2876_v49  ;;  %v3037_v13 = vld [vmem:[#allocation2 + $0x111] sm:$0xff]  ;;  %s281_s30 = scalar_lea.vmem %s3352_s4, %s1953_s22 }
  0x9f   : > { %v1132_v51 = vadd.f32 %v1100_v57, %v1031_v32  ;;  %v799_v48 = vmul.f32 %v2888_v46, %v2896_v0  ;;  %v1404_v24 = vmul.f32 %v2960_v33, %v2994_v1  ;;  %v1101_v9 = vmul.f32 %v2919_v8, %v2946_v28 }
  0xa0   : > { %v2017_v20 = vpack.c.bf16 %v1435_v17, %v1435_v17  ;;  %v931_v36 = vadd.f32 %v899_v15, %v830_v42  ;;  %v730_v49 = vadd.f32 %v698_v54, %v597_v47  ;;  %v900_v0 = vmul.f32 %v2904_v34, %v2976_v56 }
  0xa1   : > { %v1234_v21 = vadd.f32 %v1202_v52, %v1132_v51  ;;  %v1203_v61 = vmul.f32 %v2940_v27, %v3007_v60  ;;  %v1304_v23 = vmul.f32 %v2953_v45, %v3009_v37  ;;  %v1405_v30 = vmul.f32 %v2960_v33, %v3011_v22 }
  0xa2   : > { %1771 = vst.msk [vmem:[%s2487_s27 + $0x40] sm:$0xf] %vm1754_vm2, %v2017_v20  ;;  %v1482_v29 = vsel %vm452_vm0, %v1435_v17, 0.0  ;;  %v1032_v3 = vadd.f32 %v1000_v18, %v931_v36  ;;  %v831_v43 = vadd.f32 %v799_v48, %v730_v49  ;;  %v1001_v4 = vmul.f32 %v2912_v58, %v2986_v12 }
  0xa3   : > { %v1335_v7 = vadd.f32 %v1303_v26, %v1234_v21  ;;  %v1102_v39 = vmul.f32 %v2919_v8, %v2994_v1  ;;  %v2095_v57 = vunpack.c.l.bf16 %v2111_v10  ;;  %v2096_v41 = vunpack.c.h.bf16 %v2111_v10 }
  0xa4   : > { %v1133_v31 = vadd.f32 %v1101_v9, %v1032_v3  ;;  %v932_v38 = vadd.f32 %v900_v0, %v831_v43  ;;  %v598_v35 = vmul.f32 %v2870_v25, %v2932_v59  ;;  %v699_v63 = vmul.f32 %v2881_v5, %v2944_v40  ;;  %v3044_v40 = vld [vmem:[#allocation2 + $0x112] sm:$0xff] }
  0xa5   : > { %v1436_v16 = vadd.f32 %v1404_v24, %v1335_v7  ;;  %v1483_v11 = vadd.f32 %v1482_v29, %v1481_v62  ;;  %v1536_v6 = vmul.f32 %v1435_v17, %v1435_v17  ;;  %v382_v14 = vmul.f32 %v2811_v44, %v2095_v57  ;;  %v3074_v57 = vld [vmem:[#allocation2 + $0x121] sm:$0xff] }
  0xa6   : > { %v1235_v19 = vadd.f32 %v1203_v61, %v1133_v31  ;;  %v1033_v32 = vadd.f32 %v1001_v4, %v932_v38  ;;  %v1204_v52 = vmul.f32 %v2940_v27, %v3032_v53  ;;  %v383_v15 = vmul.f32 %v2811_v44, %v2096_v41 }
  0xa7   : > { %v2018_v50 = vpack.c.bf16 %v1436_v16, %v1436_v16  ;;  %v1305_v59 = vmul.f32 %v2953_v45, %v3037_v13  ;;  %v418_v62 = vadd.f32 %v2823_v55, %v382_v14  ;;  %v731_v17 = vadd.f32 %v699_v63, %v598_v35 }
  0xa8   : > { %v800_v51 = vmul.f32 %v2888_v46, %v2946_v28  ;;  %v1336_v26 = vadd.f32 %v1304_v23, %v1235_v19  ;;  %v1134_v47 = vadd.f32 %v1102_v39, %v1033_v32  ;;  %v1406_v42 = vmul.f32 %v2960_v33, %v3044_v40 }
  0xa9   : > { %1772 = vst.msk [vmem:[%s2487_s27 + $0x44] sm:$0xf] %vm1754_vm2, %v2018_v50  ;;  %v419_v44 = vadd.f32 %v2823_v55, %v383_v15  ;;  %v450_v18 = vmax.f32 %v418_v62, 0.0  ;;  %v901_v48 = vmul.f32 %v2904_v34, %v3007_v60  ;;  %v1002_v20 = vmul.f32 %v2912_v58, %v3009_v37 }
  0xaa   : > { %v832_v54 = vadd.f32 %v800_v51, %v731_v17  ;;  %v1537_v21 = vmul.f32 %v1436_v16, %v1436_v16  ;;  %v1437_v24 = vadd.f32 %v1405_v30, %v1336_v26  ;;  %v1236_v10 = vadd.f32 %v1204_v52, %v1134_v47  ;;  %v3063_v30 = vld [vmem:[#allocation2 + $0x120] sm:$0xff] }
  0xab   : > { %v451_v36 = vmax.f32 %v419_v44, 0.0  ;;  %v1583_v28 = vsel %vm452_vm0, %v1536_v6, 0.0  ;;  %v1484_v9 = vsel %vm452_vm0, %v1436_v16, 0.0  ;;  %539 = vst.msk [vmem:[#allocation2 + $0x181] sm:$0xff] %vm452_vm0, %v450_v18  ;;  %v1103_v49 = vmul.f32 %v2919_v8, %v3011_v22  ;;  %v1169_v44 = vld [vmem:[#allocation2 + $0x128] sm:$0xff] }
  0xac   : > { %v933_v55 = vadd.f32 %v901_v48, %v832_v54  ;;  %v1584_v0 = vadd.f32 %v1583_v28, %v2982_v2  ;;  %v1485_v7 = vadd.f32 %v1484_v9, %v1483_v11  ;;  %v2019_v61 = vpack.c.bf16 %v1437_v24, %v1437_v24 }
  0xad   : > { %v1337_v23 = vadd.f32 %v1305_v59, %v1236_v10  ;;  %540 = vst.msk [vmem:[#allocation2 + $0x189] sm:$0xff] %vm452_vm0, %v451_v36  ;;  %v1205_v3 = vmul.f32 %v2940_v27, %v3063_v30  ;;  %v599_v43 = vmul.f32 %v2870_v25, %v2976_v56  ;;  %v700_v4 = vmul.f32 %v2881_v5, %v2986_v12  ;;  %v3080_v56 = vld [vmem:[#allocation2 + $0x122] sm:$0xff] }
  0xae   : > { %v1034_v29 = vadd.f32 %v1002_v20, %v933_v55  ;;  %v1585_v16 = vsel %vm452_vm0, %v1537_v21, 0.0  ;;  %v1538_v2 = vmul.f32 %v1437_v24, %v1437_v24  ;;  %1773 = vst.msk [vmem:[%s2487_s27 + $0x48] sm:$0xf] %vm1754_vm2, %v2019_v61  ;;  %v801_v41 = vmul.f32 %v2888_v46, %v2994_v1 }
  0xaf   : > { %v1438_v39 = vadd.f32 %v1406_v42, %v1337_v23  ;;  %v1306_v38 = vmul.f32 %v2953_v45, %v3074_v57  ;;  %v732_v35 = vadd.f32 %v700_v4, %v599_v43  ;;  %v902_v12 = vmul.f32 %v2904_v34, %v3032_v53 }
  0xb0   : > { %v1135_v31 = vadd.f32 %v1103_v49, %v1034_v29  ;;  %v1586_v63 = vadd.f32 %v1585_v16, %v1584_v0  ;;  %v1407_v6 = vmul.f32 %v2960_v33, %v3080_v56  ;;  %v1486_v50 = vsel %vm452_vm0, %v1437_v24, 0.0  ;;  %v1270_v24 = vld [vmem:[#allocation2 + $0x129] sm:$0xff]  ;;  %v3120_v16 = vld [vmem:[#allocation2 + $0x138] sm:$0xff] }
  0xb1   : > { %v2020_v11 = vpack.c.bf16 %v1438_v39, %v1438_v39  ;;  %v833_v1 = vadd.f32 %v801_v41, %v732_v35  ;;  %v1003_v19 = vmul.f32 %v2912_v58, %v3037_v13  ;;  %v1487_v32 = vadd.f32 %v1486_v50, %v1485_v7  ;;  %v1371_v49 = vld [vmem:[#allocation2 + $0x12a] sm:$0xff] }
  0xb2   : > { %v1237_v14 = vadd.f32 %v1205_v3, %v1135_v31  ;;  %v1587_v52 = vsel %vm452_vm0, %v1538_v2, 0.0  ;;  %v1539_v15 = vmul.f32 %v1438_v39, %v1438_v39  ;;  %v600_v59 = vmul.f32 %v2870_v25, %v3007_v60  ;;  %v3122_v2 = vld [vmem:[#allocation2 + $0x139] sm:$0xff] }
  0xb3   : > { %1774 = vst.msk [vmem:[%s2487_s27 + $0x4c] sm:$0xf] %vm1754_vm2, %v2020_v11  ;;  %v934_v17 = vadd.f32 %v902_v12, %v833_v1  ;;  %v1104_v51 = vmul.f32 %v2919_v8, %v3044_v40  ;;  %v701_v26 = vmul.f32 %v2881_v5, %v3009_v37  ;;  %v1588_v47 = vadd.f32 %v1587_v52, %v1586_v63  ;;  %v3130_v63 = vld [vmem:[#allocation2 + $0x13a] sm:$0xff] }
  0xb4   : > { %v1338_v62 = vadd.f32 %v1306_v38, %v1237_v14  ;;  %v1488_v42 = vsel %vm452_vm0, %v1438_v39, 0.0  ;;  %v802_v18 = vmul.f32 %v2888_v46, %v3011_v22  ;;  %v1206_v20 = vmul.f32 %v2940_v27, %v1169_v44 }
  0xb5   : > { %v1035_v48 = vadd.f32 %v1003_v19, %v934_v17  ;;  %v733_v60 = vadd.f32 %v701_v26, %v600_v59  ;;  %v1489_v21 = vadd.f32 %v1488_v42, %v1487_v32  ;;  %v903_v10 = vmul.f32 %v2904_v34, %v3063_v30 }
  0xb6   : > { %v1439_v54 = vadd.f32 %v1407_v6, %v1338_v62  ;;  %v601_v37 = vmul.f32 %v2870_v25, %v3032_v53  ;;  %v702_v36 = vmul.f32 %v2881_v5, %v3037_v13  ;;  %v1589_v28 = vsel %vm452_vm0, %v1539_v15, 0.0  ;;  %v3132_v6 = vld [vmem:[#allocation2 + $0x140] sm:$0xff] }
  0xb7   : > { %v1136_v9 = vadd.f32 %v1104_v51, %v1035_v48  ;;  %v1307_v55 = vmul.f32 %v2953_v45, %v1270_v24  ;;  %v834_v0 = vadd.f32 %v802_v18, %v733_v60  ;;  %v1004_v7 = vmul.f32 %v2912_v58, %v3074_v57  ;;  %v3144_v62 = vld [vmem:[#allocation2 + $0x141] sm:$0xff] }
  0xb8   : > { %v2021_v22 = vpack.c.bf16 %v1439_v54, %v1439_v54  ;;  %v734_v61 = vadd.f32 %v702_v36, %v601_v37  ;;  %v803_v23 = vmul.f32 %v2888_v46, %v3044_v40  ;;  %v1590_v29 = vadd.f32 %v1589_v28, %v1588_v47  ;;  %v3151_v48 = vld [vmem:[#allocation2 + $0x142] sm:$0xff] }
  0xb9   : > { %v1238_v53 = vadd.f32 %v1206_v20, %v1136_v9  ;;  %v1408_v13 = vmul.f32 %v2960_v33, %v1371_v49  ;;  %v904_v3 = vmul.f32 %v2904_v34, %v1169_v44  ;;  %v935_v43 = vadd.f32 %v903_v10, %v834_v0 }
  0xba   : > { %1775 = vst.msk [vmem:[%s2487_s27 + $0x50] sm:$0xf] %vm1754_vm2, %v2021_v22  ;;  %v1105_v4 = vmul.f32 %v2919_v8, %v3080_v56  ;;  %v835_v39 = vadd.f32 %v803_v23, %v734_v61  ;;  %v1005_v41 = vmul.f32 %v2912_v58, %v1270_v24  ;;  %v1207_v31 = vmul.f32 %v2940_v27, %v3120_v16 }
  0xbb   : > { %v1339_v40 = vadd.f32 %v1307_v55, %v1238_v53  ;;  %v1308_v38 = vmul.f32 %v2953_v45, %v3122_v2  ;;  %v1106_v35 = vmul.f32 %v2919_v8, %v1371_v49  ;;  %v1036_v12 = vadd.f32 %v1004_v7, %v935_v43 }
  0xbc   : > { %v936_v11 = vadd.f32 %v904_v3, %v835_v39  ;;  %v602_v50 = vmul.f32 %v2870_v25, %v3063_v30  ;;  %v703_v14 = vmul.f32 %v2881_v5, %v3074_v57  ;;  %v1409_v19 = vmul.f32 %v2960_v33, %v3130_v63 }
  0xbd   : > { %v1440_v1 = vadd.f32 %v1408_v13, %v1339_v40  ;;  %v1208_v32 = vmul.f32 %v2940_v27, %v3132_v6  ;;  %v804_v52 = vmul.f32 %v2888_v46, %v3080_v56  ;;  %v1137_v15 = vadd.f32 %v1105_v4, %v1036_v12  ;;  %v3165_v13 = vld [vmem:[#allocation2 + $0x150] sm:$0xff] }
  0xbe   : > { %v1037_v59 = vadd.f32 %v1005_v41, %v936_v11  ;;  %v735_v17 = vadd.f32 %v703_v14, %v602_v50  ;;  %v905_v30 = vmul.f32 %v2904_v34, %v3120_v16  ;;  %v1490_v57 = vsel %vm452_vm0, %v1439_v54, 0.0  ;;  %v1273_v41 = vld [vmem:[#allocation2 + $0x151] sm:$0xff] }
  0xbf   : > { %v1540_v51 = vmul.f32 %v1439_v54, %v1439_v54  ;;  %v2022_v26 = vpack.c.bf16 %v1440_v1, %v1440_v1  ;;  %v1309_v47 = vmul.f32 %v2953_v45, %v3144_v62  ;;  %v1239_v42 = vadd.f32 %v1207_v31, %v1137_v15 }
  0xc0   : > { %v1138_v18 = vadd.f32 %v1106_v35, %v1037_v59  ;;  %v836_v56 = vadd.f32 %v804_v52, %v735_v17  ;;  %v1006_v20 = vmul.f32 %v2912_v58, %v3122_v2  ;;  %v1491_v60 = vadd.f32 %v1490_v57, %v1489_v21  ;;  %v3186_v59 = vld [vmem:[#allocation2 + $0x158] sm:$0xff] }
  0xc1   : > { %1776 = vst.msk [vmem:[%s2487_s27 + $0x54] sm:$0xf] %vm1754_vm2, %v2022_v26  ;;  %v1410_v10 = vmul.f32 %v2960_v33, %v3151_v48  ;;  %v603_v54 = vmul.f32 %v2870_v25, %v1169_v44  ;;  %v1541_v37 = vmul.f32 %v1440_v1, %v1440_v1  ;;  %v1340_v36 = vadd.f32 %v1308_v38, %v1239_v42  ;;  %v3174_v38 = vld [vmem:[#allocation2 + $0x152] sm:$0xff] }
  0xc2   : > { %v1240_v28 = vadd.f32 %v1208_v32, %v1138_v18  ;;  %v937_v22 = vadd.f32 %v905_v30, %v836_v56  ;;  %v1591_v9 = vsel %vm452_vm0, %v1540_v51, 0.0  ;;  %v1107_v55 = vmul.f32 %v2919_v8, %v3130_v63  ;;  %v3188_v17 = vld [vmem:[#allocation2 + $0x159] sm:$0xff] }
  0xc3   : > { %v704_v0 = vmul.f32 %v2881_v5, %v1270_v24  ;;  %v805_v21 = vmul.f32 %v2888_v46, %v1371_v49  ;;  %v1592_v7 = vadd.f32 %v1591_v9, %v1590_v29  ;;  %v1441_v61 = vadd.f32 %v1409_v19, %v1340_v36  ;;  %v3196_v51 = vld [vmem:[#allocation2 + $0x15a] sm:$0xff] }
  0xc4   : > { %v1341_v23 = vadd.f32 %v1309_v47, %v1240_v28  ;;  %v1038_v53 = vadd.f32 %v1006_v20, %v937_v22  ;;  %v1492_v44 = vsel %vm452_vm0, %v1440_v1, 0.0  ;;  %v1209_v3 = vmul.f32 %v2940_v27, %v3165_v13 }
  0xc5   : > { %v736_v43 = vadd.f32 %v704_v0, %v603_v54  ;;  %v906_v4 = vmul.f32 %v2904_v34, %v3132_v6  ;;  %v1493_v39 = vadd.f32 %v1492_v44, %v1491_v60  ;;  %v1593_v24 = vsel %vm452_vm0, %v1541_v37, 0.0 }
  0xc6   : > { %v2023_v49 = vpack.c.bf16 %v1441_v61, %v1441_v61  ;;  %v1442_v29 = vadd.f32 %v1410_v10, %v1341_v23  ;;  %v1139_v40 = vadd.f32 %v1107_v55, %v1038_v53  ;;  %v1310_v31 = vmul.f32 %v2953_v45, %v1273_v41 }
  0xc7   : > { %v837_v35 = vadd.f32 %v805_v21, %v736_v43  ;;  %v1007_v12 = vmul.f32 %v2912_v58, %v3144_v62  ;;  %v1542_v11 = vmul.f32 %v1441_v61, %v1441_v61  ;;  %v1411_v14 = vmul.f32 %v2960_v33, %v3174_v38 }
  0xc8   : > { %1777 = vst.msk [vmem:[%s2487_s27 + $0x58] sm:$0xf] %vm1754_vm2, %v2023_v49  ;;  %v2024_v50 = vpack.c.bf16 %v1442_v29, %v1442_v29  ;;  %v604_v1 = vmul.f32 %v2870_v25, %v3120_v16  ;;  %v1594_v19 = vadd.f32 %v1593_v24, %v1592_v7  ;;  %v1241_v32 = vadd.f32 %v1209_v3, %v1139_v40 }
  0xc9   : > { %v938_v52 = vadd.f32 %v906_v4, %v837_v35  ;;  %v1108_v15 = vmul.f32 %v2919_v8, %v3151_v48  ;;  %v1210_v30 = vmul.f32 %v2940_v27, %v3186_v59  ;;  %v1311_v57 = vmul.f32 %v2953_v45, %v3188_v17 }
  0xca   : > { %1778 = vst.msk [vmem:[%s2487_s27 + $0x5c] sm:$0xf] %vm1754_vm2, %v2024_v50  ;;  %v705_v16 = vmul.f32 %v2881_v5, %v3122_v2  ;;  %v806_v26 = vmul.f32 %v2888_v46, %v3130_v63  ;;  %v1494_v47 = vsel %vm452_vm0, %v1441_v61, 0.0  ;;  %v1342_v42 = vadd.f32 %v1310_v31, %v1241_v32 }
  0xcb   : > { %v1039_v18 = vadd.f32 %v1007_v12, %v938_v52  ;;  %v1412_v56 = vmul.f32 %v2960_v33, %v3196_v51  ;;  %v1495_v20 = vadd.f32 %v1494_v47, %v1493_v39  ;;  %v1595_v60 = vsel %vm452_vm0, %v1542_v11, 0.0  ;;  %v3227_v39 = vld [vmem:[#allocation2 + $0x169] sm:$0xff] }
  0xcc   : > { %v737_v10 = vadd.f32 %v705_v16, %v604_v1  ;;  %v907_v54 = vmul.f32 %v2904_v34, %v3165_v13  ;;  %v1543_v37 = vmul.f32 %v1442_v29, %v1442_v29  ;;  %v1443_v36 = vadd.f32 %v1411_v14, %v1342_v42  ;;  %v3236_v14 = vld [vmem:[#allocation2 + $0x16a] sm:$0xff] }
  0xcd   : > { %v1140_v2 = vadd.f32 %v1108_v15, %v1039_v18  ;;  %v605_v63 = vmul.f32 %v2870_v25, %v3132_v6  ;;  %v1008_v22 = vmul.f32 %v2912_v58, %v1273_v41  ;;  %v706_v9 = vmul.f32 %v2881_v5, %v3144_v62  ;;  %v3218_v6 = vld [vmem:[#allocation2 + $0x168] sm:$0xff] }
  0xce   : > { %v838_v28 = vadd.f32 %v806_v26, %v737_v10  ;;  %v807_v55 = vmul.f32 %v2888_v46, %v3151_v48  ;;  %v1596_v0 = vadd.f32 %v1595_v60, %v1594_v19  ;;  %v1496_v21 = vsel %vm452_vm0, %v1442_v29, 0.0 }
  0xcf   : > { %v2025_v7 = vpack.c.bf16 %v1443_v36, %v1443_v36  ;;  %v1242_v61 = vadd.f32 %v1210_v30, %v1140_v2  ;;  %v1109_v53 = vmul.f32 %v2919_v8, %v3174_v38  ;;  %v738_v44 = vadd.f32 %v706_v9, %v605_v63  ;;  %v3244_v30 = vld [vmem:[#allocation2 + $0x170] sm:$0xff] }
  0xd0   : > { %v939_v23 = vadd.f32 %v907_v54, %v838_v28  ;;  %v908_v3 = vmul.f32 %v2904_v34, %v3186_v59  ;;  %v1497_v43 = vadd.f32 %v1496_v21, %v1495_v20  ;;  %v1597_v62 = vsel %vm452_vm0, %v1543_v37, 0.0  ;;  %v3260_v2 = vld [vmem:[#allocation2 + $0x172] sm:$0xff] }
  0xd1   : > { %1779 = vst.msk [vmem:[%s2487_s27 + $0x60] sm:$0xf] %vm1754_vm2, %v2025_v7  ;;  %v1343_v48 = vadd.f32 %v1311_v57, %v1242_v61  ;;  %v1211_v4 = vmul.f32 %v2940_v27, %v3218_v6  ;;  %v1312_v49 = vmul.f32 %v2953_v45, %v3227_v39  ;;  %v839_v29 = vadd.f32 %v807_v55, %v738_v44  ;;  %v1277_v7 = vld [vmem:[#allocation2 + $0x181] sm:$0xff] }
  0xd2   : > { %v1040_v24 = vadd.f32 %v1008_v22, %v939_v23  ;;  %v1009_v40 = vmul.f32 %v2912_v58, %v3188_v17  ;;  %v1544_v31 = vmul.f32 %v1443_v36, %v1443_v36  ;;  %v606_v12 = vmul.f32 %v2870_v25, %v3165_v13  ;;  %v1378_v44 = vld [vmem:[#allocation2 + $0x182] sm:$0xff] }
  0xd3   : > { %v1444_v35 = vadd.f32 %v1412_v56, %v1343_v48  ;;  %v707_v11 = vmul.f32 %v2881_v5, %v1273_v41  ;;  %v940_v1 = vadd.f32 %v908_v3, %v839_v29  ;;  %v1110_v19 = vmul.f32 %v2919_v8, %v3196_v51 }
  0xd4   : > { %v1141_v50 = vadd.f32 %v1109_v53, %v1040_v24  ;;  %v808_v32 = vmul.f32 %v2888_v46, %v3174_v38  ;;  %v1413_v15 = vmul.f32 %v2960_v33, %v3236_v14  ;;  %v909_v41 = vmul.f32 %v2904_v34, %v3218_v6  ;;  %v3253_v38 = vld [vmem:[#allocation2 + $0x171] sm:$0xff] }
  0xd5   : > { %v2026_v52 = vpack.c.bf16 %v1444_v35, %v1444_v35  ;;  %v739_v13 = vadd.f32 %v707_v11, %v606_v12  ;;  %v1498_v57 = vsel %vm452_vm0, %v1443_v36, 0.0  ;;  %v1041_v26 = vadd.f32 %v1009_v40, %v940_v1  ;;  %v1176_v36 = vld [vmem:[#allocation2 + $0x180] sm:$0xff]  ;;  %v1177_v11 = vld [vmem:[#allocation2 + $0x188] sm:$0xff] }
  0xd6   : > { %v1243_v16 = vadd.f32 %v1211_v4, %v1141_v50  ;;  %v1212_v47 = vmul.f32 %v2940_v27, %v3244_v30  ;;  %v1598_v42 = vadd.f32 %v1597_v62, %v1596_v0  ;;  %v1499_v18 = vadd.f32 %v1498_v57, %v1497_v43 }
  0xd7   : > { %1780 = vst.msk [vmem:[%s2487_s27 + $0x64] sm:$0xf] %vm1754_vm2, %v2026_v52  ;;  %v840_v56 = vadd.f32 %v808_v32, %v739_v13  ;;  %v1010_v20 = vmul.f32 %v2912_v58, %v3227_v39  ;;  %v1599_v60 = vsel %vm452_vm0, %v1544_v31, 0.0  ;;  %v1142_v54 = vadd.f32 %v1110_v19, %v1041_v26  ;;  %v1278_v13 = vld [vmem:[#allocation2 + $0x189] sm:$0xff] }
  0xd8   : > { %v1344_v10 = vadd.f32 %v1312_v49, %v1243_v16  ;;  %v1313_v37 = vmul.f32 %v2953_v45, %v3253_v38  ;;  %v1111_v28 = vmul.f32 %v2919_v8, %v3236_v14  ;;  %v607_v22 = vmul.f32 %v2870_v25, %v3186_v59 }
  0xd9   : > { %v941_v63 = vadd.f32 %v909_v41, %v840_v56  ;;  %v708_v9 = vmul.f32 %v2881_v5, %v3188_v17  ;;  %v1244_v0 = vadd.f32 %v1212_v47, %v1142_v54  ;;  %v1414_v21 = vmul.f32 %v2960_v33, %v3260_v2 }
  0xda   : > { %v1445_v55 = vadd.f32 %v1413_v15, %v1344_v10  ;;  %v809_v61 = vmul.f32 %v2888_v46, %v3196_v51  ;;  %v1213_v53 = vmul.f32 %v2940_v27, %v1176_v36  ;;  %v910_v59 = vmul.f32 %v2904_v34, %v3244_v30 }
  0xdb   : > { %v1042_v23 = vadd.f32 %v1010_v20, %v941_v63  ;;  %v740_v3 = vadd.f32 %v708_v9, %v607_v22  ;;  %v1500_v17 = vsel %vm452_vm0, %v1444_v35, 0.0  ;;  %v1545_v43 = vmul.f32 %v1444_v35, %v1444_v35 }
  0xdc   : > { %v2027_v62 = vpack.c.bf16 %v1445_v55, %v1445_v55  ;;  %v1345_v48 = vadd.f32 %v1313_v37, %v1244_v0  ;;  %v1314_v24 = vmul.f32 %v2953_v45, %v1277_v7  ;;  %v1011_v51 = vmul.f32 %v2912_v58, %v3253_v38 }
  0xdd   : > { %v1143_v4 = vadd.f32 %v1111_v28, %v1042_v23  ;;  %v841_v49 = vadd.f32 %v809_v61, %v740_v3  ;;  %v1600_v29 = vadd.f32 %v1599_v60, %v1598_v42  ;;  %v1501_v40 = vadd.f32 %v1500_v17, %v1499_v18  ;;  %v1379_v18 = vld [vmem:[#allocation2 + $0x18a] sm:$0xff] }
  0xde   : > { %1781 = vst.msk [vmem:[%s2487_s27 + $0x68] sm:$0xf] %vm1754_vm2, %v2027_v62  ;;  %v1446_v31 = vadd.f32 %v1414_v21, %v1345_v48  ;;  %v1415_v12 = vmul.f32 %v2960_v33, %v1378_v44  ;;  %v1112_v1 = vmul.f32 %v2919_v8, %v3260_v2  ;;  %v608_v19 = vmul.f32 %v2870_v25, %v3218_v6  ;;  %v1178_v21 = vld [vmem:[#allocation2 + $0x198] sm:$0xff] }
  0xdf   : > { %v1245_v50 = vadd.f32 %v1213_v53, %v1143_v4  ;;  %v942_v35 = vadd.f32 %v910_v59, %v841_v49  ;;  %v1601_v32 = vsel %vm452_vm0, %v1545_v43, 0.0  ;;  %v1546_v52 = vmul.f32 %v1445_v55, %v1445_v55  ;;  %v1279_v59 = vld [vmem:[#allocation2 + $0x199] sm:$0xff] }
  0xe0   : > { %v2028_v15 = vpack.c.bf16 %v1446_v31, %v1446_v31  ;;  %v709_v41 = vmul.f32 %v2881_v5, %v3227_v39  ;;  %v1214_v26 = vmul.f32 %v2940_v27, %v1177_v11  ;;  %v810_v47 = vmul.f32 %v2888_v46, %v3236_v14 }
  0xe1   : > { %v1346_v57 = vadd.f32 %v1314_v24, %v1245_v50  ;;  %v1043_v16 = vadd.f32 %v1011_v51, %v942_v35  ;;  %v1602_v42 = vadd.f32 %v1601_v32, %v1600_v29  ;;  %v911_v56 = vmul.f32 %v2904_v34, %v1176_v36 }
  0xe2   : > { %1782 = vst.msk [vmem:[%s2487_s27 + $0x6c] sm:$0xf] %vm1754_vm2, %v2028_v15  ;;  %v741_v6 = vadd.f32 %v709_v41, %v608_v19  ;;  %v1502_v20 = vsel %vm452_vm0, %v1445_v55, 0.0  ;;  %v1315_v39 = vmul.f32 %v2953_v45, %v1278_v13  ;;  %v1603_v37 = vsel %vm452_vm0, %v1546_v52, 0.0  ;;  %v1280_v19 = vld [vmem:[#allocation2 + $0x1a1] sm:$0xff] }
  0xe3   : > { %v1447_v60 = vadd.f32 %v1415_v12, %v1346_v57  ;;  %v1144_v10 = vadd.f32 %v1112_v1, %v1043_v16  ;;  %v1503_v54 = vadd.f32 %v1502_v20, %v1501_v40  ;;  %v1012_v14 = vmul.f32 %v2912_v58, %v1277_v7 }
  0xe4   : > { %v842_v63 = vadd.f32 %v810_v47, %v741_v6  ;;  %v1547_v28 = vmul.f32 %v1446_v31, %v1446_v31  ;;  %v1416_v0 = vmul.f32 %v2960_v33, %v1379_v18  ;;  %v1113_v55 = vmul.f32 %v2919_v8, %v1378_v44  ;;  %v1380_v44 = vld [vmem:[#allocation2 + $0x19a] sm:$0xff] }
  0xe5   : > { %v2029_v22 = vpack.c.bf16 %v1447_v60, %v1447_v60  ;;  %v1246_v9 = vadd.f32 %v1214_v26, %v1144_v10  ;;  %v609_v61 = vmul.f32 %v2870_v25, %v3244_v30  ;;  %v710_v23 = vmul.f32 %v2881_v5, %v3253_v38 }
  0xe6   : > { %v943_v36 = vadd.f32 %v911_v56, %v842_v63  ;;  %v1604_v53 = vadd.f32 %v1603_v37, %v1602_v42  ;;  %v1504_v3 = vsel %vm452_vm0, %v1446_v31, 0.0  ;;  %v811_v17 = vmul.f32 %v2888_v46, %v3260_v2  ;;  %v1179_v31 = vld [vmem:[#allocation2 + $0x1a0] sm:$0xff] }
  0xe7   : > { %1783 = vst.msk [vmem:[%s2487_s27 + $0x70] sm:$0xf] %vm1754_vm2, %v2029_v22  ;;  %v1347_v7 = vadd.f32 %v1315_v39, %v1246_v9  ;;  %v1215_v62 = vmul.f32 %v2940_v27, %v1178_v21  ;;  %v742_v48 = vadd.f32 %v710_v23, %v609_v61  ;;  %v912_v25 = vmul.f32 %v2904_v34, %v1177_v11 }
  0xe8   : > { %v1044_v43 = vadd.f32 %v1012_v14, %v943_v36  ;;  %v1505_v30 = vadd.f32 %v1504_v3, %v1503_v54  ;;  %v1605_v5 = vsel %vm452_vm0, %v1547_v28, 0.0  ;;  %v1548_v38 = vmul.f32 %v1447_v60, %v1447_v60 }
  0xe9   : > { %v1448_v4 = vadd.f32 %v1416_v0, %v1347_v7  ;;  %v1316_v49 = vmul.f32 %v2953_v45, %v1279_v59  ;;  %v843_v51 = vadd.f32 %v811_v17, %v742_v48  ;;  %v1013_v29 = vmul.f32 %v2912_v58, %v1278_v13  ;;  %v1381_v13 = vld [vmem:[#allocation2 + $0x1a2] sm:$0xff] }
  0xea   : > { %v1145_v24 = vadd.f32 %v1113_v55, %v1044_v43  ;;  %v1606_v46 = vadd.f32 %v1605_v5, %v1604_v53  ;;  %v1417_v40 = vmul.f32 %v2960_v33, %v1380_v44  ;;  %v1506_v12 = vsel %vm452_vm0, %v1447_v60, 0.0 }
  0xeb   : > { %v2030_v2 = vpack.c.bf16 %v1448_v4, %v1448_v4  ;;  %v944_v11 = vadd.f32 %v912_v25, %v843_v51  ;;  %v1114_v50 = vmul.f32 %v2919_v8, %v1379_v18  ;;  %v1507_v35 = vadd.f32 %v1506_v12, %v1505_v30 }
  0xec   : > { %v1247_v34 = vadd.f32 %v1215_v62, %v1145_v24  ;;  %v1607_v1 = vsel %vm452_vm0, %v1548_v38, 0.0  ;;  %v1549_v32 = vmul.f32 %v1448_v4, %v1448_v4  ;;  %v1216_v15 = vmul.f32 %v2940_v27, %v1179_v31 }
  0xed   : > { %1784 = vst.msk [vmem:[%s2487_s27 + $0x74] sm:$0xf] %vm1754_vm2, %v2030_v2  ;;  %v1045_v58 = vadd.f32 %v1013_v29, %v944_v11  ;;  %v1608_v41 = vadd.f32 %v1607_v1, %v1606_v46  ;;  %v1508_v57 = vsel %vm452_vm0, %v1448_v4, 0.0  ;;  %v1317_v8 = vmul.f32 %v2953_v45, %v1280_v19 }
  0xee   : > { %v1348_v52 = vadd.f32 %v1316_v49, %v1247_v34  ;;  %v1509_v47 = vadd.f32 %v1508_v57, %v1507_v35  ;;  %v1418_v42 = vmul.f32 %v2960_v33, %v1381_v13  ;;  %v1609_v18 = vsel %vm452_vm0, %v1549_v32, 0.0 }
  0xef   : > { %v1146_v26 = vadd.f32 %v1114_v50, %v1045_v58  ;;  %v1610_v60 = vadd.f32 %v1609_v18, %v1608_v41 }
  0xf0   : > { %v1449_v16 = vadd.f32 %v1417_v40, %v1348_v52 }
  0xf1   : > { %v1248_v20 = vadd.f32 %v1216_v15, %v1146_v26 }
  0xf2   : > { %v1550_v6 = vmul.f32 %v1449_v16, %v1449_v16  ;;  %v2031_v56 = vpack.c.bf16 %v1449_v16, %v1449_v16  ;;  %v1510_v27 = vsel %vm452_vm0, %v1449_v16, 0.0 }
  0xf3   : > { %v1349_v10 = vadd.f32 %v1317_v8, %v1248_v20  ;;  %v1511_v39 = vadd.f32 %v1510_v27, %v1509_v47 }
  0xf4   : > { %1785 = vst.msk [vmem:[%s2487_s27 + $0x78] sm:$0xf] %vm1754_vm2, %v2031_v56  ;;  %v1611_v54 = vsel %vm452_vm0, %v1550_v6, 0.0 }
  0xf5   : > { %v1450_v37 = vadd.f32 %v1418_v42, %v1349_v10  ;;  %v1612_v45 = vadd.f32 %v1611_v54, %v1610_v60 }
  0xf7   : > { %v1512_v63 = vsel %vm452_vm0, %v1450_v37, 0.0  ;;  %v1551_v33 = vmul.f32 %v1450_v37, %v1450_v37  ;;  %v2032_v14 = vpack.c.bf16 %v1450_v37, %v1450_v37 }
  0xf8   : > { %v1513_v28 = vadd.f32 %v1512_v63, %v1511_v39 }
  0xf9   : > { %1786 = vst.msk [vmem:[%s2487_s27 + $0x7c] sm:$0xf] %vm1754_vm2, %v2032_v14  ;;  %v1613_v22 = vsel %vm452_vm0, %v1551_v33, 0.0 }
  0xfa   : > { %v1514_v9 = vrot.slane %v1513_v28, 4  ;;  %v1614_v0 = vadd.f32 %v1613_v22, %v1612_v45 }
  0xfc   : > { %v1515_v21 = vadd.f32 %v1514_v9, %v1513_v28  ;;  %v1615_v36 = vrot.slane %v1614_v0, 4 }
  0xfe   : > { %v1516_v55 = vrot.slane %v1515_v21, 2  ;;  %v1616_v61 = vadd.f32 %v1615_v36, %v1614_v0 }
 0x100   : > { %v1517_v23 = vadd.f32 %v1516_v55, %v1515_v21  ;;  %v1617_v53 = vrot.slane %v1616_v61, 2 }
 0x102   : > { %v1518_v3 = vrot.slane %v1517_v23, 1  ;;  %v1618_v7 = vadd.f32 %v1617_v53, %v1616_v61 }
 0x104   : > { %v1619_v59 = vrot.slane %v1618_v7, 1  ;;  %v1519_v17 = vadd.f32 %v1518_v3, %v1517_v23 }
 0x106   : > { %v1620_v43 = vadd.f32 %v1619_v59, %v1618_v7 }
 0x108   : > { %v1622_v62 = vsel %vm1621_vm3, %v1519_v17, %v1620_v43 }
 0x109   : > { %v1624_v44 = vsel %vm1623_vm4, %v1622_v62, 0.0 }
 0x10a   : > { %1625 = vst.msk [vmem:[%s281_s30] sm:$0xff] %vm452_vm0, %v1624_v44 }
 0x10b PF: > { %s15_s17 = sadd.s32 1, %s2170_s17   ;;  %s3353_s15 = smov %s2166_s16 }
 0x10c   : > { %p12_p5 = scmp.ge.s32.totalorder %s15_s17, 4   ;;  %s3354_s16 = smov %s3356_s18 }
 0x10e   :  { %14 = sbr.rel (!%p12_p5) target bundleno = 2 (0x2), region = 82 }

</bundles_post_ra>
